<compile_context>
chip_gen: v7x
topology: tpu7x:2x2x1
jax: 0.10.0
libtpu: 0.0.40
codegen_flags: <defaults>
</compile_context>

<pallas_src>
import functools

import jax
import jax.numpy as jnp
from jax.experimental import pallas as pl
from jax.experimental.pallas import tpu as pltpu


_VMEM_LIMIT = 32 * 1024 * 1024   # explicit scoped-VMEM cap; safe on v5e/v6e/v7x


@functools.lru_cache(maxsize=1)
def _mm_tiles():
    """Matmul tile defaults: 512 on v5e/v6e (128 MiB VMEM, ~85% HBM roofline),
    256 on v7x (64 MiB VMEM part)."""
    try:
        kind = jax.devices()[0].device_kind.lower()
    except Exception:
        kind = ""
    if "v7" in kind:
        return 256, 256, 512
    return 512, 512, 512


def _tile(dim, pref, align):
    """Largest tile <= pref that is a multiple of `align` and divides `dim`.

    Falls back to the full dim (always a legal block).  Model dims here are
    kept 8/128-friendly by construction (hidden dim is zero-padded to 128)."""
    if dim <= pref:
        return dim
    t = (pref // align) * align
    while t >= align:
        if dim % t == 0:
            return t
        t -= align
    return dim


# --------------------- patch embedding (+ fused pos-emb) --------------------

def _patch_pos_kernel(x_ref, w_ref, pos_ref, o_ref, acc_ref):
    @pl.when(pl.program_id(3) == 0)
    def _init():
        acc_ref[...] = jnp.zeros_like(acc_ref)

    acc_ref[...] += jnp.dot(x_ref[...], w_ref[...],
                            preferred_element_type=jnp.float32)

    @pl.when(pl.program_id(3) == pl.num_programs(3) - 1)
    def _done():
        o_ref[...] = (acc_ref[...]
                      + pos_ref[...].astype(jnp.float32)).astype(o_ref.dtype)


def patch_embed_pos(xp, w, pos, *, batch, n_tokens):
    """[B*N, C*P*P] @ [C*P*P, dim] with the position embedding added in the
    epilogue (pos block indexed independently of the batch grid axis)."""
    M, K = xp.shape
    _, Dout = w.shape
    pm, pn, pk = _mm_tiles()
    tm = _tile(n_tokens, pm, 8)
    tn = _tile(Dout, pn, 128)
    tk = _tile(K, pk, 128)
    nb = n_tokens // tm                      # row blocks per image
    return pl.pallas_call(
        _patch_pos_kernel,
        out_shape=jax.ShapeDtypeStruct((M, Dout), xp.dtype),
        grid=(batch, nb, Dout // tn, K // tk),
        in_specs=[pl.BlockSpec((tm, tk), lambda b, i, j, k: (b * nb + i, k)),
                  pl.BlockSpec((tk, tn), lambda b, i, j, k: (k, j)),
                  pl.BlockSpec((tm, tn), lambda b, i, j, k: (i, j))],
        out_specs=pl.BlockSpec((tm, tn), lambda b, i, j, k: (b * nb + i, j)),
        scratch_shapes=[pltpu.VMEM((tm, tn), jnp.float32)],
        compiler_params=pltpu.CompilerParams(
            dimension_semantics=("parallel", "parallel", "parallel", "arbitrary"),
            vmem_limit_bytes=_VMEM_LIMIT),
    )(xp, w, pos.reshape(n_tokens, Dout))


# ------------------------------- LayerNorm ----------------------------------

def _layernorm_kernel(x_ref, g_ref, b_ref, o_ref, *, eps):
    x = x_ref[...].astype(jnp.float32)
    mu = jnp.mean(x, axis=-1, keepdims=True)
    var = jnp.mean(jnp.square(x - mu), axis=-1, keepdims=True)
    y = (x - mu) * jax.lax.rsqrt(var + eps)
    o_ref[...] = (y * g_ref[...] + b_ref[...]).astype(o_ref.dtype)


def layernorm(x, g, b, *, eps=1e-5, tm=512):
    """Row-tiled standalone LayerNorm (norm_pre: its output is also the first
    residual, so it cannot be folded into the first layer's QKV kernel)."""
    M, D = x.shape
    tm = _tile(M, tm, 8)
    return pl.pallas_call(
        functools.partial(_layernorm_kernel, eps=eps),
        out_shape=jax.ShapeDtypeStruct((M, D), x.dtype),
        grid=(M // tm,),
        in_specs=[pl.BlockSpec((tm, D), lambda i: (i, 0)),
                  pl.BlockSpec((1, D), lambda i: (0, 0)),
                  pl.BlockSpec((1, D), lambda i: (0, 0))],
        out_specs=pl.BlockSpec((tm, D), lambda i: (i, 0)),
        compiler_params=pltpu.CompilerParams(
            dimension_semantics=("parallel",),
            vmem_limit_bytes=_VMEM_LIMIT),
    )(x, g.reshape(1, D), b.reshape(1, D))


# -------------------- fused LayerNorm -> matmul (QKV proj) ------------------

def _ln_matmul_kernel(x_ref, g_ref, b_ref, w_ref, o_ref, xn_ref, *, eps):
    # LN computed once per row block (j == 0) into VMEM scratch, reused for the
    # remaining N tiles of this row block.
    @pl.when(pl.program_id(1) == 0)
    def _ln():
        x = x_ref[...].astype(jnp.float32)
        mu = jnp.mean(x, axis=-1, keepdims=True)
        var = jnp.mean(jnp.square(x - mu), axis=-1, keepdims=True)
        xn_ref[...] = ((x - mu) * jax.lax.rsqrt(var + eps)
                       * g_ref[...] + b_ref[...]).astype(xn_ref.dtype)

    o_ref[...] = jnp.dot(xn_ref[...], w_ref[...],
                         preferred_element_type=jnp.float32).astype(o_ref.dtype)


def ln_matmul(x, g, b, w, *, eps=1e-5):
    """LayerNorm(x) @ w with the output (N) axis tiled; emits one fused array
    (here the [M, 3*inner] QKV projection, q/k/v bias-free)."""
    M, D = x.shape
    N = w.shape[1]
    pm, pn, _ = _mm_tiles()
    tm = _tile(M, min(pm, 256), 8)
    tn = _tile(N, pn, 128)
    return pl.pallas_call(
        functools.partial(_ln_matmul_kernel, eps=eps),
        out_shape=jax.ShapeDtypeStruct((M, N), x.dtype),
        grid=(M // tm, N // tn),
        in_specs=[pl.BlockSpec((tm, D), lambda i, j: (i, 0)),
                  pl.BlockSpec((1, D), lambda i, j: (0, 0)),
                  pl.BlockSpec((1, D), lambda i, j: (0, 0)),
                  pl.BlockSpec((D, tn), lambda i, j: (0, j))],
        out_specs=pl.BlockSpec((tm, tn), lambda i, j: (i, j)),
        scratch_shapes=[pltpu.VMEM((tm, D), x.dtype)],
        compiler_params=pltpu.CompilerParams(
            dimension_semantics=("parallel", "arbitrary"),
            vmem_limit_bytes=_VMEM_LIMIT),
    )(x, g.reshape(1, D), b.reshape(1, D), w)


# -------------------------------- attention ---------------------------------

def _attn_kernel(q_ref, k_ref, v_ref, o_ref, *, num_head, dim_head, scale):
    """Query-tiled attention.  q/k/v stay lane-dense [tq|S, H*Dh] in the input
    dtype (bf16 inputs hit the native bf16 MXU path); only softmax statistics
    are f32.  Each head's result is stored directly into its lane slice."""
    q = q_ref[0] * jnp.asarray(scale, q_ref.dtype)     # pre-scale q (O(tq*Dh*H))
    k = k_ref[0]
    v = v_ref[0]
    for h in range(num_head):
        lo, hi = h * dim_head, (h + 1) * dim_head
        # q @ k^T via dot_general on the last dims (no materialized transpose).
        s = jax.lax.dot_general(q[:, lo:hi], k[:, lo:hi],
                                (((1,), (1,)), ((), ())),
                                preferred_element_type=jnp.float32)
        s = s - jnp.max(s, axis=-1, keepdims=True)      # stable softmax (f32)
        p = jnp.exp(s)
        p = p * pl.reciprocal(jnp.sum(p, axis=-1, keepdims=True), approx=True)
        o_ref[0, :, lo:hi] = jnp.dot(p.astype(v.dtype), v[:, lo:hi],
                                     preferred_element_type=jnp.float32
                                     ).astype(o_ref.dtype)


def attention_core(qkv, *, num_head, dim_head, scale, tq=256):
    """qkv is the fused [B, S, 3*inner] projection; q/k/v windows are read via
    three BlockSpecs on the same array (block offsets 0 / inner / 2*inner)."""
    B, S, three_inner = qkv.shape
    inner = three_inner // 3
    assert inner % 128 == 0, "num_head*dim_head must be a multiple of 128"
    tq = _tile(S, tq, 8)
    q_spec = pl.BlockSpec((1, tq, inner), lambda b, qi: (b, qi, 0))
    k_spec = pl.BlockSpec((1, S, inner), lambda b, qi: (b, 0, 1))
    v_spec = pl.BlockSpec((1, S, inner), lambda b, qi: (b, 0, 2))
    o_spec = pl.BlockSpec((1, tq, inner), lambda b, qi: (b, qi, 0))
    return pl.pallas_call(
        functools.partial(_attn_kernel, num_head=num_head, dim_head=dim_head,
                          scale=scale),
        out_shape=jax.ShapeDtypeStruct((B, S, inner), qkv.dtype),
        grid=(B, S // tq),
        in_specs=[q_spec, k_spec, v_spec],
        out_specs=o_spec,
        compiler_params=pltpu.CompilerParams(
            dimension_semantics=("parallel", "parallel"),
            vmem_limit_bytes=_VMEM_LIMIT),
    )(qkv, qkv, qkv)


# ------------------- matmul + bias + residual (out proj) --------------------

def _proj_res_kernel(a_ref, w_ref, b_ref, r_ref, o_ref, acc_ref):
    @pl.when(pl.program_id(2) == 0)
    def _init():
        acc_ref[...] = jnp.zeros_like(acc_ref)

    acc_ref[...] += jnp.dot(a_ref[...], w_ref[...],
                            preferred_element_type=jnp.float32)

    @pl.when(pl.program_id(2) == pl.num_programs(2) - 1)
    def _done():
        o_ref[...] = (acc_ref[...] + b_ref[...]
                      + r_ref[...].astype(jnp.float32)).astype(o_ref.dtype)


def proj_bias_residual(a, w, b, res):
    M, K = a.shape
    _, N = w.shape
    pm, pn, pk = _mm_tiles()
    tm = _tile(M, pm, 8)
    tn = _tile(N, pn, 128)
    tk = _tile(K, pk, 128)
    return pl.pallas_call(
        _proj_res_kernel,
        out_shape=jax.ShapeDtypeStruct((M, N), a.dtype),
        grid=(M // tm, N // tn, K // tk),
        in_specs=[pl.BlockSpec((tm, tk), lambda i, j, k: (i, k)),
                  pl.BlockSpec((tk, tn), lambda i, j, k: (k, j)),
                  pl.BlockSpec((1, tn), lambda i, j, k: (0, j)),
                  pl.BlockSpec((tm, tn), lambda i, j, k: (i, j))],
        out_specs=pl.BlockSpec((tm, tn), lambda i, j, k: (i, j)),
        scratch_shapes=[pltpu.VMEM((tm, tn), jnp.float32)],
        compiler_params=pltpu.CompilerParams(
            dimension_semantics=("parallel", "parallel", "arbitrary"),
            vmem_limit_bytes=_VMEM_LIMIT),
    )(a, w, b.reshape(1, N), res)


# --------------------- fused LN -> SwiGLU FFN -> +residual ------------------

def _ln_swiglu_kernel(x_ref, g_ref, b_ref, w1_ref, b1_ref, w2_ref, b2_ref,
                      w3_ref, b3_ref, r_ref, o_ref, xn_ref, acc_ref, *, eps):
    j = pl.program_id(1)

    # LayerNorm hoisted out of the hidden-tile reduction: computed once per row
    # block into VMEM scratch and reused for every hidden tile.
    @pl.when(j == 0)
    def _init():
        x = x_ref[...].astype(jnp.float32)
        mu = jnp.mean(x, axis=-1, keepdims=True)
        var = jnp.mean(jnp.square(x - mu), axis=-1, keepdims=True)
        xn_ref[...] = ((x - mu) * jax.lax.rsqrt(var + eps)
                       * g_ref[...] + b_ref[...]).astype(xn_ref.dtype)
        acc_ref[...] = jnp.zeros_like(acc_ref)

    xn = xn_ref[...]
    h1 = jnp.dot(xn, w1_ref[...], preferred_element_type=jnp.float32) + b1_ref[...]
    h2 = jnp.dot(xn, w2_ref[...], preferred_element_type=jnp.float32) + b2_ref[...]
    hgate = (h1 * jax.nn.sigmoid(h1)) * h2                      # SiLU(x1) * x2
    acc_ref[...] += jnp.dot(hgate.astype(xn.dtype), w3_ref[...],
                            preferred_element_type=jnp.float32)

    @pl.when(j == pl.num_programs(1) - 1)
    def _done():
        o_ref[...] = (acc_ref[...] + b3_ref[...]
                      + r_ref[...].astype(jnp.float32)).astype(o_ref.dtype)


def ln_swiglu_residual(x, g, b, w1, b1, w2, b2, w3, b3, res, *, eps=1e-5,
                       tm=128, th=128):
    M, D = x.shape
    H = w1.shape[1]
    Do = w3.shape[1]
    tm = _tile(M, tm, 8)
    th = _tile(H, th, 128)       # th=128 keeps h1/h2/gate f32 set inside 64 vregs
    return pl.pallas_call(
        functools.partial(_ln_swiglu_kernel, eps=eps),
        out_shape=jax.ShapeDtypeStruct((M, Do), x.dtype),
        grid=(M // tm, H // th),
        in_specs=[pl.BlockSpec((tm, D), lambda i, j: (i, 0)),
                  pl.BlockSpec((1, D), lambda i, j: (0, 0)),
                  pl.BlockSpec((1, D), lambda i, j: (0, 0)),
                  pl.BlockSpec((D, th), lambda i, j: (0, j)),
                  pl.BlockSpec((1, th), lambda i, j: (0, j)),
                  pl.BlockSpec((D, th), lambda i, j: (0, j)),
                  pl.BlockSpec((1, th), lambda i, j: (0, j)),
                  pl.BlockSpec((th, Do), lambda i, j: (j, 0)),
                  pl.BlockSpec((1, Do), lambda i, j: (0, 0)),
                  pl.BlockSpec((tm, Do), lambda i, j: (i, 0))],
        out_specs=pl.BlockSpec((tm, Do), lambda i, j: (i, 0)),
        scratch_shapes=[pltpu.VMEM((tm, D), x.dtype),
                        pltpu.VMEM((tm, Do), jnp.float32)],
        compiler_params=pltpu.CompilerParams(
            dimension_semantics=("parallel", "arbitrary"),
            vmem_limit_bytes=_VMEM_LIMIT),
    )(x, g.reshape(1, D), b.reshape(1, D), w1, b1.reshape(1, H), w2,
      b2.reshape(1, H), w3, b3.reshape(1, Do), res)


# ------------------------ parameter init (synthetic) ------------------------

def _xavier(key, shape):
    fan_in, fan_out = shape
    lim = (6.0 / (fan_in + fan_out)) ** 0.5
    return jax.random.uniform(key, shape, jnp.float32, -lim, lim)


def init_encoder_params(key, *, image_size, patch_size, dim, depth, num_head,
                        dim_head, mlp_dim, in_channels):
    num_patches = (image_size // patch_size) ** 2
    inner = num_head * dim_head
    # SwiGLUFFNFused: hidden_features = (int(mlp_dim * 2/3) + 7) // 8 * 8
    hidden = ((int(mlp_dim * 2 / 3) + 7) // 8) * 8
    # Zero-pad hidden to a 128 multiple for lane-dense tiling.  Exact: padded
    # columns give silu(0)*0 = 0 and the matching w3 rows are zero.
    hidden_pad = ((hidden + 127) // 128) * 128

    def pad_cols(a):
        return jnp.pad(a, ((0, 0), (0, hidden_pad - a.shape[1])))

    def pad_rows(a):
        return jnp.pad(a, ((0, hidden_pad - a.shape[0]), (0, 0)))

    keys = jax.random.split(key, 2 + depth)
    params = {}
    # Conv2d(in_ch, dim, k=stride=P, bias=False) flattened to [C*P*P, dim]
    params["patch_w"] = jax.random.normal(
        keys[0], (in_channels * patch_size * patch_size, dim), jnp.float32) * 0.02
    params["pos_emb"] = jax.random.normal(
        keys[1], (1, num_patches, dim), jnp.float32) * dim ** (-0.5)
    params["norm_pre_g"] = jnp.ones((dim,), jnp.float32)
    params["norm_pre_b"] = jnp.zeros((dim,), jnp.float32)
    layers = []
    for i in range(depth):
        lk = jax.random.split(keys[2 + i], 7)
        wq = _xavier(lk[0], (dim, inner))
        wk = _xavier(lk[1], (dim, inner))
        wv = _xavier(lk[2], (dim, inner))
        layers.append(dict(
            norm1_g=jnp.ones((dim,), jnp.float32),
            norm1_b=jnp.zeros((dim,), jnp.float32),
            wqkv=jnp.concatenate([wq, wk, wv], axis=1),     # fused [D, 3*inner]
            wo=_xavier(lk[3], (inner, dim)), bo=jnp.zeros((dim,), jnp.float32),
            norm2_g=jnp.ones((dim,), jnp.float32),
            norm2_b=jnp.zeros((dim,), jnp.float32),
            w1=pad_cols(_xavier(lk[4], (dim, hidden))),
            b1=jnp.zeros((hidden_pad,), jnp.float32),
            w2=pad_cols(_xavier(lk[5], (dim, hidden))),
            b2=jnp.zeros((hidden_pad,), jnp.float32),
            w3=pad_rows(_xavier(lk[6], (hidden, dim))),
            b3=jnp.zeros((dim,), jnp.float32),
        ))
    params["layers"] = layers
    return params


# ------------------------------ forward pass -------------------------------

def encoder_forward(params, x, slots, *, patch_size, num_head, dim_head):
    B, C, Himg, Wimg = x.shape
    P = patch_size
    Hp, Wp = Himg // P, Wimg // P
    N = Hp * Wp
    # patchify: b c (hp p1) (wp p2) -> (b hp wp) (c p1 p2)   == Conv2d stride=P
    xp = x.reshape(B, C, Hp, P, Wp, P).transpose(0, 2, 4, 1, 3, 5) \
          .reshape(B * N, C * P * P)
    # patch embedding with the position-embedding add fused into the epilogue
    tokens = patch_embed_pos(xp, params["patch_w"], params["pos_emb"],
                             batch=B, n_tokens=N)               # [B*N, dim]
    dim = tokens.shape[-1]
    h = jnp.concatenate([tokens.reshape(B, N, dim), slots], axis=1)
    Bq, S, D = h.shape
    # norm_pre output is also the first layer's residual -> standalone kernel.
    h = layernorm(h.reshape(Bq * S, D),
                  params["norm_pre_g"], params["norm_pre_b"]).reshape(Bq, S, D)

    inner = num_head * dim_head
    scale = dim_head ** (-0.5)
    for lp in params["layers"]:
        hf = h.reshape(Bq * S, D)
        # x = attn1(norm1(x)) + x  -- LN fused into the (N-tiled) QKV projection;
        # attention reads q/k/v windows of the fused array; residual add fused
        # into the output-projection epilogue.
        qkv = ln_matmul(hf, lp["norm1_g"], lp["norm1_b"], lp["wqkv"])
        o = attention_core(qkv.reshape(Bq, S, 3 * inner),
                           num_head=num_head, dim_head=dim_head, scale=scale)
        hf = proj_bias_residual(o.reshape(Bq * S, inner), lp["wo"], lp["bo"], hf)
        # x = ffnet(norm2(x)) + x  -- LN (hoisted) + SwiGLU + residual, one kernel.
        hf = ln_swiglu_residual(hf, lp["norm2_g"], lp["norm2_b"],
                                lp["w1"], lp["b1"], lp["w2"], lp["b2"],
                                lp["w3"], lp["b3"], hf)
        h = hf.reshape(Bq, S, D)
    return h


# ----------------------------------- main -----------------------------------

if __name__ == "__main__":
    key = jax.random.PRNGKey(0)
    k_x, k_slots, k_params = jax.random.split(key, 3)

    # small, shape-consistent config
    image_size, patch_size, in_channels = 16, 4, 4
    dim, depth, num_head, dim_head, mlp_dim = 32, 2, 4, 32, 64
    num_slots, batch = 8, 2

    x = jax.random.normal(k_x, (batch, in_channels, image_size, image_size),
                          jnp.float32)
    slots = jax.random.normal(k_slots, (batch, num_slots, dim), jnp.float32)

    params = init_encoder_params(
        k_params, image_size=image_size, patch_size=patch_size, dim=dim,
        depth=depth, num_head=num_head, dim_head=dim_head, mlp_dim=mlp_dim,
        in_channels=in_channels)

    fwd = jax.jit(functools.partial(encoder_forward, patch_size=patch_size,
                                    num_head=num_head, dim_head=dim_head))
    out = fwd(params, x, slots)
    jax.block_until_ready(out)

    num_patches = (image_size // patch_size) ** 2
    assert out.shape == (batch, num_patches + num_slots, dim)
    assert bool(jnp.all(jnp.isfinite(out)))
    print("KERNEL_OK")
</pallas_src>

<mosaic_0001>
module attributes {stable_mosaic.version = 11 : i64} {
  func.func @_patch_pos_kernel(%arg0: i32, %arg1: i32, %arg2: i32, %arg3: i32, %arg4: memref<16x64xf32, #tpu.memory_space<vmem>>, %arg5: memref<64x32xf32, #tpu.memory_space<vmem>>, %arg6: memref<16x32xf32, #tpu.memory_space<vmem>>, %arg7: memref<16x32xf32, #tpu.memory_space<vmem>>, %arg8: memref<16x32xf32, #tpu.memory_space<vmem>>) attributes {dimension_semantics = [#tpu.dimension_semantics<parallel>, #tpu.dimension_semantics<parallel>, #tpu.dimension_semantics<parallel>, #tpu.dimension_semantics<arbitrary>], iteration_bounds = array<i64: 2, 1, 1, 1>, scalar_prefetch = 0 : i64, scratch_operands = 1 : i64, tpu.core_type = #tpu.core_type<tc>, window_params = [{transform_indices = @transform_0, window_bounds = array<i64: 16, 64>}, {transform_indices = @transform_1, window_bounds = array<i64: 64, 32>}, {transform_indices = @transform_2, window_bounds = array<i64: 16, 32>}, {transform_indices = @transform_3, window_bounds = array<i64: 16, 32>}]} {
    %c0_i32 = arith.constant 0 : i32
    %0 = arith.cmpi eq, %arg3, %c0_i32 : i32
    %1 = arith.extui %0 : i1 to i32
    %c0_i32_0 = arith.constant 0 : i32
    %2 = arith.cmpi ne, %1, %c0_i32_0 : i32
    scf.if %2 {
      %cst_10 = arith.constant 0.000000e+00 : f32
      %12 = vector.broadcast %cst_10 : f32 to vector<16x32xf32>
      %c0_11 = arith.constant 0 : index
      %c0_12 = arith.constant 0 : index
      %13 = vector.load %arg8[%c0_11, %c0_12] : memref<16x32xf32, #tpu.memory_space<vmem>>, vector<16x32xf32>
      tpu.vector_store %arg8[%c0_11, %c0_12], %12 {strides = array<i32>} : memref<16x32xf32, #tpu.memory_space<vmem>>, vector<16x32xf32>,
    } else {
    }
    %c0 = arith.constant 0 : index
    %c0_1 = arith.constant 0 : index
    %3 = vector.load %arg8[%c0, %c0_1] : memref<16x32xf32, #tpu.memory_space<vmem>>, vector<16x32xf32>
    %c0_2 = arith.constant 0 : index
    %c0_3 = arith.constant 0 : index
    %4 = vector.load %arg4[%c0_2, %c0_3] : memref<16x64xf32, #tpu.memory_space<vmem>>, vector<16x64xf32>
    %c0_4 = arith.constant 0 : index
    %c0_5 = arith.constant 0 : index
    %5 = vector.load %arg5[%c0_4, %c0_5] : memref<64x32xf32, #tpu.memory_space<vmem>>, vector<64x32xf32>
    %cst = arith.constant dense<0.000000e+00> : vector<16x32xf32>
    %6 = tpu.matmul %4, %5, %cst {dimension_numbers = #tpu.dot_dimension_numbers<[1], [0], [0], [1], [0, 0, 1, 1], [], []>} : vector<16x64xf32>, vector<64x32xf32>, vector<16x32xf32> -> vector<16x32xf32>
    %7 = arith.addf %3, %6 : vector<16x32xf32>
    %c0_6 = arith.constant 0 : index
    %c0_7 = arith.constant 0 : index
    %8 = vector.load %arg8[%c0_6, %c0_7] : memref<16x32xf32, #tpu.memory_space<vmem>>, vector<16x32xf32>
    tpu.vector_store %arg8[%c0_6, %c0_7], %7 {strides = array<i32>} : memref<16x32xf32, #tpu.memory_space<vmem>>, vector<16x32xf32>,
    %c0_i32_8 = arith.constant 0 : i32
    %9 = arith.cmpi eq, %arg3, %c0_i32_8 : i32
    %10 = arith.extui %9 : i1 to i32
    %c0_i32_9 = arith.constant 0 : i32
    %11 = arith.cmpi ne, %10, %c0_i32_9 : i32
    scf.if %11 {
      %c0_10 = arith.constant 0 : index
      %c0_11 = arith.constant 0 : index
      %12 = vector.load %arg8[%c0_10, %c0_11] : memref<16x32xf32, #tpu.memory_space<vmem>>, vector<16x32xf32>
      %c0_12 = arith.constant 0 : index
      %c0_13 = arith.constant 0 : index
      %13 = vector.load %arg6[%c0_12, %c0_13] : memref<16x32xf32, #tpu.memory_space<vmem>>, vector<16x32xf32>
      %14 = arith.addf %12, %13 : vector<16x32xf32>
      %c0_14 = arith.constant 0 : index
      %c0_15 = arith.constant 0 : index
      %15 = vector.load %arg7[%c0_14, %c0_15] : memref<16x32xf32, #tpu.memory_space<vmem>>, vector<16x32xf32>
      tpu.vector_store %arg7[%c0_14, %c0_15], %14 {strides = array<i32>} : memref<16x32xf32, #tpu.memory_space<vmem>>, vector<16x32xf32>,
    } else {
    }
    return
  }
  func.func @transform_0(%arg0: i32, %arg1: i32, %arg2: i32, %arg3: i32) -> (i32, i32) {
    %c1_i32 = arith.constant 1 : i32
    %0 = arith.muli %arg0, %c1_i32 : i32
    %1 = arith.addi %0, %arg1 : i32
    %c0_i32 = arith.constant 0 : i32
    return %1, %arg3 : i32, i32
  }
  func.func @transform_1(%arg0: i32, %arg1: i32, %arg2: i32, %arg3: i32) -> (i32, i32) {
    %c0_i32 = arith.constant 0 : i32
    return %arg3, %arg2 : i32, i32
  }
  func.func @transform_2(%arg0: i32, %arg1: i32, %arg2: i32, %arg3: i32) -> (i32, i32) {
    %c0_i32 = arith.constant 0 : i32
    return %arg1, %arg2 : i32, i32
  }
  func.func @transform_3(%arg0: i32, %arg1: i32, %arg2: i32, %arg3: i32) -> (i32, i32) {
    %c1_i32 = arith.constant 1 : i32
    %0 = arith.muli %arg0, %c1_i32 : i32
    %1 = arith.addi %0, %arg1 : i32
    %c0_i32 = arith.constant 0 : i32
    return %1, %arg2 : i32, i32
  }
}

module attributes {stable_mosaic.version = 11 : i64} {
  func.func @_layernorm_kernel(%arg0: i32, %arg1: memref<48x32xf32, #tpu.memory_space<vmem>>, %arg2: memref<1x32xf32, #tpu.memory_space<vmem>>, %arg3: memref<1x32xf32, #tpu.memory_space<vmem>>, %arg4: memref<48x32xf32, #tpu.memory_space<vmem>>) attributes {dimension_semantics = [#tpu.dimension_semantics<parallel>], iteration_bounds = array<i64: 1>, scalar_prefetch = 0 : i64, scratch_operands = 0 : i64, tpu.core_type = #tpu.core_type<tc>, window_params = [{transform_indices = @transform_0, window_bounds = array<i64: 48, 32>}, {pipeline_mode = #tpu.pipeline_mode<synchronous>, transform_indices = @transform_1, window_bounds = array<i64: 1, 32>}, {pipeline_mode = #tpu.pipeline_mode<synchronous>, transform_indices = @transform_2, window_bounds = array<i64: 1, 32>}, {transform_indices = @transform_3, window_bounds = array<i64: 48, 32>}]} {
    %c0 = arith.constant 0 : index
    %c0_0 = arith.constant 0 : index
    %0 = vector.load %arg1[%c0, %c0_0] : memref<48x32xf32, #tpu.memory_space<vmem>>, vector<48x32xf32>
    %cst = arith.constant dense<0.000000e+00> : vector<48xf32>
    %1 = vector.multi_reduction <add>, %0, %cst [1] : vector<48x32xf32> to vector<48xf32>
    %2 = vector.shape_cast %1 : vector<48xf32> to vector<48x1xf32>
    %cst_1 = arith.constant 3.200000e+01 : f32
    %3 = vector.broadcast %cst_1 : f32 to vector<48x1xf32>
    %4 = arith.divf %2, %3 : vector<48x1xf32>
    %5 = vector.broadcast %4 : vector<48x1xf32> to vector<48x32xf32>
    %6 = arith.subf %0, %5 : vector<48x32xf32>
    %7 = arith.mulf %6, %6 : vector<48x32xf32>
    %cst_2 = arith.constant dense<0.000000e+00> : vector<48xf32>
    %8 = vector.multi_reduction <add>, %7, %cst_2 [1] : vector<48x32xf32> to vector<48xf32>
    %9 = vector.shape_cast %8 : vector<48xf32> to vector<48x1xf32>
    %cst_3 = arith.constant 3.200000e+01 : f32
    %10 = vector.broadcast %cst_3 : f32 to vector<48x1xf32>
    %11 = arith.divf %9, %10 : vector<48x1xf32>
    %12 = vector.broadcast %4 : vector<48x1xf32> to vector<48x32xf32>
    %13 = arith.subf %0, %12 : vector<48x32xf32>
    %cst_4 = arith.constant 9.99999974E-6 : f32
    %14 = vector.broadcast %cst_4 : f32 to vector<48x1xf32>
    %15 = arith.addf %11, %14 : vector<48x1xf32>
    %16 = math.rsqrt %15 : vector<48x1xf32>
    %17 = vector.broadcast %16 : vector<48x1xf32> to vector<48x32xf32>
    %18 = arith.mulf %13, %17 : vector<48x32xf32>
    %c0_5 = arith.constant 0 : index
    %c0_6 = arith.constant 0 : index
    %19 = vector.load %arg2[%c0_5, %c0_6] : memref<1x32xf32, #tpu.memory_space<vmem>>, vector<1x32xf32>
    %20 = vector.broadcast %19 : vector<1x32xf32> to vector<48x32xf32>
    %21 = arith.mulf %18, %20 : vector<48x32xf32>
    %c0_7 = arith.constant 0 : index
    %c0_8 = arith.constant 0 : index
    %22 = vector.load %arg3[%c0_7, %c0_8] : memref<1x32xf32, #tpu.memory_space<vmem>>, vector<1x32xf32>
    %23 = vector.broadcast %22 : vector<1x32xf32> to vector<48x32xf32>
    %24 = arith.addf %21, %23 : vector<48x32xf32>
    %c0_9 = arith.constant 0 : index
    %c0_10 = arith.constant 0 : index
    %25 = vector.load %arg4[%c0_9, %c0_10] : memref<48x32xf32, #tpu.memory_space<vmem>>, vector<48x32xf32>
    tpu.vector_store %arg4[%c0_9, %c0_10], %24 {strides = array<i32>} : memref<48x32xf32, #tpu.memory_space<vmem>>, vector<48x32xf32>,
    return
  }
  func.func @transform_0(%arg0: i32) -> (i32, i32) {
    %c0_i32 = arith.constant 0 : i32
    %c0_i32_0 = arith.constant 0 : i32
    return %arg0, %c0_i32 : i32, i32
  }
  func.func @transform_1(%arg0: i32) -> (i32, i32) {
    %c0_i32 = arith.constant 0 : i32
    %c0_i32_0 = arith.constant 0 : i32
    %c0_i32_1 = arith.constant 0 : i32
    return %c0_i32, %c0_i32_0 : i32, i32
  }
  func.func @transform_2(%arg0: i32) -> (i32, i32) {
    %c0_i32 = arith.constant 0 : i32
    %c0_i32_0 = arith.constant 0 : i32
    %c0_i32_1 = arith.constant 0 : i32
    return %c0_i32, %c0_i32_0 : i32, i32
  }
  func.func @transform_3(%arg0: i32) -> (i32, i32) {
    %c0_i32 = arith.constant 0 : i32
    %c0_i32_0 = arith.constant 0 : i32
    return %arg0, %c0_i32 : i32, i32
  }
}

module attributes {stable_mosaic.version = 11 : i64} {
  func.func @_ln_matmul_kernel(%arg0: i32, %arg1: i32, %arg2: memref<48x32xf32, #tpu.memory_space<vmem>>, %arg3: memref<1x32xf32, #tpu.memory_space<vmem>>, %arg4: memref<1x32xf32, #tpu.memory_space<vmem>>, %arg5: memref<32x384xf32, #tpu.memory_space<vmem>>, %arg6: memref<48x384xf32, #tpu.memory_space<vmem>>, %arg7: memref<48x32xf32, #tpu.memory_space<vmem>>) attributes {dimension_semantics = [#tpu.dimension_semantics<parallel>, #tpu.dimension_semantics<arbitrary>], iteration_bounds = array<i64: 1, 1>, scalar_prefetch = 0 : i64, scratch_operands = 1 : i64, tpu.core_type = #tpu.core_type<tc>, window_params = [{transform_indices = @transform_0, window_bounds = array<i64: 48, 32>}, {pipeline_mode = #tpu.pipeline_mode<synchronous>, transform_indices = @transform_1, window_bounds = array<i64: 1, 32>}, {pipeline_mode = #tpu.pipeline_mode<synchronous>, transform_indices = @transform_2, window_bounds = array<i64: 1, 32>}, {transform_indices = @transform_3, window_bounds = array<i64: 32, 384>}, {transform_indices = @transform_4, window_bounds = array<i64: 48, 384>}]} {
    %c0_i32 = arith.constant 0 : i32
    %0 = arith.cmpi eq, %arg1, %c0_i32 : i32
    %1 = arith.extui %0 : i1 to i32
    %c0_i32_0 = arith.constant 0 : i32
    %2 = arith.cmpi ne, %1, %c0_i32_0 : i32
    scf.if %2 {
      %c0_6 = arith.constant 0 : index
      %c0_7 = arith.constant 0 : index
      %7 = vector.load %arg2[%c0_6, %c0_7] : memref<48x32xf32, #tpu.memory_space<vmem>>, vector<48x32xf32>
      %cst_8 = arith.constant dense<0.000000e+00> : vector<48xf32>
      %8 = vector.multi_reduction <add>, %7, %cst_8 [1] : vector<48x32xf32> to vector<48xf32>
      %9 = vector.shape_cast %8 : vector<48xf32> to vector<48x1xf32>
      %cst_9 = arith.constant 3.200000e+01 : f32
      %10 = vector.broadcast %cst_9 : f32 to vector<48x1xf32>
      %11 = arith.divf %9, %10 : vector<48x1xf32>
      %12 = vector.broadcast %11 : vector<48x1xf32> to vector<48x32xf32>
      %13 = arith.subf %7, %12 : vector<48x32xf32>
      %14 = arith.mulf %13, %13 : vector<48x32xf32>
      %cst_10 = arith.constant dense<0.000000e+00> : vector<48xf32>
      %15 = vector.multi_reduction <add>, %14, %cst_10 [1] : vector<48x32xf32> to vector<48xf32>
      %16 = vector.shape_cast %15 : vector<48xf32> to vector<48x1xf32>
      %cst_11 = arith.constant 3.200000e+01 : f32
      %17 = vector.broadcast %cst_11 : f32 to vector<48x1xf32>
      %18 = arith.divf %16, %17 : vector<48x1xf32>
      %19 = vector.broadcast %11 : vector<48x1xf32> to vector<48x32xf32>
      %20 = arith.subf %7, %19 : vector<48x32xf32>
      %cst_12 = arith.constant 9.99999974E-6 : f32
      %21 = vector.broadcast %cst_12 : f32 to vector<48x1xf32>
      %22 = arith.addf %18, %21 : vector<48x1xf32>
      %23 = math.rsqrt %22 : vector<48x1xf32>
      %24 = vector.broadcast %23 : vector<48x1xf32> to vector<48x32xf32>
      %25 = arith.mulf %20, %24 : vector<48x32xf32>
      %c0_13 = arith.constant 0 : index
      %c0_14 = arith.constant 0 : index
      %26 = vector.load %arg3[%c0_13, %c0_14] : memref<1x32xf32, #tpu.memory_space<vmem>>, vector<1x32xf32>
      %27 = vector.broadcast %26 : vector<1x32xf32> to vector<48x32xf32>
      %28 = arith.mulf %25, %27 : vector<48x32xf32>
      %c0_15 = arith.constant 0 : index
      %c0_16 = arith.constant 0 : index
      %29 = vector.load %arg4[%c0_15, %c0_16] : memref<1x32xf32, #tpu.memory_space<vmem>>, vector<1x32xf32>
      %30 = vector.broadcast %29 : vector<1x32xf32> to vector<48x32xf32>
      %31 = arith.addf %28, %30 : vector<48x32xf32>
      %c0_17 = arith.constant 0 : index
      %c0_18 = arith.constant 0 : index
      %32 = vector.load %arg7[%c0_17, %c0_18] : memref<48x32xf32, #tpu.memory_space<vmem>>, vector<48x32xf32>
      tpu.vector_store %arg7[%c0_17, %c0_18], %31 {strides = array<i32>} : memref<48x32xf32, #tpu.memory_space<vmem>>, vector<48x32xf32>,
    } else {
    }
    %c0 = arith.constant 0 : index
    %c0_1 = arith.constant 0 : index
    %3 = vector.load %arg7[%c0, %c0_1] : memref<48x32xf32, #tpu.memory_space<vmem>>, vector<48x32xf32>
    %c0_2 = arith.constant 0 : index
    %c0_3 = arith.constant 0 : index
    %4 = vector.load %arg5[%c0_2, %c0_3] : memref<32x384xf32, #tpu.memory_space<vmem>>, vector<32x384xf32>
    %cst = arith.constant dense<0.000000e+00> : vector<48x384xf32>
    %5 = tpu.matmul %3, %4, %cst {dimension_numbers = #tpu.dot_dimension_numbers<[1], [0], [0], [1], [0, 0, 1, 1], [], []>} : vector<48x32xf32>, vector<32x384xf32>, vector<48x384xf32> -> vector<48x384xf32>
    %c0_4 = arith.constant 0 : index
    %c0_5 = arith.constant 0 : index
    %6 = vector.load %arg6[%c0_4, %c0_5] : memref<48x384xf32, #tpu.memory_space<vmem>>, vector<48x384xf32>
    tpu.vector_store %arg6[%c0_4, %c0_5], %5 {strides = array<i32>} : memref<48x384xf32, #tpu.memory_space<vmem>>, vector<48x384xf32>,
    return
  }
  func.func @transform_0(%arg0: i32, %arg1: i32) -> (i32, i32) {
    %c0_i32 = arith.constant 0 : i32
    %c0_i32_0 = arith.constant 0 : i32
    return %arg0, %c0_i32 : i32, i32
  }
  func.func @transform_1(%arg0: i32, %arg1: i32) -> (i32, i32) {
    %c0_i32 = arith.constant 0 : i32
    %c0_i32_0 = arith.constant 0 : i32
    %c0_i32_1 = arith.constant 0 : i32
    return %c0_i32, %c0_i32_0 : i32, i32
  }
  func.func @transform_2(%arg0: i32, %arg1: i32) -> (i32, i32) {
    %c0_i32 = arith.constant 0 : i32
    %c0_i32_0 = arith.constant 0 : i32
    %c0_i32_1 = arith.constant 0 : i32
    return %c0_i32, %c0_i32_0 : i32, i32
  }
  func.func @transform_3(%arg0: i32, %arg1: i32) -> (i32, i32) {
    %c0_i32 = arith.constant 0 : i32
    %c0_i32_0 = arith.constant 0 : i32
    return %c0_i32, %arg1 : i32, i32
  }
  func.func @transform_4(%arg0: i32, %arg1: i32) -> (i32, i32) {
    %c0_i32 = arith.constant 0 : i32
    return %arg0, %arg1 : i32, i32
  }
}

module attributes {stable_mosaic.version = 11 : i64} {
  func.func @_attn_kernel(%arg0: i32, %arg1: i32, %arg2: memref<1x24x128xf32, #tpu.memory_space<vmem>>, %arg3: memref<1x24x128xf32, #tpu.memory_space<vmem>>, %arg4: memref<1x24x128xf32, #tpu.memory_space<vmem>>, %arg5: memref<1x24x128xf32, #tpu.memory_space<vmem>>) attributes {dimension_semantics = [#tpu.dimension_semantics<parallel>, #tpu.dimension_semantics<parallel>], iteration_bounds = array<i64: 2, 1>, scalar_prefetch = 0 : i64, scratch_operands = 0 : i64, tpu.core_type = #tpu.core_type<tc>, window_params = [{transform_indices = @transform_0, window_bounds = array<i64: 1, 24, 128>}, {transform_indices = @transform_1, window_bounds = array<i64: 1, 24, 128>}, {transform_indices = @transform_2, window_bounds = array<i64: 1, 24, 128>}, {transform_indices = @transform_3, window_bounds = array<i64: 1, 24, 128>}]} {
    %c0 = arith.constant 0 : index
    %c0_0 = arith.constant 0 : index
    %c0_1 = arith.constant 0 : index
    %0 = vector.load %arg2[%c0, %c0_0, %c0_1] : memref<1x24x128xf32, #tpu.memory_space<vmem>>, vector<1x24x128xf32>
    %1 = vector.shape_cast %0 : vector<1x24x128xf32> to vector<24x128xf32>
    %cst = arith.constant 0.176776692 : f32
    %2 = vector.broadcast %cst : f32 to vector<24x128xf32>
    %3 = arith.mulf %1, %2 : vector<24x128xf32>
    %c0_2 = arith.constant 0 : index
    %c0_3 = arith.constant 0 : index
    %c0_4 = arith.constant 0 : index
    %4 = vector.load %arg3[%c0_2, %c0_3, %c0_4] : memref<1x24x128xf32, #tpu.memory_space<vmem>>, vector<1x24x128xf32>
    %5 = vector.shape_cast %4 : vector<1x24x128xf32> to vector<24x128xf32>
    %c0_5 = arith.constant 0 : index
    %c0_6 = arith.constant 0 : index
    %c0_7 = arith.constant 0 : index
    %6 = vector.load %arg4[%c0_5, %c0_6, %c0_7] : memref<1x24x128xf32, #tpu.memory_space<vmem>>, vector<1x24x128xf32>
    %7 = vector.shape_cast %6 : vector<1x24x128xf32> to vector<24x128xf32>
    %8 = vector.extract_strided_slice %3 {offsets = [0, 0], sizes = [24, 32], strides = [1, 1]} : vector<24x128xf32> to vector<24x32xf32>
    %9 = vector.extract_strided_slice %5 {offsets = [0, 0], sizes = [24, 32], strides = [1, 1]} : vector<24x128xf32> to vector<24x32xf32>
    %cst_8 = arith.constant dense<0.000000e+00> : vector<24x24xf32>
    %10 = tpu.matmul %8, %9, %cst_8 {dimension_numbers = #tpu.dot_dimension_numbers<[1], [1], [0], [0], [0, 0, 1, 0], [], []>} : vector<24x32xf32>, vector<24x32xf32>, vector<24x24xf32> -> vector<24x24xf32>
    %cst_9 = arith.constant dense<0xFF800000> : vector<24xf32>
    %11 = vector.multi_reduction <maximumf>, %10, %cst_9 [1] : vector<24x24xf32> to vector<24xf32>
    %12 = vector.shape_cast %11 : vector<24xf32> to vector<24x1xf32>
    %13 = vector.broadcast %12 : vector<24x1xf32> to vector<24x24xf32>
    %14 = arith.subf %10, %13 : vector<24x24xf32>
    %15 = math.exp %14 : vector<24x24xf32>
    %cst_10 = arith.constant dense<0.000000e+00> : vector<24xf32>
    %16 = vector.multi_reduction <add>, %15, %cst_10 [1] : vector<24x24xf32> to vector<24xf32>
    %17 = vector.shape_cast %16 : vector<24xf32> to vector<24x1xf32>
    %18 = tpu.reciprocal %17 {approx = true} : vector<24x1xf32> -> vector<24x1xf32>
    %19 = vector.broadcast %18 : vector<24x1xf32> to vector<24x24xf32>
    %20 = arith.mulf %15, %19 : vector<24x24xf32>
    %21 = vector.extract_strided_slice %7 {offsets = [0, 0], sizes = [24, 32], strides = [1, 1]} : vector<24x128xf32> to vector<24x32xf32>
    %cst_11 = arith.constant dense<0.000000e+00> : vector<24x32xf32>
    %22 = tpu.matmul %20, %21, %cst_11 {dimension_numbers = #tpu.dot_dimension_numbers<[1], [0], [0], [1], [0, 0, 1, 1], [], []>} : vector<24x24xf32>, vector<24x32xf32>, vector<24x32xf32> -> vector<24x32xf32>
    %c0_12 = arith.constant 0 : index
    %c0_13 = arith.constant 0 : index
    %c0_14 = arith.constant 0 : index
    %23 = vector.load %arg5[%c0_12, %c0_13, %c0_14] : memref<1x24x128xf32, #tpu.memory_space<vmem>>, vector<1x24x32xf32>
    %24 = vector.shape_cast %23 : vector<1x24x32xf32> to vector<24x32xf32>
    %25 = vector.shape_cast %22 : vector<24x32xf32> to vector<1x24x32xf32>
    tpu.vector_store %arg5[%c0_12, %c0_13, %c0_14], %25 {strides = array<i32>} : memref<1x24x128xf32, #tpu.memory_space<vmem>>, vector<1x24x32xf32>,
    %26 = vector.extract_strided_slice %3 {offsets = [0, 32], sizes = [24, 32], strides = [1, 1]} : vector<24x128xf32> to vector<24x32xf32>
    %27 = vector.extract_strided_slice %5 {offsets = [0, 32], sizes = [24, 32], strides = [1, 1]} : vector<24x128xf32> to vector<24x32xf32>
    %cst_15 = arith.constant dense<0.000000e+00> : vector<24x24xf32>
    %28 = tpu.matmul %26, %27, %cst_15 {dimension_numbers = #tpu.dot_dimension_numbers<[1], [1], [0], [0], [0, 0, 1, 0], [], []>} : vector<24x32xf32>, vector<24x32xf32>, vector<24x24xf32> -> vector<24x24xf32>
    %cst_16 = arith.constant dense<0xFF800000> : vector<24xf32>
    %29 = vector.multi_reduction <maximumf>, %28, %cst_16 [1] : vector<24x24xf32> to vector<24xf32>
    %30 = vector.shape_cast %29 : vector<24xf32> to vector<24x1xf32>
    %31 = vector.broadcast %30 : vector<24x1xf32> to vector<24x24xf32>
    %32 = arith.subf %28, %31 : vector<24x24xf32>
    %33 = math.exp %32 : vector<24x24xf32>
    %cst_17 = arith.constant dense<0.000000e+00> : vector<24xf32>
    %34 = vector.multi_reduction <add>, %33, %cst_17 [1] : vector<24x24xf32> to vector<24xf32>
    %35 = vector.shape_cast %34 : vector<24xf32> to vector<24x1xf32>
    %36 = tpu.reciprocal %35 {approx = true} : vector<24x1xf32> -> vector<24x1xf32>
    %37 = vector.broadcast %36 : vector<24x1xf32> to vector<24x24xf32>
    %38 = arith.mulf %33, %37 : vector<24x24xf32>
    %39 = vector.extract_strided_slice %7 {offsets = [0, 32], sizes = [24, 32], strides = [1, 1]} : vector<24x128xf32> to vector<24x32xf32>
    %cst_18 = arith.constant dense<0.000000e+00> : vector<24x32xf32>
    %40 = tpu.matmul %38, %39, %cst_18 {dimension_numbers = #tpu.dot_dimension_numbers<[1], [0], [0], [1], [0, 0, 1, 1], [], []>} : vector<24x24xf32>, vector<24x32xf32>, vector<24x32xf32> -> vector<24x32xf32>
    %c0_19 = arith.constant 0 : index
    %c0_20 = arith.constant 0 : index
    %c32 = arith.constant 32 : index
    %41 = vector.load %arg5[%c0_19, %c0_20, %c32] : memref<1x24x128xf32, #tpu.memory_space<vmem>>, vector<1x24x32xf32>
    %42 = vector.shape_cast %41 : vector<1x24x32xf32> to vector<24x32xf32>
    %43 = vector.shape_cast %40 : vector<24x32xf32> to vector<1x24x32xf32>
    tpu.vector_store %arg5[%c0_19, %c0_20, %c32], %43 {strides = array<i32>} : memref<1x24x128xf32, #tpu.memory_space<vmem>>, vector<1x24x32xf32>,
    %44 = vector.extract_strided_slice %3 {offsets = [0, 64], sizes = [24, 32], strides = [1, 1]} : vector<24x128xf32> to vector<24x32xf32>
    %45 = vector.extract_strided_slice %5 {offsets = [0, 64], sizes = [24, 32], strides = [1, 1]} : vector<24x128xf32> to vector<24x32xf32>
    %cst_21 = arith.constant dense<0.000000e+00> : vector<24x24xf32>
    %46 = tpu.matmul %44, %45, %cst_21 {dimension_numbers = #tpu.dot_dimension_numbers<[1], [1], [0], [0], [0, 0, 1, 0], [], []>} : vector<24x32xf32>, vector<24x32xf32>, vector<24x24xf32> -> vector<24x24xf32>
    %cst_22 = arith.constant dense<0xFF800000> : vector<24xf32>
    %47 = vector.multi_reduction <maximumf>, %46, %cst_22 [1] : vector<24x24xf32> to vector<24xf32>
    %48 = vector.shape_cast %47 : vector<24xf32> to vector<24x1xf32>
    %49 = vector.broadcast %48 : vector<24x1xf32> to vector<24x24xf32>
    %50 = arith.subf %46, %49 : vector<24x24xf32>
    %51 = math.exp %50 : vector<24x24xf32>
    %cst_23 = arith.constant dense<0.000000e+00> : vector<24xf32>
    %52 = vector.multi_reduction <add>, %51, %cst_23 [1] : vector<24x24xf32> to vector<24xf32>
    %53 = vector.shape_cast %52 : vector<24xf32> to vector<24x1xf32>
    %54 = tpu.reciprocal %53 {approx = true} : vector<24x1xf32> -> vector<24x1xf32>
    %55 = vector.broadcast %54 : vector<24x1xf32> to vector<24x24xf32>
    %56 = arith.mulf %51, %55 : vector<24x24xf32>
    %57 = vector.extract_strided_slice %7 {offsets = [0, 64], sizes = [24, 32], strides = [1, 1]} : vector<24x128xf32> to vector<24x32xf32>
    %cst_24 = arith.constant dense<0.000000e+00> : vector<24x32xf32>
    %58 = tpu.matmul %56, %57, %cst_24 {dimension_numbers = #tpu.dot_dimension_numbers<[1], [0], [0], [1], [0, 0, 1, 1], [], []>} : vector<24x24xf32>, vector<24x32xf32>, vector<24x32xf32> -> vector<24x32xf32>
    %c0_25 = arith.constant 0 : index
    %c0_26 = arith.constant 0 : index
    %c64 = arith.constant 64 : index
    %59 = vector.load %arg5[%c0_25, %c0_26, %c64] : memref<1x24x128xf32, #tpu.memory_space<vmem>>, vector<1x24x32xf32>
    %60 = vector.shape_cast %59 : vector<1x24x32xf32> to vector<24x32xf32>
    %61 = vector.shape_cast %58 : vector<24x32xf32> to vector<1x24x32xf32>
    tpu.vector_store %arg5[%c0_25, %c0_26, %c64], %61 {strides = array<i32>} : memref<1x24x128xf32, #tpu.memory_space<vmem>>, vector<1x24x32xf32>,
    %62 = vector.extract_strided_slice %3 {offsets = [0, 96], sizes = [24, 32], strides = [1, 1]} : vector<24x128xf32> to vector<24x32xf32>
    %63 = vector.extract_strided_slice %5 {offsets = [0, 96], sizes = [24, 32], strides = [1, 1]} : vector<24x128xf32> to vector<24x32xf32>
    %cst_27 = arith.constant dense<0.000000e+00> : vector<24x24xf32>
    %64 = tpu.matmul %62, %63, %cst_27 {dimension_numbers = #tpu.dot_dimension_numbers<[1], [1], [0], [0], [0, 0, 1, 0], [], []>} : vector<24x32xf32>, vector<24x32xf32>, vector<24x24xf32> -> vector<24x24xf32>
    %cst_28 = arith.constant dense<0xFF800000> : vector<24xf32>
    %65 = vector.multi_reduction <maximumf>, %64, %cst_28 [1] : vector<24x24xf32> to vector<24xf32>
    %66 = vector.shape_cast %65 : vector<24xf32> to vector<24x1xf32>
    %67 = vector.broadcast %66 : vector<24x1xf32> to vector<24x24xf32>
    %68 = arith.subf %64, %67 : vector<24x24xf32>
    %69 = math.exp %68 : vector<24x24xf32>
    %cst_29 = arith.constant dense<0.000000e+00> : vector<24xf32>
    %70 = vector.multi_reduction <add>, %69, %cst_29 [1] : vector<24x24xf32> to vector<24xf32>
    %71 = vector.shape_cast %70 : vector<24xf32> to vector<24x1xf32>
    %72 = tpu.reciprocal %71 {approx = true} : vector<24x1xf32> -> vector<24x1xf32>
    %73 = vector.broadcast %72 : vector<24x1xf32> to vector<24x24xf32>
    %74 = arith.mulf %69, %73 : vector<24x24xf32>
    %75 = vector.extract_strided_slice %7 {offsets = [0, 96], sizes = [24, 32], strides = [1, 1]} : vector<24x128xf32> to vector<24x32xf32>
    %cst_30 = arith.constant dense<0.000000e+00> : vector<24x32xf32>
    %76 = tpu.matmul %74, %75, %cst_30 {dimension_numbers = #tpu.dot_dimension_numbers<[1], [0], [0], [1], [0, 0, 1, 1], [], []>} : vector<24x24xf32>, vector<24x32xf32>, vector<24x32xf32> -> vector<24x32xf32>
    %c0_31 = arith.constant 0 : index
    %c0_32 = arith.constant 0 : index
    %c96 = arith.constant 96 : index
    %77 = vector.load %arg5[%c0_31, %c0_32, %c96] : memref<1x24x128xf32, #tpu.memory_space<vmem>>, vector<1x24x32xf32>
    %78 = vector.shape_cast %77 : vector<1x24x32xf32> to vector<24x32xf32>
    %79 = vector.shape_cast %76 : vector<24x32xf32> to vector<1x24x32xf32>
    tpu.vector_store %arg5[%c0_31, %c0_32, %c96], %79 {strides = array<i32>} : memref<1x24x128xf32, #tpu.memory_space<vmem>>, vector<1x24x32xf32>,
    return
  }
  func.func @transform_0(%arg0: i32, %arg1: i32) -> (i32, i32, i32) {
    %c0_i32 = arith.constant 0 : i32
    %c0_i32_0 = arith.constant 0 : i32
    return %arg0, %arg1, %c0_i32 : i32, i32, i32
  }
  func.func @transform_1(%arg0: i32, %arg1: i32) -> (i32, i32, i32) {
    %c0_i32 = arith.constant 0 : i32
    %c1_i32 = arith.constant 1 : i32
    %c0_i32_0 = arith.constant 0 : i32
    return %arg0, %c0_i32, %c1_i32 : i32, i32, i32
  }
  func.func @transform_2(%arg0: i32, %arg1: i32) -> (i32, i32, i32) {
    %c0_i32 = arith.constant 0 : i32
    %c2_i32 = arith.constant 2 : i32
    %c0_i32_0 = arith.constant 0 : i32
    return %arg0, %c0_i32, %c2_i32 : i32, i32, i32
  }
  func.func @transform_3(%arg0: i32, %arg1: i32) -> (i32, i32, i32) {
    %c0_i32 = arith.constant 0 : i32
    %c0_i32_0 = arith.constant 0 : i32
    return %arg0, %arg1, %c0_i32 : i32, i32, i32
  }
}

module attributes {stable_mosaic.version = 11 : i64} {
  func.func @_proj_res_kernel(%arg0: i32, %arg1: i32, %arg2: i32, %arg3: memref<48x128xf32, #tpu.memory_space<vmem>>, %arg4: memref<128x32xf32, #tpu.memory_space<vmem>>, %arg5: memref<1x32xf32, #tpu.memory_space<vmem>>, %arg6: memref<48x32xf32, #tpu.memory_space<vmem>>, %arg7: memref<48x32xf32, #tpu.memory_space<vmem>>, %arg8: memref<48x32xf32, #tpu.memory_space<vmem>>) attributes {dimension_semantics = [#tpu.dimension_semantics<parallel>, #tpu.dimension_semantics<parallel>, #tpu.dimension_semantics<arbitrary>], iteration_bounds = array<i64: 1, 1, 1>, scalar_prefetch = 0 : i64, scratch_operands = 1 : i64, tpu.core_type = #tpu.core_type<tc>, window_params = [{transform_indices = @transform_0, window_bounds = array<i64: 48, 128>}, {transform_indices = @transform_1, window_bounds = array<i64: 128, 32>}, {transform_indices = @transform_2, window_bounds = array<i64: 1, 32>}, {transform_indices = @transform_3, window_bounds = array<i64: 48, 32>}, {transform_indices = @transform_4, window_bounds = array<i64: 48, 32>}]} {
    %c0_i32 = arith.constant 0 : i32
    %0 = arith.cmpi eq, %arg2, %c0_i32 : i32
    %1 = arith.extui %0 : i1 to i32
    %c0_i32_0 = arith.constant 0 : i32
    %2 = arith.cmpi ne, %1, %c0_i32_0 : i32
    scf.if %2 {
      %cst_10 = arith.constant 0.000000e+00 : f32
      %12 = vector.broadcast %cst_10 : f32 to vector<48x32xf32>
      %c0_11 = arith.constant 0 : index
      %c0_12 = arith.constant 0 : index
      %13 = vector.load %arg8[%c0_11, %c0_12] : memref<48x32xf32, #tpu.memory_space<vmem>>, vector<48x32xf32>
      tpu.vector_store %arg8[%c0_11, %c0_12], %12 {strides = array<i32>} : memref<48x32xf32, #tpu.memory_space<vmem>>, vector<48x32xf32>,
    } else {
    }
    %c0 = arith.constant 0 : index
    %c0_1 = arith.constant 0 : index
    %3 = vector.load %arg8[%c0, %c0_1] : memref<48x32xf32, #tpu.memory_space<vmem>>, vector<48x32xf32>
    %c0_2 = arith.constant 0 : index
    %c0_3 = arith.constant 0 : index
    %4 = vector.load %arg3[%c0_2, %c0_3] : memref<48x128xf32, #tpu.memory_space<vmem>>, vector<48x128xf32>
    %c0_4 = arith.constant 0 : index
    %c0_5 = arith.constant 0 : index
    %5 = vector.load %arg4[%c0_4, %c0_5] : memref<128x32xf32, #tpu.memory_space<vmem>>, vector<128x32xf32>
    %cst = arith.constant dense<0.000000e+00> : vector<48x32xf32>
    %6 = tpu.matmul %4, %5, %cst {dimension_numbers = #tpu.dot_dimension_numbers<[1], [0], [0], [1], [0, 0, 1, 1], [], []>} : vector<48x128xf32>, vector<128x32xf32>, vector<48x32xf32> -> vector<48x32xf32>
    %7 = arith.addf %3, %6 : vector<48x32xf32>
    %c0_6 = arith.constant 0 : index
    %c0_7 = arith.constant 0 : index
    %8 = vector.load %arg8[%c0_6, %c0_7] : memref<48x32xf32, #tpu.memory_space<vmem>>, vector<48x32xf32>
    tpu.vector_store %arg8[%c0_6, %c0_7], %7 {strides = array<i32>} : memref<48x32xf32, #tpu.memory_space<vmem>>, vector<48x32xf32>,
    %c0_i32_8 = arith.constant 0 : i32
    %9 = arith.cmpi eq, %arg2, %c0_i32_8 : i32
    %10 = arith.extui %9 : i1 to i32
    %c0_i32_9 = arith.constant 0 : i32
    %11 = arith.cmpi ne, %10, %c0_i32_9 : i32
    scf.if %11 {
      %c0_10 = arith.constant 0 : index
      %c0_11 = arith.constant 0 : index
      %12 = vector.load %arg8[%c0_10, %c0_11] : memref<48x32xf32, #tpu.memory_space<vmem>>, vector<48x32xf32>
      %c0_12 = arith.constant 0 : index
      %c0_13 = arith.constant 0 : index
      %13 = vector.load %arg5[%c0_12, %c0_13] : memref<1x32xf32, #tpu.memory_space<vmem>>, vector<1x32xf32>
      %14 = vector.broadcast %13 : vector<1x32xf32> to vector<48x32xf32>
      %15 = arith.addf %12, %14 : vector<48x32xf32>
      %c0_14 = arith.constant 0 : index
      %c0_15 = arith.constant 0 : index
      %16 = vector.load %arg6[%c0_14, %c0_15] : memref<48x32xf32, #tpu.memory_space<vmem>>, vector<48x32xf32>
      %17 = arith.addf %15, %16 : vector<48x32xf32>
      %c0_16 = arith.constant 0 : index
      %c0_17 = arith.constant 0 : index
      %18 = vector.load %arg7[%c0_16, %c0_17] : memref<48x32xf32, #tpu.memory_space<vmem>>, vector<48x32xf32>
      tpu.vector_store %arg7[%c0_16, %c0_17], %17 {strides = array<i32>} : memref<48x32xf32, #tpu.memory_space<vmem>>, vector<48x32xf32>,
    } else {
    }
    return
  }
  func.func @transform_0(%arg0: i32, %arg1: i32, %arg2: i32) -> (i32, i32) {
    %c0_i32 = arith.constant 0 : i32
    return %arg0, %arg2 : i32, i32
  }
  func.func @transform_1(%arg0: i32, %arg1: i32, %arg2: i32) -> (i32, i32) {
    %c0_i32 = arith.constant 0 : i32
    return %arg2, %arg1 : i32, i32
  }
  func.func @transform_2(%arg0: i32, %arg1: i32, %arg2: i32) -> (i32, i32) {
    %c0_i32 = arith.constant 0 : i32
    %c0_i32_0 = arith.constant 0 : i32
    return %c0_i32, %arg1 : i32, i32
  }
  func.func @transform_3(%arg0: i32, %arg1: i32, %arg2: i32) -> (i32, i32) {
    %c0_i32 = arith.constant 0 : i32
    return %arg0, %arg1 : i32, i32
  }
  func.func @transform_4(%arg0: i32, %arg1: i32, %arg2: i32) -> (i32, i32) {
    %c0_i32 = arith.constant 0 : i32
    return %arg0, %arg1 : i32, i32
  }
}

module attributes {stable_mosaic.version = 11 : i64} {
  func.func @_ln_swiglu_kernel(%arg0: i32, %arg1: i32, %arg2: memref<48x32xf32, #tpu.memory_space<vmem>>, %arg3: memref<1x32xf32, #tpu.memory_space<vmem>>, %arg4: memref<1x32xf32, #tpu.memory_space<vmem>>, %arg5: memref<32x128xf32, #tpu.memory_space<vmem>>, %arg6: memref<1x128xf32, #tpu.memory_space<vmem>>, %arg7: memref<32x128xf32, #tpu.memory_space<vmem>>, %arg8: memref<1x128xf32, #tpu.memory_space<vmem>>, %arg9: memref<128x32xf32, #tpu.memory_space<vmem>>, %arg10: memref<1x32xf32, #tpu.memory_space<vmem>>, %arg11: memref<48x32xf32, #tpu.memory_space<vmem>>, %arg12: memref<48x32xf32, #tpu.memory_space<vmem>>, %arg13: memref<48x32xf32, #tpu.memory_space<vmem>>, %arg14: memref<48x32xf32, #tpu.memory_space<vmem>>) attributes {dimension_semantics = [#tpu.dimension_semantics<parallel>, #tpu.dimension_semantics<arbitrary>], iteration_bounds = array<i64: 1, 1>, scalar_prefetch = 0 : i64, scratch_operands = 2 : i64, tpu.core_type = #tpu.core_type<tc>, window_params = [{transform_indices = @transform_0, window_bounds = array<i64: 48, 32>}, {pipeline_mode = #tpu.pipeline_mode<synchronous>, transform_indices = @transform_1, window_bounds = array<i64: 1, 32>}, {pipeline_mode = #tpu.pipeline_mode<synchronous>, transform_indices = @transform_2, window_bounds = array<i64: 1, 32>}, {transform_indices = @transform_3, window_bounds = array<i64: 32, 128>}, {transform_indices = @transform_4, window_bounds = array<i64: 1, 128>}, {transform_indices = @transform_5, window_bounds = array<i64: 32, 128>}, {transform_indices = @transform_6, window_bounds = array<i64: 1, 128>}, {transform_indices = @transform_7, window_bounds = array<i64: 128, 32>}, {pipeline_mode = #tpu.pipeline_mode<synchronous>, transform_indices = @transform_8, window_bounds = array<i64: 1, 32>}, {transform_indices = @transform_9, window_bounds = array<i64: 48, 32>}, {transform_indices = @transform_10, window_bounds = array<i64: 48, 32>}]} {
    %c0_i32 = arith.constant 0 : i32
    %0 = arith.cmpi eq, %arg1, %c0_i32 : i32
    %1 = arith.extui %0 : i1 to i32
    %c0_i32_0 = arith.constant 0 : i32
    %2 = arith.cmpi ne, %1, %c0_i32_0 : i32
    scf.if %2 {
      %c0_21 = arith.constant 0 : index
      %c0_22 = arith.constant 0 : index
      %29 = vector.load %arg2[%c0_21, %c0_22] : memref<48x32xf32, #tpu.memory_space<vmem>>, vector<48x32xf32>
      %cst_23 = arith.constant dense<0.000000e+00> : vector<48xf32>
      %30 = vector.multi_reduction <add>, %29, %cst_23 [1] : vector<48x32xf32> to vector<48xf32>
      %31 = vector.shape_cast %30 : vector<48xf32> to vector<48x1xf32>
      %cst_24 = arith.constant 3.200000e+01 : f32
      %32 = vector.broadcast %cst_24 : f32 to vector<48x1xf32>
      %33 = arith.divf %31, %32 : vector<48x1xf32>
      %34 = vector.broadcast %33 : vector<48x1xf32> to vector<48x32xf32>
      %35 = arith.subf %29, %34 : vector<48x32xf32>
      %36 = arith.mulf %35, %35 : vector<48x32xf32>
      %cst_25 = arith.constant dense<0.000000e+00> : vector<48xf32>
      %37 = vector.multi_reduction <add>, %36, %cst_25 [1] : vector<48x32xf32> to vector<48xf32>
      %38 = vector.shape_cast %37 : vector<48xf32> to vector<48x1xf32>
      %cst_26 = arith.constant 3.200000e+01 : f32
      %39 = vector.broadcast %cst_26 : f32 to vector<48x1xf32>
      %40 = arith.divf %38, %39 : vector<48x1xf32>
      %41 = vector.broadcast %33 : vector<48x1xf32> to vector<48x32xf32>
      %42 = arith.subf %29, %41 : vector<48x32xf32>
      %cst_27 = arith.constant 9.99999974E-6 : f32
      %43 = vector.broadcast %cst_27 : f32 to vector<48x1xf32>
      %44 = arith.addf %40, %43 : vector<48x1xf32>
      %45 = math.rsqrt %44 : vector<48x1xf32>
      %46 = vector.broadcast %45 : vector<48x1xf32> to vector<48x32xf32>
      %47 = arith.mulf %42, %46 : vector<48x32xf32>
      %c0_28 = arith.constant 0 : index
      %c0_29 = arith.constant 0 : index
      %48 = vector.load %arg3[%c0_28, %c0_29] : memref<1x32xf32, #tpu.memory_space<vmem>>, vector<1x32xf32>
      %49 = vector.broadcast %48 : vector<1x32xf32> to vector<48x32xf32>
      %50 = arith.mulf %47, %49 : vector<48x32xf32>
      %c0_30 = arith.constant 0 : index
      %c0_31 = arith.constant 0 : index
      %51 = vector.load %arg4[%c0_30, %c0_31] : memref<1x32xf32, #tpu.memory_space<vmem>>, vector<1x32xf32>
      %52 = vector.broadcast %51 : vector<1x32xf32> to vector<48x32xf32>
      %53 = arith.addf %50, %52 : vector<48x32xf32>
      %c0_32 = arith.constant 0 : index
      %c0_33 = arith.constant 0 : index
      %54 = vector.load %arg13[%c0_32, %c0_33] : memref<48x32xf32, #tpu.memory_space<vmem>>, vector<48x32xf32>
      tpu.vector_store %arg13[%c0_32, %c0_33], %53 {strides = array<i32>} : memref<48x32xf32, #tpu.memory_space<vmem>>, vector<48x32xf32>,
      %cst_34 = arith.constant 0.000000e+00 : f32
      %55 = vector.broadcast %cst_34 : f32 to vector<48x32xf32>
      %c0_35 = arith.constant 0 : index
      %c0_36 = arith.constant 0 : index
      %56 = vector.load %arg14[%c0_35, %c0_36] : memref<48x32xf32, #tpu.memory_space<vmem>>, vector<48x32xf32>
      tpu.vector_store %arg14[%c0_35, %c0_36], %55 {strides = array<i32>} : memref<48x32xf32, #tpu.memory_space<vmem>>, vector<48x32xf32>,
    } else {
    }
    %c0 = arith.constant 0 : index
    %c0_1 = arith.constant 0 : index
    %3 = vector.load %arg13[%c0, %c0_1] : memref<48x32xf32, #tpu.memory_space<vmem>>, vector<48x32xf32>
    %c0_2 = arith.constant 0 : index
    %c0_3 = arith.constant 0 : index
    %4 = vector.load %arg5[%c0_2, %c0_3] : memref<32x128xf32, #tpu.memory_space<vmem>>, vector<32x128xf32>
    %cst = arith.constant dense<0.000000e+00> : vector<48x128xf32>
    %5 = tpu.matmul %3, %4, %cst {dimension_numbers = #tpu.dot_dimension_numbers<[1], [0], [0], [1], [0, 0, 1, 1], [], []>} : vector<48x32xf32>, vector<32x128xf32>, vector<48x128xf32> -> vector<48x128xf32>
    %c0_4 = arith.constant 0 : index
    %c0_5 = arith.constant 0 : index
    %6 = vector.load %arg6[%c0_4, %c0_5] : memref<1x128xf32, #tpu.memory_space<vmem>>, vector<1x128xf32>
    %7 = vector.broadcast %6 : vector<1x128xf32> to vector<48x128xf32>
    %8 = arith.addf %5, %7 : vector<48x128xf32>
    %c0_6 = arith.constant 0 : index
    %c0_7 = arith.constant 0 : index
    %9 = vector.load %arg7[%c0_6, %c0_7] : memref<32x128xf32, #tpu.memory_space<vmem>>, vector<32x128xf32>
    %cst_8 = arith.constant dense<0.000000e+00> : vector<48x128xf32>
    %10 = tpu.matmul %3, %9, %cst_8 {dimension_numbers = #tpu.dot_dimension_numbers<[1], [0], [0], [1], [0, 0, 1, 1], [], []>} : vector<48x32xf32>, vector<32x128xf32>, vector<48x128xf32> -> vector<48x128xf32>
    %c0_9 = arith.constant 0 : index
    %c0_10 = arith.constant 0 : index
    %11 = vector.load %arg8[%c0_9, %c0_10] : memref<1x128xf32, #tpu.memory_space<vmem>>, vector<1x128xf32>
    %12 = vector.broadcast %11 : vector<1x128xf32> to vector<48x128xf32>
    %13 = arith.addf %10, %12 : vector<48x128xf32>
    %14 = arith.negf %8 : vector<48x128xf32>
    %15 = math.exp %14 : vector<48x128xf32>
    %cst_11 = arith.constant 1.000000e+00 : f32
    %16 = vector.broadcast %cst_11 : f32 to vector<48x128xf32>
    %17 = arith.addf %16, %15 : vector<48x128xf32>
    %18 = arith.divf %16, %17 : vector<48x128xf32>
    %19 = arith.mulf %8, %18 : vector<48x128xf32>
    %20 = arith.mulf %19, %13 : vector<48x128xf32>
    %c0_12 = arith.constant 0 : index
    %c0_13 = arith.constant 0 : index
    %21 = vector.load %arg14[%c0_12, %c0_13] : memref<48x32xf32, #tpu.memory_space<vmem>>, vector<48x32xf32>
    %c0_14 = arith.constant 0 : index
    %c0_15 = arith.constant 0 : index
    %22 = vector.load %arg9[%c0_14, %c0_15] : memref<128x32xf32, #tpu.memory_space<vmem>>, vector<128x32xf32>
    %cst_16 = arith.constant dense<0.000000e+00> : vector<48x32xf32>
    %23 = tpu.matmul %20, %22, %cst_16 {dimension_numbers = #tpu.dot_dimension_numbers<[1], [0], [0], [1], [0, 0, 1, 1], [], []>} : vector<48x128xf32>, vector<128x32xf32>, vector<48x32xf32> -> vector<48x32xf32>
    %24 = arith.addf %21, %23 : vector<48x32xf32>
    %c0_17 = arith.constant 0 : index
    %c0_18 = arith.constant 0 : index
    %25 = vector.load %arg14[%c0_17, %c0_18] : memref<48x32xf32, #tpu.memory_space<vmem>>, vector<48x32xf32>
    tpu.vector_store %arg14[%c0_17, %c0_18], %24 {strides = array<i32>} : memref<48x32xf32, #tpu.memory_space<vmem>>, vector<48x32xf32>,
    %c0_i32_19 = arith.constant 0 : i32
    %26 = arith.cmpi eq, %arg1, %c0_i32_19 : i32
    %27 = arith.extui %26 : i1 to i32
    %c0_i32_20 = arith.constant 0 : i32
    %28 = arith.cmpi ne, %27, %c0_i32_20 : i32
    scf.if %28 {
      %c0_21 = arith.constant 0 : index
      %c0_22 = arith.constant 0 : index
      %29 = vector.load %arg14[%c0_21, %c0_22] : memref<48x32xf32, #tpu.memory_space<vmem>>, vector<48x32xf32>
      %c0_23 = arith.constant 0 : index
      %c0_24 = arith.constant 0 : index
      %30 = vector.load %arg10[%c0_23, %c0_24] : memref<1x32xf32, #tpu.memory_space<vmem>>, vector<1x32xf32>
      %31 = vector.broadcast %30 : vector<1x32xf32> to vector<48x32xf32>
      %32 = arith.addf %29, %31 : vector<48x32xf32>
      %c0_25 = arith.constant 0 : index
      %c0_26 = arith.constant 0 : index
      %33 = vector.load %arg11[%c0_25, %c0_26] : memref<48x32xf32, #tpu.memory_space<vmem>>, vector<48x32xf32>
      %34 = arith.addf %32, %33 : vector<48x32xf32>
      %c0_27 = arith.constant 0 : index
      %c0_28 = arith.constant 0 : index
      %35 = vector.load %arg12[%c0_27, %c0_28] : memref<48x32xf32, #tpu.memory_space<vmem>>, vector<48x32xf32>
      tpu.vector_store %arg12[%c0_27, %c0_28], %34 {strides = array<i32>} : memref<48x32xf32, #tpu.memory_space<vmem>>, vector<48x32xf32>,
    } else {
    }
    return
  }
  func.func @transform_0(%arg0: i32, %arg1: i32) -> (i32, i32) {
    %c0_i32 = arith.constant 0 : i32
    %c0_i32_0 = arith.constant 0 : i32
    return %arg0, %c0_i32 : i32, i32
  }
  func.func @transform_1(%arg0: i32, %arg1: i32) -> (i32, i32) {
    %c0_i32 = arith.constant 0 : i32
    %c0_i32_0 = arith.constant 0 : i32
    %c0_i32_1 = arith.constant 0 : i32
    return %c0_i32, %c0_i32_0 : i32, i32
  }
  func.func @transform_2(%arg0: i32, %arg1: i32) -> (i32, i32) {
    %c0_i32 = arith.constant 0 : i32
    %c0_i32_0 = arith.constant 0 : i32
    %c0_i32_1 = arith.constant 0 : i32
    return %c0_i32, %c0_i32_0 : i32, i32
  }
  func.func @transform_3(%arg0: i32, %arg1: i32) -> (i32, i32) {
    %c0_i32 = arith.constant 0 : i32
    %c0_i32_0 = arith.constant 0 : i32
    return %c0_i32, %arg1 : i32, i32
  }
  func.func @transform_4(%arg0: i32, %arg1: i32) -> (i32, i32) {
    %c0_i32 = arith.constant 0 : i32
    %c0_i32_0 = arith.constant 0 : i32
    return %c0_i32, %arg1 : i32, i32
  }
  func.func @transform_5(%arg0: i32, %arg1: i32) -> (i32, i32) {
    %c0_i32 = arith.constant 0 : i32
    %c0_i32_0 = arith.constant 0 : i32
    return %c0_i32, %arg1 : i32, i32
  }
  func.func @transform_6(%arg0: i32, %arg1: i32) -> (i32, i32) {
    %c0_i32 = arith.constant 0 : i32
    %c0_i32_0 = arith.constant 0 : i32
    return %c0_i32, %arg1 : i32, i32
  }
  func.func @transform_7(%arg0: i32, %arg1: i32) -> (i32, i32) {
    %c0_i32 = arith.constant 0 : i32
    %c0_i32_0 = arith.constant 0 : i32
    return %arg1, %c0_i32 : i32, i32
  }
  func.func @transform_8(%arg0: i32, %arg1: i32) -> (i32, i32) {
    %c0_i32 = arith.constant 0 : i32
    %c0_i32_0 = arith.constant 0 : i32
    %c0_i32_1 = arith.constant 0 : i32
    return %c0_i32, %c0_i32_0 : i32, i32
  }
  func.func @transform_9(%arg0: i32, %arg1: i32) -> (i32, i32) {
    %c0_i32 = arith.constant 0 : i32
    %c0_i32_0 = arith.constant 0 : i32
    return %arg0, %c0_i32 : i32, i32
  }
  func.func @transform_10(%arg0: i32, %arg1: i32) -> (i32, i32) {
    %c0_i32 = arith.constant 0 : i32
    %c0_i32_0 = arith.constant 0 : i32
    return %arg0, %c0_i32 : i32, i32
  }
}

module attributes {stable_mosaic.version = 11 : i64} {
  func.func @_ln_swiglu_kernel(%arg0: i32, %arg1: i32, %arg2: memref<48x32xf32, #tpu.memory_space<vmem>>, %arg3: memref<1x32xf32, #tpu.memory_space<vmem>>, %arg4: memref<1x32xf32, #tpu.memory_space<vmem>>, %arg5: memref<32x128xf32, #tpu.memory_space<vmem>>, %arg6: memref<1x128xf32, #tpu.memory_space<vmem>>, %arg7: memref<32x128xf32, #tpu.memory_space<vmem>>, %arg8: memref<1x128xf32, #tpu.memory_space<vmem>>, %arg9: memref<128x32xf32, #tpu.memory_space<vmem>>, %arg10: memref<1x32xf32, #tpu.memory_space<vmem>>, %arg11: memref<48x32xf32, #tpu.memory_space<vmem>>, %arg12: memref<48x32xf32, #tpu.memory_space<vmem>>, %arg13: memref<48x32xf32, #tpu.memory_space<vmem>>, %arg14: memref<48x32xf32, #tpu.memory_space<vmem>>) attributes {dimension_semantics = [#tpu.dimension_semantics<parallel>, #tpu.dimension_semantics<arbitrary>], iteration_bounds = array<i64: 1, 1>, scalar_prefetch = 0 : i64, scratch_operands = 2 : i64, tpu.core_type = #tpu.core_type<tc>, window_params = [{transform_indices = @transform_0, window_bounds = array<i64: 48, 32>}, {pipeline_mode = #tpu.pipeline_mode<synchronous>, transform_indices = @transform_1, window_bounds = array<i64: 1, 32>}, {pipeline_mode = #tpu.pipeline_mode<synchronous>, transform_indices = @transform_2, window_bounds = array<i64: 1, 32>}, {transform_indices = @transform_3, window_bounds = array<i64: 32, 128>}, {transform_indices = @transform_4, window_bounds = array<i64: 1, 128>}, {transform_indices = @transform_5, window_bounds = array<i64: 32, 128>}, {transform_indices = @transform_6, window_bounds = array<i64: 1, 128>}, {transform_indices = @transform_7, window_bounds = array<i64: 128, 32>}, {pipeline_mode = #tpu.pipeline_mode<synchronous>, transform_indices = @transform_8, window_bounds = array<i64: 1, 32>}, {transform_indices = @transform_9, window_bounds = array<i64: 48, 32>}, {transform_indices = @transform_10, window_bounds = array<i64: 48, 32>}]} {
    %c0_i32 = arith.constant 0 : i32
    %0 = arith.cmpi eq, %arg1, %c0_i32 : i32
    %1 = arith.extui %0 : i1 to i32
    %c0_i32_0 = arith.constant 0 : i32
    %2 = arith.cmpi ne, %1, %c0_i32_0 : i32
    scf.if %2 {
      %c0_21 = arith.constant 0 : index
      %c0_22 = arith.constant 0 : index
      %29 = vector.load %arg2[%c0_21, %c0_22] : memref<48x32xf32, #tpu.memory_space<vmem>>, vector<48x32xf32>
      %cst_23 = arith.constant dense<0.000000e+00> : vector<48xf32>
      %30 = vector.multi_reduction <add>, %29, %cst_23 [1] : vector<48x32xf32> to vector<48xf32>
      %31 = vector.shape_cast %30 : vector<48xf32> to vector<48x1xf32>
      %cst_24 = arith.constant 3.200000e+01 : f32
      %32 = vector.broadcast %cst_24 : f32 to vector<48x1xf32>
      %33 = arith.divf %31, %32 : vector<48x1xf32>
      %34 = vector.broadcast %33 : vector<48x1xf32> to vector<48x32xf32>
      %35 = arith.subf %29, %34 : vector<48x32xf32>
      %36 = arith.mulf %35, %35 : vector<48x32xf32>
      %cst_25 = arith.constant dense<0.000000e+00> : vector<48xf32>
      %37 = vector.multi_reduction <add>, %36, %cst_25 [1] : vector<48x32xf32> to vector<48xf32>
      %38 = vector.shape_cast %37 : vector<48xf32> to vector<48x1xf32>
      %cst_26 = arith.constant 3.200000e+01 : f32
      %39 = vector.broadcast %cst_26 : f32 to vector<48x1xf32>
      %40 = arith.divf %38, %39 : vector<48x1xf32>
      %41 = vector.broadcast %33 : vector<48x1xf32> to vector<48x32xf32>
      %42 = arith.subf %29, %41 : vector<48x32xf32>
      %cst_27 = arith.constant 9.99999974E-6 : f32
      %43 = vector.broadcast %cst_27 : f32 to vector<48x1xf32>
      %44 = arith.addf %40, %43 : vector<48x1xf32>
      %45 = math.rsqrt %44 : vector<48x1xf32>
      %46 = vector.broadcast %45 : vector<48x1xf32> to vector<48x32xf32>
      %47 = arith.mulf %42, %46 : vector<48x32xf32>
      %c0_28 = arith.constant 0 : index
      %c0_29 = arith.constant 0 : index
      %48 = vector.load %arg3[%c0_28, %c0_29] : memref<1x32xf32, #tpu.memory_space<vmem>>, vector<1x32xf32>
      %49 = vector.broadcast %48 : vector<1x32xf32> to vector<48x32xf32>
      %50 = arith.mulf %47, %49 : vector<48x32xf32>
      %c0_30 = arith.constant 0 : index
      %c0_31 = arith.constant 0 : index
      %51 = vector.load %arg4[%c0_30, %c0_31] : memref<1x32xf32, #tpu.memory_space<vmem>>, vector<1x32xf32>
      %52 = vector.broadcast %51 : vector<1x32xf32> to vector<48x32xf32>
      %53 = arith.addf %50, %52 : vector<48x32xf32>
      %c0_32 = arith.constant 0 : index
      %c0_33 = arith.constant 0 : index
      %54 = vector.load %arg13[%c0_32, %c0_33] : memref<48x32xf32, #tpu.memory_space<vmem>>, vector<48x32xf32>
      tpu.vector_store %arg13[%c0_32, %c0_33], %53 {strides = array<i32>} : memref<48x32xf32, #tpu.memory_space<vmem>>, vector<48x32xf32>,
      %cst_34 = arith.constant 0.000000e+00 : f32
      %55 = vector.broadcast %cst_34 : f32 to vector<48x32xf32>
      %c0_35 = arith.constant 0 : index
      %c0_36 = arith.constant 0 : index
      %56 = vector.load %arg14[%c0_35, %c0_36] : memref<48x32xf32, #tpu.memory_space<vmem>>, vector<48x32xf32>
      tpu.vector_store %arg14[%c0_35, %c0_36], %55 {strides = array<i32>} : memref<48x32xf32, #tpu.memory_space<vmem>>, vector<48x32xf32>,
    } else {
    }
    %c0 = arith.constant 0 : index
    %c0_1 = arith.constant 0 : index
    %3 = vector.load %arg13[%c0, %c0_1] : memref<48x32xf32, #tpu.memory_space<vmem>>, vector<48x32xf32>
    %c0_2 = arith.constant 0 : index
    %c0_3 = arith.constant 0 : index
    %4 = vector.load %arg5[%c0_2, %c0_3] : memref<32x128xf32, #tpu.memory_space<vmem>>, vector<32x128xf32>
    %cst = arith.constant dense<0.000000e+00> : vector<48x128xf32>
    %5 = tpu.matmul %3, %4, %cst {dimension_numbers = #tpu.dot_dimension_numbers<[1], [0], [0], [1], [0, 0, 1, 1], [], []>} : vector<48x32xf32>, vector<32x128xf32>, vector<48x128xf32> -> vector<48x128xf32>
    %c0_4 = arith.constant 0 : index
    %c0_5 = arith.constant 0 : index
    %6 = vector.load %arg6[%c0_4, %c0_5] : memref<1x128xf32, #tpu.memory_space<vmem>>, vector<1x128xf32>
    %7 = vector.broadcast %6 : vector<1x128xf32> to vector<48x128xf32>
    %8 = arith.addf %5, %7 : vector<48x128xf32>
    %c0_6 = arith.constant 0 : index
    %c0_7 = arith.constant 0 : index
    %9 = vector.load %arg7[%c0_6, %c0_7] : memref<32x128xf32, #tpu.memory_space<vmem>>, vector<32x128xf32>
    %cst_8 = arith.constant dense<0.000000e+00> : vector<48x128xf32>
    %10 = tpu.matmul %3, %9, %cst_8 {dimension_numbers = #tpu.dot_dimension_numbers<[1], [0], [0], [1], [0, 0, 1, 1], [], []>} : vector<48x32xf32>, vector<32x128xf32>, vector<48x128xf32> -> vector<48x128xf32>
    %c0_9 = arith.constant 0 : index
    %c0_10 = arith.constant 0 : index
    %11 = vector.load %arg8[%c0_9, %c0_10] : memref<1x128xf32, #tpu.memory_space<vmem>>, vector<1x128xf32>
    %12 = vector.broadcast %11 : vector<1x128xf32> to vector<48x128xf32>
    %13 = arith.addf %10, %12 : vector<48x128xf32>
    %14 = arith.negf %8 : vector<48x128xf32>
    %15 = math.exp %14 : vector<48x128xf32>
    %cst_11 = arith.constant 1.000000e+00 : f32
    %16 = vector.broadcast %cst_11 : f32 to vector<48x128xf32>
    %17 = arith.addf %16, %15 : vector<48x128xf32>
    %18 = arith.divf %16, %17 : vector<48x128xf32>
    %19 = arith.mulf %8, %18 : vector<48x128xf32>
    %20 = arith.mulf %19, %13 : vector<48x128xf32>
    %c0_12 = arith.constant 0 : index
    %c0_13 = arith.constant 0 : index
    %21 = vector.load %arg14[%c0_12, %c0_13] : memref<48x32xf32, #tpu.memory_space<vmem>>, vector<48x32xf32>
    %c0_14 = arith.constant 0 : index
    %c0_15 = arith.constant 0 : index
    %22 = vector.load %arg9[%c0_14, %c0_15] : memref<128x32xf32, #tpu.memory_space<vmem>>, vector<128x32xf32>
    %cst_16 = arith.constant dense<0.000000e+00> : vector<48x32xf32>
    %23 = tpu.matmul %20, %22, %cst_16 {dimension_numbers = #tpu.dot_dimension_numbers<[1], [0], [0], [1], [0, 0, 1, 1], [], []>} : vector<48x128xf32>, vector<128x32xf32>, vector<48x32xf32> -> vector<48x32xf32>
    %24 = arith.addf %21, %23 : vector<48x32xf32>
    %c0_17 = arith.constant 0 : index
    %c0_18 = arith.constant 0 : index
    %25 = vector.load %arg14[%c0_17, %c0_18] : memref<48x32xf32, #tpu.memory_space<vmem>>, vector<48x32xf32>
    tpu.vector_store %arg14[%c0_17, %c0_18], %24 {strides = array<i32>} : memref<48x32xf32, #tpu.memory_space<vmem>>, vector<48x32xf32>,
    %c0_i32_19 = arith.constant 0 : i32
    %26 = arith.cmpi eq, %arg1, %c0_i32_19 : i32
    %27 = arith.extui %26 : i1 to i32
    %c0_i32_20 = arith.constant 0 : i32
    %28 = arith.cmpi ne, %27, %c0_i32_20 : i32
    scf.if %28 {
      %c0_21 = arith.constant 0 : index
      %c0_22 = arith.constant 0 : index
      %29 = vector.load %arg14[%c0_21, %c0_22] : memref<48x32xf32, #tpu.memory_space<vmem>>, vector<48x32xf32>
      %c0_23 = arith.constant 0 : index
      %c0_24 = arith.constant 0 : index
      %30 = vector.load %arg10[%c0_23, %c0_24] : memref<1x32xf32, #tpu.memory_space<vmem>>, vector<1x32xf32>
      %31 = vector.broadcast %30 : vector<1x32xf32> to vector<48x32xf32>
      %32 = arith.addf %29, %31 : vector<48x32xf32>
      %c0_25 = arith.constant 0 : index
      %c0_26 = arith.constant 0 : index
      %33 = vector.load %arg11[%c0_25, %c0_26] : memref<48x32xf32, #tpu.memory_space<vmem>>, vector<48x32xf32>
      %34 = arith.addf %32, %33 : vector<48x32xf32>
      %c0_27 = arith.constant 0 : index
      %c0_28 = arith.constant 0 : index
      %35 = vector.load %arg12[%c0_27, %c0_28] : memref<48x32xf32, #tpu.memory_space<vmem>>, vector<48x32xf32>
      tpu.vector_store %arg12[%c0_27, %c0_28], %34 {strides = array<i32>} : memref<48x32xf32, #tpu.memory_space<vmem>>, vector<48x32xf32>,
    } else {
    }
    return
  }
  func.func @transform_0(%arg0: i32, %arg1: i32) -> (i32, i32) {
    %c0_i32 = arith.constant 0 : i32
    %c0_i32_0 = arith.constant 0 : i32
    return %arg0, %c0_i32 : i32, i32
  }
  func.func @transform_1(%arg0: i32, %arg1: i32) -> (i32, i32) {
    %c0_i32 = arith.constant 0 : i32
    %c0_i32_0 = arith.constant 0 : i32
    %c0_i32_1 = arith.constant 0 : i32
    return %c0_i32, %c0_i32_0 : i32, i32
  }
  func.func @transform_2(%arg0: i32, %arg1: i32) -> (i32, i32) {
    %c0_i32 = arith.constant 0 : i32
    %c0_i32_0 = arith.constant 0 : i32
    %c0_i32_1 = arith.constant 0 : i32
    return %c0_i32, %c0_i32_0 : i32, i32
  }
  func.func @transform_3(%arg0: i32, %arg1: i32) -> (i32, i32) {
    %c0_i32 = arith.constant 0 : i32
    %c0_i32_0 = arith.constant 0 : i32
    return %c0_i32, %arg1 : i32, i32
  }
  func.func @transform_4(%arg0: i32, %arg1: i32) -> (i32, i32) {
    %c0_i32 = arith.constant 0 : i32
    %c0_i32_0 = arith.constant 0 : i32
    return %c0_i32, %arg1 : i32, i32
  }
  func.func @transform_5(%arg0: i32, %arg1: i32) -> (i32, i32) {
    %c0_i32 = arith.constant 0 : i32
    %c0_i32_0 = arith.constant 0 : i32
    return %c0_i32, %arg1 : i32, i32
  }
  func.func @transform_6(%arg0: i32, %arg1: i32) -> (i32, i32) {
    %c0_i32 = arith.constant 0 : i32
    %c0_i32_0 = arith.constant 0 : i32
    return %c0_i32, %arg1 : i32, i32
  }
  func.func @transform_7(%arg0: i32, %arg1: i32) -> (i32, i32) {
    %c0_i32 = arith.constant 0 : i32
    %c0_i32_0 = arith.constant 0 : i32
    return %arg1, %c0_i32 : i32, i32
  }
  func.func @transform_8(%arg0: i32, %arg1: i32) -> (i32, i32) {
    %c0_i32 = arith.constant 0 : i32
    %c0_i32_0 = arith.constant 0 : i32
    %c0_i32_1 = arith.constant 0 : i32
    return %c0_i32, %c0_i32_0 : i32, i32
  }
  func.func @transform_9(%arg0: i32, %arg1: i32) -> (i32, i32) {
    %c0_i32 = arith.constant 0 : i32
    %c0_i32_0 = arith.constant 0 : i32
    return %arg0, %c0_i32 : i32, i32
  }
  func.func @transform_10(%arg0: i32, %arg1: i32) -> (i32, i32) {
    %c0_i32 = arith.constant 0 : i32
    %c0_i32_0 = arith.constant 0 : i32
    return %arg0, %c0_i32 : i32, i32
  }
}

</mosaic_0001>

<bundles_post_ra>
// kernel: encoder_forward.11
= control target key start
LH: loop header
LB: loop body
LE: loop exit
PB: predicated region body
PF: predicated region fallthrough
CT: control target
= control target key end

     0   :  { %vm20_vm0 = vcmask 261120   ;;  %s245_s0 = inlined_call_operand.vmem [shape: f32[48,32], index: 0, kind: input, shape index: {}]   ;;  %s246_s1 = inlined_call_operand.vmem [shape: f32[1,32], index: 1, kind: input, shape index: {}]   ;;  %s247_s2 = inlined_call_operand.vmem [shape: f32[1,32], index: 2, kind: input, shape index: {}]   ;;  %s248_s3 = inlined_call_operand.vmem [shape: f32[48,32], index: 3, kind: output, shape index: {}]  }
   0x1   :  { %v14_v0 = vld [vmem:[%s245_s0] sm:$0xff]  ;;  %v16_v1 = vld [vmem:[%s245_s0 + $0x10] sm:$0xff]  ;;  %v15_v2 = vld [vmem:[%s245_s0 + $0x8] sm:$0xff] }
   0x2   :  { %v21_v3 = vsel %vm20_vm0, %v14_v0, 0.0  ;;  %v27_v4 = vsel %vm20_vm0, %v16_v1, 0.0  ;;  %v17_v5 = vld [vmem:[%s245_s0 + $0x18] sm:$0xff]  ;;  %v24_v6 = vsel %vm20_vm0, %v15_v2, 0.0  ;;  %v18_v8 = vld [vmem:[%s245_s0 + $0x20] sm:$0xff]  ;;  %v19_v9 = vld [vmem:[%s245_s0 + $0x28] sm:$0xff] }
   0x3   :  { %22 = vadd.xlane.f32.xlu0 %v21_v3  ;;  %28 = vadd.xlane.f32.xlu1 %v27_v4  ;;  %v30_v7 = vsel %vm20_vm0, %v17_v5, 0.0  ;;  %v33_v10 = vsel %vm20_vm0, %v18_v8, 0.0  ;;  %v36_v11 = vsel %vm20_vm0, %v19_v9, 0.0  ;;  %v136_v60 = vld [vmem:[%s246_s1] ss:$0 sm:$0xff] }
   0x4   :  { %v137_v63 = vld [vmem:[%s247_s2] ss:$0 sm:$0xff] }
   0x7   :  { %25 = vadd.xlane.f32.xlu0 %v24_v6  ;;  %31 = vadd.xlane.f32.xlu1 %v30_v7 }
   0xb   :  { %34 = vadd.xlane.f32.xlu0 %v33_v10  ;;  %37 = vadd.xlane.f32.xlu1 %v36_v11 }
  0x90   :  { %v23_v12 = vpop.xlane.xlu0 %22  ;;  %v29_v13 = vpop.xlane.xlu1 %28 }
  0x91   :  { %v40_v14 = vmul.f32 0.03125, %v23_v12  ;;  %v42_v15 = vmul.f32 0.03125, %v29_v13 }
  0x93   :  { %v46_v16 = vsub.f32 %v14_v0, %v40_v14  ;;  %v194_v17 = vsub.f32 %v16_v1, %v42_v15 }
  0x94   :  { %v26_v18 = vpop.xlane.xlu0 %25  ;;  %v32_v19 = vpop.xlane.xlu1 %31 }
  0x95   :  { %v41_v20 = vmul.f32 0.03125, %v26_v18  ;;  %v43_v21 = vmul.f32 0.03125, %v32_v19  ;;  %v52_v22 = vmul.f32 %v46_v16, %v46_v16  ;;  %v54_v23 = vmul.f32 %v194_v17, %v194_v17 }
  0x97   :  { %v47_v24 = vsub.f32 %v15_v2, %v41_v20  ;;  %v198_v25 = vsub.f32 %v17_v5, %v43_v21  ;;  %v58_v26 = vsel %vm20_vm0, %v52_v22, 0.0  ;;  %v64_v29 = vsel %vm20_vm0, %v54_v23, 0.0 }
  0x98   :  { %59 = vadd.xlane.f32.xlu0 %v58_v26  ;;  %v35_v27 = vpop.xlane.xlu0 %34  ;;  %v38_v28 = vpop.xlane.xlu1 %37 }
  0x99   :  { %v44_v30 = vmul.f32 0.03125, %v35_v27  ;;  %v45_v31 = vmul.f32 0.03125, %v38_v28  ;;  %v53_v32 = vmul.f32 %v47_v24, %v47_v24  ;;  %v55_v33 = vmul.f32 %v198_v25, %v198_v25 }
  0x9b   :  { %v50_v34 = vsub.f32 %v18_v8, %v44_v30  ;;  %v204_v35 = vsub.f32 %v19_v9, %v45_v31  ;;  %v61_v36 = vsel %vm20_vm0, %v53_v32, 0.0  ;;  %v67_v37 = vsel %vm20_vm0, %v55_v33, 0.0 }
  0x9c   :  { %65 = vadd.xlane.f32.xlu0 %v64_v29  ;;  %62 = vadd.xlane.f32.xlu1 %v61_v36 }
  0x9d   :  { %v56_v38 = vmul.f32 %v50_v34, %v50_v34  ;;  %v57_v39 = vmul.f32 %v204_v35, %v204_v35 }
  0x9f   :  { %v70_v40 = vsel %vm20_vm0, %v56_v38, 0.0  ;;  %v73_v41 = vsel %vm20_vm0, %v57_v39, 0.0 }
  0xa0   :  { %68 = vadd.xlane.f32.xlu1 %v67_v37  ;;  %71 = vadd.xlane.f32.xlu0 %v70_v40 }
  0xa4   :  { %74 = vadd.xlane.f32.xlu1 %v73_v41 }
 0x125   :  { %v60_v42 = vpop.xlane.xlu0 %59 }
 0x126   :  { %v76_v43 = vmul.f32 0.03125, %v60_v42 }
 0x128   :  { %v82_v44 = vadd.f32 1e-05, %v76_v43 }
 0x129   :  { %v63_v45 = vpop.xlane.xlu1 %62  ;;  %v66_v46 = vpop.xlane.xlu0 %65 }
 0x12a   :  { %138 = vrsqrt.f32 %v82_v44  ;;  %v77_v47 = vmul.f32 0.03125, %v63_v45  ;;  %v78_v48 = vmul.f32 0.03125, %v66_v46 }
 0x12c   :  { %v83_v49 = vadd.f32 1e-05, %v77_v47  ;;  %v84_v50 = vadd.f32 1e-05, %v78_v48 }
 0x12d   :  { %v69_v51 = vpop.xlane.xlu1 %68  ;;  %v72_v52 = vpop.xlane.xlu0 %71 }
 0x12e   :  { %140 = vrsqrt.f32 %v83_v49  ;;  %v79_v53 = vmul.f32 0.03125, %v69_v51  ;;  %v80_v54 = vmul.f32 0.03125, %v72_v52 }
 0x12f   :  { %142 = vrsqrt.f32 %v84_v50 }
 0x130   :  { %v85_v55 = vadd.f32 1e-05, %v79_v53  ;;  %v86_v56 = vadd.f32 1e-05, %v80_v54 }
 0x131   :  { %v75_v57 = vpop.xlane.xlu1 %74 }
 0x132   :  { %144 = vrsqrt.f32 %v85_v55  ;;  %v81_v58 = vmul.f32 0.03125, %v75_v57 }
 0x133   :  { %146 = vrsqrt.f32 %v86_v56 }
 0x134   :  { %v139_v59 = vpop.eup %138  ;;  %v87_v61 = vadd.f32 1e-05, %v81_v58 }
 0x135   :  { %v94_v62 = vmul.f32 %v139_v59, %v46_v16 }
 0x136   :  { %148 = vrsqrt.f32 %v87_v61 }
 0x137   :  { %v107_v0 = vmul.f32 %v136_v60, %v94_v62 }
 0x138   :  { %v141_v1 = vpop.eup %140 }
 0x139   :  { %v143_v2 = vpop.eup %142  ;;  %v120_v3 = vadd.f32 %v137_v63, %v107_v0  ;;  %v95_v4 = vmul.f32 %v141_v1, %v47_v24 }
 0x13a   :  { %v96_v5 = vmul.f32 %v143_v2, %v194_v17 }
 0x13b   :  { %126 = vst.msk [vmem:[%s248_s3] sm:$0xff] %vm20_vm0, %v120_v3  ;;  %v108_v6 = vmul.f32 %v136_v60, %v95_v4 }
 0x13c   :  { %v145_v7 = vpop.eup %144  ;;  %v109_v8 = vmul.f32 %v136_v60, %v96_v5 }
 0x13d   :  { %v147_v9 = vpop.eup %146  ;;  %v121_v10 = vadd.f32 %v137_v63, %v108_v6  ;;  %v97_v11 = vmul.f32 %v145_v7, %v198_v25 }
 0x13e   :  { %v122_v12 = vadd.f32 %v137_v63, %v109_v8  ;;  %v98_v13 = vmul.f32 %v147_v9, %v50_v34 }
 0x13f   :  { %127 = vst.msk [vmem:[%s248_s3 + $0x8] sm:$0xff] %vm20_vm0, %v121_v10  ;;  %v110_v14 = vmul.f32 %v136_v60, %v97_v11 }
 0x140   :  { %v149_v15 = vpop.eup %148  ;;  %128 = vst.msk [vmem:[%s248_s3 + $0x10] sm:$0xff] %vm20_vm0, %v122_v12  ;;  %v111_v16 = vmul.f32 %v136_v60, %v98_v13 }
 0x141   :  { %v123_v17 = vadd.f32 %v137_v63, %v110_v14  ;;  %v99_v18 = vmul.f32 %v149_v15, %v204_v35 }
 0x142   :  { %v124_v19 = vadd.f32 %v137_v63, %v111_v16 }
 0x143   :  { %129 = vst.msk [vmem:[%s248_s3 + $0x18] sm:$0xff] %vm20_vm0, %v123_v17  ;;  %v112_v20 = vmul.f32 %v136_v60, %v99_v18 }
 0x144   :  { %130 = vst.msk [vmem:[%s248_s3 + $0x20] sm:$0xff] %vm20_vm0, %v124_v19 }
 0x145   :  { %v125_v21 = vadd.f32 %v137_v63, %v112_v20 }
 0x147   :  { %131 = vst.msk [vmem:[%s248_s3 + $0x28] sm:$0xff] %vm20_vm0, %v125_v21 }

// kernel: encoder_forward.10
= control target key start
LH: loop header
LB: loop body
LE: loop exit
PB: predicated region body
PF: predicated region fallthrough
CT: control target
= control target key end

     0   :  { %s667_s12 = smov 0   ;;  %s669_s13 = smov 0   ;;  %s739_s0 = inlined_call_operand.vmem [shape: f32[32,64], index: 0, kind: input, shape index: {}]   ;;  %s740_s1 = inlined_call_operand.vmem [shape: f32[64,32], index: 1, kind: input, shape index: {}]   ;;  %s741_s2 = inlined_call_operand.vmem [shape: f32[16,32], index: 2, kind: input, shape index: {}]   ;;  %s742_s3 = inlined_call_operand.vmem [shape: f32[32,32], index: 3, kind: output, shape index: {}]  }
   0x1   :  { %s671_s14 = smov 0  }
   0x2 LB: > { %s39_s15 = sadd.s32 1, %s640_s13  ;;  %p543_p0 = scmp.ge.s32.totalorder %s644_s14, 1  ;;  %s644_s14 = sphi %s671_s14, %s13_s14   ;;  %s640_s13 = sphi %s669_s13, %s744_s13   ;;  %s636_s12 = sphi %s667_s12, %s743_s12  }
   0x3   : > { %p41_p1 = scmp.ge.s32.totalorder %s39_s15, 2  ;;  %p209_p2 = scmp.lt.s32.totalorder %s644_s14, 3 }
   0x5   : > { %s746_s15 = smov (%p41_p1, %s39_s15), 0  ;;  %p210_p3 = pnand %p543_p0, %p209_p2 }
   0x6   : > { %v308_v0 = vld [vmem:[%s740_s1] sm:$0xff] (!%p210_p3)  ;;  %v309_v1 = vld [vmem:[%s740_s1 + $0x8] sm:$0xff] (!%p210_p3)  ;;  %v310_v2 = vld [vmem:[%s740_s1 + $0x10] sm:$0xff] (!%p210_p3)  ;;  %s544_s22 = sshll.u32 (!%p210_p3), %s636_s12, 1  ;;  %vm301_vm0 = vcmask (!%p210_p3), 261120   ;;  %v646_v8 = vmov (!%p210_p3), 0.0  }
   0x7   : > { %213 = sbr.rel (%p210_p3) target bundleno = 251 (0xfb), region = 32  ;;  %v581_v3 = vpack.c.bf16 (!%p210_p3), %v309_v1, %v308_v0  ;;  %v311_v4 = vld [vmem:[%s740_s1 + $0x18] sm:$0xff] (!%p210_p3)  ;;  %p259_p4 = scmp.lt.s32.totalorder (!%p210_p3), %s544_s22, 3  ;;  %v312_v6 = vld [vmem:[%s740_s1 + $0x20] sm:$0xff] (!%p210_p3)  ;;  %v313_v7 = vld [vmem:[%s740_s1 + $0x28] sm:$0xff] (!%p210_p3)  ;;  %303 = vst.msk [vmem:[#allocation2 + $0x8] sm:$0xff] (!%p210_p3), %vm301_vm0, %v646_v8 }
   0x8   : > { %v585_v5 = vpack.c.bf16 (!%p210_p3), %v311_v4, %v310_v2  ;;  %302 = vst.msk [vmem:[#allocation2] sm:$0xff] (!%p210_p3), %vm301_vm0, %v646_v8  ;;  %v589_v9 = vpack.c.bf16 (!%p210_p3), %v313_v7, %v312_v6  ;;  %vm316_vm1 = vcmask (!%p210_p3), 523264   ;;  %v314_v10 = vld [vmem:[%s740_s1 + $0x30] sm:$0xff] (!%p210_p3)  ;;  %v315_v11 = vld [vmem:[%s740_s1 + $0x38] sm:$0xff] (!%p210_p3)  ;;  %v408_v21 = vld [vmem:[%s741_s2] sm:$0xff] (!%p210_p3) }
   0x9   : > { %582 = vmatprep.subr.bf16.mxu0 (!%p210_p3), %v581_v3  ;;  %v593_v13 = vpack.c.bf16 (!%p210_p3), %v315_v11, %v314_v10  ;;  %v409_v23 = vld [vmem:[%s741_s2 + $0x8] sm:$0xff] (!%p210_p3) }
   0xa   : > { %584 = vmatpush3.bf16.msra.mxu0 (!%p210_p3), %v581_v3 }
   0xb   : > { %586 = vmatprep.subr.bf16.mxu0 (!%p210_p3), %v585_v5 }
   0xe   : > { %s748_s22 = smov (!%p259_p4, %s544_s22), 3  ;;  %588 = vmatpush3.bf16.msra.mxu0 %v585_v5  ;;  %v305_v15 = vld [vmem:[#allocation2 + $0x8] sm:$0xff] }
   0xf   : > { %s545_s29 = sshll.u32 %s748_s22, 3  ;;  %590 = vmatprep.subr.bf16.mxu0 %v589_v9  ;;  %v304_v16 = vld [vmem:[#allocation2] sm:$0xff] }
  0x10   : > { %s265_s9 = scalar_lea.vmem %s739_s0, %s545_s29  ;;  %s294_s19 = scalar_lea.vmem %s742_s3, %s545_s29 }
  0x11   : > { %v306_v12 = vld [vmem:[%s265_s9] sm:$0xff]  ;;  %v307_v14 = vld [vmem:[%s265_s9 + $0x8] sm:$0xff] }
  0x12   : > { %578 = vmatprep.mubr.msk.f32.mxu0 %vm316_vm1, %v306_v12  ;;  %592 = vmatpush3.bf16.msra.mxu0 %v589_v9 }
  0x13   : > { %594 = vmatprep.subr.bf16.mxu0 %v593_v13 }
  0x16   : > { %596 = vmatpush3.bf16.msra.mxu0 %v593_v13 }
  0x19   : > { %579 = vmatmul.mubr.msk.f32.vlgmr.msra.gmra.mrb[0].mxu0 %vm316_vm1, %v307_v14 }
  0xec   : > { %v580_v17 = vpop.f32.mrb[0].mxu0 }
  0xed   : > { %v399_v18 = vadd.f32 %v580_v17, %v305_v15  ;;  %v389_v19 = vpop.f32.mrb[1].mxu0 }
  0xee   : > { %v398_v20 = vadd.f32 %v389_v19, %v304_v16 }
  0xef   : > { %402 = vst.msk [vmem:[#allocation2 + $0x8] sm:$0xff] %vm301_vm0, %v399_v18 }
  0xf0   : > { %401 = vst.msk [vmem:[#allocation2] sm:$0xff] %vm301_vm0, %v398_v20 }
  0xf6   : > { %v407_v22 = vld [vmem:[#allocation2 + $0x8] sm:$0xff] }
  0xf7   : > { %v406_v24 = vld [vmem:[#allocation2] sm:$0xff]  ;;  %v411_v26 = vadd.f32 %v409_v23, %v407_v22 }
  0xf8   : > { %v410_v25 = vadd.f32 %v408_v21, %v406_v24 }
  0xf9   : > { %413 = vst.msk [vmem:[%s294_s19 + $0x8] sm:$0xff] %vm301_vm0, %v411_v26 }
  0xfa   : > { %412 = vst.msk [vmem:[%s294_s19] sm:$0xff] %vm301_vm0, %v410_v25 }
  0xfb PF: > { %s13_s14 = sadd.s32 1, %s644_s14   ;;  %s743_s12 = smov %s640_s13 }
  0xfc   : > { %p10_p5 = scmp.ge.s32.totalorder %s13_s14, 4   ;;  %s744_s13 = smov %s746_s15 }
  0xfe   :  { %12 = sbr.rel (!%p10_p5) target bundleno = 2 (0x2), region = 76 }

// kernel: encoder_forward.12
= control target key start
LH: loop header
LB: loop body
LE: loop exit
PB: predicated region body
PF: predicated region fallthrough
CT: control target
= control target key end

     0   :  { %vm27_vm0 = vcmask 261120   ;;  %v464_v60 = vmov 0.0   ;;  %s670_s0 = inlined_call_operand.vmem [shape: f32[48,32], index: 0, kind: input, shape index: {}]   ;;  %s671_s3 = inlined_call_operand.vmem [shape: f32[32,384], index: 3, kind: input, shape index: {}]   ;;  %s672_s1 = inlined_call_operand.vmem [shape: f32[1,32], index: 1, kind: input, shape index: {}]   ;;  %s673_s2 = inlined_call_operand.vmem [shape: f32[1,32], index: 2, kind: input, shape index: {}]   ;;  %s674_s4 = inlined_call_operand.vmem [shape: f32[48,384], index: 4, kind: output, shape index: {}]  }
   0x1   :  { %v21_v0 = vld [vmem:[%s670_s0] sm:$0xff]  ;;  %v23_v1 = vld [vmem:[%s670_s0 + $0x10] sm:$0xff]  ;;  %v22_v2 = vld [vmem:[%s670_s0 + $0x8] sm:$0xff]  ;;  %240 = vmatprep.mubr.f32.mxu0 %v464_v60 }
   0x2   :  { %v28_v3 = vsel %vm27_vm0, %v21_v0, 0.0  ;;  %v34_v4 = vsel %vm27_vm0, %v23_v1, 0.0  ;;  %v24_v5 = vld [vmem:[%s670_s0 + $0x18] sm:$0xff]  ;;  %v31_v6 = vsel %vm27_vm0, %v22_v2, 0.0  ;;  %v25_v8 = vld [vmem:[%s670_s0 + $0x20] sm:$0xff]  ;;  %v26_v9 = vld [vmem:[%s670_s0 + $0x28] sm:$0xff] }
   0x3   :  { %29 = vadd.xlane.f32.xlu0 %v28_v3  ;;  %35 = vadd.xlane.f32.xlu1 %v34_v4  ;;  %v37_v7 = vsel %vm27_vm0, %v24_v5, 0.0  ;;  %v40_v10 = vsel %vm27_vm0, %v25_v8, 0.0  ;;  %v43_v11 = vsel %vm27_vm0, %v26_v9, 0.0  ;;  %v146_v42 = vld [vmem:[%s671_s3 + $0x8] sm:$0xff]  ;;  %v149_v43 = vld [vmem:[%s671_s3 + $0x20] sm:$0xff]  ;;  %v148_v46 = vld [vmem:[%s671_s3 + $0x18] sm:$0xff] }
   0x4   :  { %v435_v44 = vpack.c.bf16 %v149_v43, %v146_v42  ;;  %v145_v45 = vld [vmem:[%s671_s3] sm:$0xff]  ;;  %v152_v48 = vld [vmem:[%s671_s3 + $0x38] sm:$0xff]  ;;  %v155_v49 = vld [vmem:[%s671_s3 + $0x50] sm:$0xff] }
   0x5   :  { %v437_v47 = vpack.c.bf16 %v148_v46, %v145_v45  ;;  %v147_v50 = vld [vmem:[%s671_s3 + $0x10] sm:$0xff]  ;;  %v439_v51 = vpack.c.bf16 %v155_v49, %v152_v48  ;;  %v150_v52 = vld [vmem:[%s671_s3 + $0x28] sm:$0xff]  ;;  %v153_v57 = vld [vmem:[%s671_s3 + $0x40] sm:$0xff] }
   0x6   :  { %436 = vmatprep.subr.bf16.mxu0 %v435_v44  ;;  %v151_v53 = vld [vmem:[%s671_s3 + $0x30] sm:$0xff]  ;;  %v154_v54 = vld [vmem:[%s671_s3 + $0x48] sm:$0xff]  ;;  %v443_v55 = vpack.c.bf16 %v150_v52, %v147_v50  ;;  %v156_v58 = vld [vmem:[%s671_s3 + $0x58] sm:$0xff] }
   0x7   :  { %32 = vadd.xlane.f32.xlu0 %v31_v6  ;;  %38 = vadd.xlane.f32.xlu1 %v37_v7  ;;  %v441_v56 = vpack.c.bf16 %v154_v54, %v151_v53  ;;  %v447_v59 = vpack.c.bf16 %v156_v58, %v153_v57 }
   0x8   :  { %438 = vmatpush1.bf16.msra.mxu0 %v437_v47  ;;  %444 = vmatprep.subr.bf16.mxu1 %v443_v55 }
   0x9   :  { %440 = vmatprep.subr.bf16.mxu0 %v439_v51  ;;  %446 = vmatpush3.bf16.msra.mxu1 %v443_v55 }
   0xa   :  { %448 = vmatprep.subr.bf16.mxu1 %v447_v59 }
   0xb   :  { %41 = vadd.xlane.f32.xlu0 %v40_v10  ;;  %44 = vadd.xlane.f32.xlu1 %v43_v11 }
   0xc   :  { %442 = vmatpush1.bf16.msra.mxu0 %v441_v56 }
   0xd   :  { %450 = vmatpush3.bf16.msra.mxu1 %v447_v59 }
  0x90   :  { %v30_v12 = vpop.xlane.xlu0 %29  ;;  %v36_v13 = vpop.xlane.xlu1 %35 }
  0x91   :  { %v47_v14 = vmul.f32 0.03125, %v30_v12  ;;  %v49_v15 = vmul.f32 0.03125, %v36_v13 }
  0x93   :  { %v514_v16 = vsub.f32 %v21_v0, %v47_v14  ;;  %v516_v17 = vsub.f32 %v23_v1, %v49_v15  ;;  %v394_v15 = vld [vmem:[%s672_s1] ss:$0 sm:$0xff] }
  0x94   :  { %v33_v18 = vpop.xlane.xlu0 %32  ;;  %v39_v19 = vpop.xlane.xlu1 %38 }
  0x95   :  { %v48_v20 = vmul.f32 0.03125, %v33_v18  ;;  %v50_v21 = vmul.f32 0.03125, %v39_v19  ;;  %v59_v22 = vmul.f32 %v514_v16, %v514_v16  ;;  %v61_v23 = vmul.f32 %v516_v17, %v516_v17 }
  0x97   :  { %v522_v24 = vsub.f32 %v22_v2, %v48_v20  ;;  %v524_v25 = vsub.f32 %v24_v5, %v50_v21  ;;  %v65_v26 = vsel %vm27_vm0, %v59_v22, 0.0  ;;  %v71_v29 = vsel %vm27_vm0, %v61_v23, 0.0  ;;  %v395_v20 = vld [vmem:[%s673_s2] ss:$0 sm:$0xff] }
  0x98   :  { %66 = vadd.xlane.f32.xlu0 %v65_v26  ;;  %v42_v27 = vpop.xlane.xlu0 %41  ;;  %v45_v28 = vpop.xlane.xlu1 %44 }
  0x99   :  { %v51_v30 = vmul.f32 0.03125, %v42_v27  ;;  %v52_v31 = vmul.f32 0.03125, %v45_v28  ;;  %v60_v32 = vmul.f32 %v522_v24, %v522_v24  ;;  %v62_v33 = vmul.f32 %v524_v25, %v524_v25 }
  0x9b   :  { %v532_v34 = vsub.f32 %v25_v8, %v51_v30  ;;  %v534_v35 = vsub.f32 %v26_v9, %v52_v31  ;;  %v68_v36 = vsel %vm27_vm0, %v60_v32, 0.0  ;;  %v74_v37 = vsel %vm27_vm0, %v62_v33, 0.0 }
  0x9c   :  { %72 = vadd.xlane.f32.xlu0 %v71_v29  ;;  %69 = vadd.xlane.f32.xlu1 %v68_v36 }
  0x9d   :  { %v63_v38 = vmul.f32 %v532_v34, %v532_v34  ;;  %v64_v39 = vmul.f32 %v534_v35, %v534_v35 }
  0x9f   :  { %v77_v40 = vsel %vm27_vm0, %v63_v38, 0.0  ;;  %v80_v41 = vsel %vm27_vm0, %v64_v39, 0.0 }
  0xa0   :  { %75 = vadd.xlane.f32.xlu1 %v74_v37  ;;  %78 = vadd.xlane.f32.xlu0 %v77_v40 }
  0xa4   :  { %81 = vadd.xlane.f32.xlu1 %v80_v41 }
 0x125   :  { %v67_v61 = vpop.xlane.xlu0 %66 }
 0x126   :  { %v83_v62 = vmul.f32 0.03125, %v67_v61 }
 0x128   :  { %v89_v63 = vadd.f32 1e-05, %v83_v62 }
 0x129   :  { %v70_v0 = vpop.xlane.xlu1 %69  ;;  %v73_v1 = vpop.xlane.xlu0 %72 }
 0x12a   :  { %452 = vrsqrt.f32 %v89_v63  ;;  %v84_v2 = vmul.f32 0.03125, %v70_v0  ;;  %v85_v3 = vmul.f32 0.03125, %v73_v1 }
 0x12c   :  { %v90_v4 = vadd.f32 1e-05, %v84_v2  ;;  %v91_v5 = vadd.f32 1e-05, %v85_v3 }
 0x12d   :  { %v76_v6 = vpop.xlane.xlu1 %75  ;;  %v79_v7 = vpop.xlane.xlu0 %78 }
 0x12e   :  { %454 = vrsqrt.f32 %v90_v4  ;;  %v86_v8 = vmul.f32 0.03125, %v76_v6  ;;  %v87_v9 = vmul.f32 0.03125, %v79_v7 }
 0x12f   :  { %456 = vrsqrt.f32 %v91_v5 }
 0x130   :  { %v92_v10 = vadd.f32 1e-05, %v86_v8  ;;  %v93_v11 = vadd.f32 1e-05, %v87_v9 }
 0x131   :  { %v82_v12 = vpop.xlane.xlu1 %81 }
 0x132   :  { %458 = vrsqrt.f32 %v92_v10  ;;  %v88_v13 = vmul.f32 0.03125, %v82_v12 }
 0x133   :  { %460 = vrsqrt.f32 %v93_v11 }
 0x134   :  { %v453_v14 = vpop.eup %452  ;;  %v94_v18 = vadd.f32 1e-05, %v88_v13 }
 0x135   :  { %v101_v19 = vmul.f32 %v453_v14, %v514_v16 }
 0x136   :  { %462 = vrsqrt.f32 %v94_v18 }
 0x137   :  { %v114_v21 = vmul.f32 %v394_v15, %v101_v19 }
 0x138   :  { %v455_v22 = vpop.eup %454 }
 0x139   :  { %v457_v23 = vpop.eup %456  ;;  %v127_v26 = vadd.f32 %v395_v20, %v114_v21  ;;  %v102_v27 = vmul.f32 %v455_v22, %v522_v24 }
 0x13a   :  { %v103_v28 = vmul.f32 %v457_v23, %v516_v17 }
 0x13b   :  { %133 = vst.msk [vmem:[#allocation2] sm:$0xff] %vm27_vm0, %v127_v26  ;;  %v115_v29 = vmul.f32 %v394_v15, %v102_v27 }
 0x13c   :  { %v459_v30 = vpop.eup %458  ;;  %v116_v31 = vmul.f32 %v394_v15, %v103_v28 }
 0x13d   :  { %v461_v32 = vpop.eup %460  ;;  %v128_v16 = vadd.f32 %v395_v20, %v115_v29  ;;  %v104_v33 = vmul.f32 %v459_v30, %v524_v25 }
 0x13e   :  { %v129_v36 = vadd.f32 %v395_v20, %v116_v31  ;;  %v105_v37 = vmul.f32 %v461_v32, %v532_v34 }
 0x13f   :  { %134 = vst.msk [vmem:[#allocation2 + $0x8] sm:$0xff] %vm27_vm0, %v128_v16  ;;  %v117_v38 = vmul.f32 %v394_v15, %v104_v33 }
 0x140   :  { %v463_v39 = vpop.eup %462  ;;  %135 = vst.msk [vmem:[#allocation2 + $0x10] sm:$0xff] %vm27_vm0, %v129_v36  ;;  %v118_v24 = vmul.f32 %v394_v15, %v105_v37 }
 0x141   :  { %v130_v17 = vadd.f32 %v395_v20, %v117_v38  ;;  %v106_v40 = vmul.f32 %v463_v39, %v534_v35 }
 0x142   :  { %v131_v41 = vadd.f32 %v395_v20, %v118_v24  ;;  %v139_v42 = vld [vmem:[#allocation2] sm:$0xff] }
 0x143   :  { %136 = vst.msk [vmem:[#allocation2 + $0x18] sm:$0xff] %vm27_vm0, %v130_v17  ;;  %v119_v43 = vmul.f32 %v394_v15, %v106_v40  ;;  %396 = vmatmul.mubr.msk.f32.vlgmr.msra.gmra.mrb[0].mxu0 %vm27_vm0, %v139_v42  ;;  %426 = vmatprep.mubr.msk.f32.mxu1 %vm27_vm0, %v139_v42 }
 0x144   :  { %137 = vst.msk [vmem:[#allocation2 + $0x20] sm:$0xff] %vm27_vm0, %v131_v41  ;;  %246 = vmatprep.mubr.f32.mxu0 %v464_v60 }
 0x145   :  { %v132_v25 = vadd.f32 %v395_v20, %v119_v43 }
 0x146   :  { %v140_v34 = vld [vmem:[#allocation2 + $0x8] sm:$0xff] }
 0x147   :  { %138 = vst.msk [vmem:[#allocation2 + $0x28] sm:$0xff] %vm27_vm0, %v132_v25  ;;  %397 = vmatmul.mubr.msk.f32.gmra.mrb[2].mxu0 %vm27_vm0, %v140_v34  ;;  %427 = vmatmul.mubr.msk.f32.vlgmr.msra.gmra.mrb[0].mxu1 %vm27_vm0, %v140_v34  ;;  %v141_v35 = vld [vmem:[#allocation2 + $0x10] sm:$0xff] }
 0x148   :  { %429 = vmatprep.mubr.msk.f32.mxu1 %vm27_vm0, %v141_v35  ;;  %252 = vmatprep.mubr.f32.mxu0 %v464_v60 }
 0x14a   :  { %v142_v44 = vld [vmem:[#allocation2 + $0x18] sm:$0xff] }
 0x14b   :  { %398 = vmatmul.mubr.msk.f32.gmra.mrb[4].mxu0 %vm27_vm0, %v141_v35  ;;  %430 = vmatmul.mubr.msk.f32.gmra.mrb[2].mxu1 %vm27_vm0, %v142_v44  ;;  %v143_v45 = vld [vmem:[#allocation2 + $0x20] sm:$0xff] }
 0x14c   :  { %432 = vmatprep.mubr.msk.f32.mxu1 %vm27_vm0, %v143_v45  ;;  %258 = vmatprep.mubr.f32.mxu0 %v464_v60 }
 0x14e   :  { %v144_v46 = vld [vmem:[#allocation2 + $0x28] sm:$0xff] }
 0x14f   :  { %399 = vmatmul.mubr.msk.f32.gmra.mrb[6].mxu0 %vm27_vm0, %v142_v44  ;;  %433 = vmatmul.mubr.msk.f32.gmra.mrb[4].mxu1 %vm27_vm0, %v144_v46 }
 0x150   :  { %264 = vmatprep.mubr.f32.mxu0 %v464_v60 }
 0x153   :  { %400 = vmatmul.mubr.msk.f32.gmra.mrb[8].mxu0 %vm27_vm0, %v143_v45 }
 0x154   :  { %270 = vmatprep.mubr.f32.mxu0 %v464_v60 }
 0x157   :  { %401 = vmatmul.mubr.msk.f32.gmra.mrb[10].mxu0 %vm27_vm0, %v144_v46 }
 0x216   :  { %v242_v47 = vpop.f32.mrb[0].mxu0 }
 0x217   :  { %372 = vst [vmem:[%s674_s4] sm:$0xff] %v242_v47  ;;  %v244_v48 = vpop.f32.mrb[1].mxu0 }
 0x218   :  { %373 = vst [vmem:[%s674_s4 + $0x8] sm:$0xff] %v244_v48 }
 0x21a   :  { %v248_v49 = vpop.f32.mrb[2].mxu0  ;;  %v428_v50 = vpop.f32.mrb[0].mxu1 }
 0x21b   :  { %375 = vst [vmem:[%s674_s4 + $0x18] sm:$0xff] %v248_v49  ;;  %377 = vst [vmem:[%s674_s4 + $0x28] sm:$0xff] %v428_v50  ;;  %v250_v51 = vpop.f32.mrb[3].mxu0  ;;  %v343_v52 = vpop.f32.mrb[1].mxu1 }
 0x21c   :  { %376 = vst [vmem:[%s674_s4 + $0x20] sm:$0xff] %v250_v51  ;;  %374 = vst [vmem:[%s674_s4 + $0x10] sm:$0xff] %v343_v52 }
 0x21e   :  { %v254_v53 = vpop.f32.mrb[4].mxu0  ;;  %v431_v54 = vpop.f32.mrb[2].mxu1 }
 0x21f   :  { %378 = vst [vmem:[%s674_s4 + $0x30] sm:$0xff] %v254_v53  ;;  %383 = vst [vmem:[%s674_s4 + $0x58] sm:$0xff] %v431_v54  ;;  %v256_v55 = vpop.f32.mrb[5].mxu0  ;;  %v353_v56 = vpop.f32.mrb[3].mxu1 }
 0x220   :  { %379 = vst [vmem:[%s674_s4 + $0x38] sm:$0xff] %v256_v55  ;;  %380 = vst [vmem:[%s674_s4 + $0x40] sm:$0xff] %v353_v56 }
 0x222   :  { %v260_v57 = vpop.f32.mrb[6].mxu0  ;;  %v434_v58 = vpop.f32.mrb[4].mxu1 }
 0x223   :  { %381 = vst [vmem:[%s674_s4 + $0x48] sm:$0xff] %v260_v57  ;;  %389 = vst [vmem:[%s674_s4 + $0x88] sm:$0xff] %v434_v58  ;;  %v262_v59 = vpop.f32.mrb[7].mxu0  ;;  %v363_v60 = vpop.f32.mrb[5].mxu1 }
 0x224   :  { %382 = vst [vmem:[%s674_s4 + $0x50] sm:$0xff] %v262_v59  ;;  %386 = vst [vmem:[%s674_s4 + $0x70] sm:$0xff] %v363_v60 }
 0x226   :  { %v266_v61 = vpop.f32.mrb[8].mxu0 }
 0x227   :  { %384 = vst [vmem:[%s674_s4 + $0x60] sm:$0xff] %v266_v61  ;;  %v268_v62 = vpop.f32.mrb[9].mxu0 }
 0x228   :  { %385 = vst [vmem:[%s674_s4 + $0x68] sm:$0xff] %v268_v62 }
 0x22a   :  { %v272_v63 = vpop.f32.mrb[10].mxu0 }
 0x22b   :  { %387 = vst [vmem:[%s674_s4 + $0x78] sm:$0xff] %v272_v63  ;;  %v274_v0 = vpop.f32.mrb[11].mxu0 }
 0x22c   :  { %388 = vst [vmem:[%s674_s4 + $0x80] sm:$0xff] %v274_v0 }

// kernel: encoder_forward.14
= control target key start
LH: loop header
LB: loop body
LE: loop exit
PB: predicated region body
PF: predicated region fallthrough
CT: control target
= control target key end

     0   :  { %vm21_vm0 = vcmask 261120   ;;  %v321_v3 = vmov 0.0   ;;  %s470_s1 = inlined_call_operand.vmem [shape: f32[128,32], index: 1, kind: input, shape index: {}]   ;;  %s471_s0 = inlined_call_operand.vmem [shape: f32[48,128], index: 0, kind: input, shape index: {}]   ;;  %s472_s2 = inlined_call_operand.vmem [shape: f32[1,32], index: 2, kind: input, shape index: {}]   ;;  %s473_s3 = inlined_call_operand.vmem [shape: f32[48,32], index: 3, kind: input, shape index: {}]   ;;  %s474_s4 = inlined_call_operand.vmem [shape: f32[48,32], index: 4, kind: output, shape index: {}]  }
   0x1   :  { %v40_v0 = vld [vmem:[%s470_s1] sm:$0xff]  ;;  %v41_v1 = vld [vmem:[%s470_s1 + $0x8] sm:$0xff]  ;;  %v42_v2 = vld [vmem:[%s470_s1 + $0x10] sm:$0xff]  ;;  %25 = vst.msk [vmem:[#allocation2 + $0x18] sm:$0xff] %vm21_vm0, %v321_v3 }
   0x2   :  { %22 = vst.msk [vmem:[#allocation2] sm:$0xff] %vm21_vm0, %v321_v3  ;;  %23 = vst.msk [vmem:[#allocation2 + $0x8] sm:$0xff] %vm21_vm0, %v321_v3  ;;  %v272_v4 = vpack.c.bf16 %v41_v1, %v40_v0  ;;  %v43_v5 = vld [vmem:[%s470_s1 + $0x18] sm:$0xff]  ;;  %v44_v7 = vld [vmem:[%s470_s1 + $0x20] sm:$0xff] }
   0x3   :  { %24 = vst.msk [vmem:[#allocation2 + $0x10] sm:$0xff] %vm21_vm0, %v321_v3  ;;  %26 = vst.msk [vmem:[#allocation2 + $0x20] sm:$0xff] %vm21_vm0, %v321_v3  ;;  %v276_v6 = vpack.c.bf16 %v43_v5, %v42_v2  ;;  %v45_v8 = vld [vmem:[%s470_s1 + $0x28] sm:$0xff]  ;;  %v36_v10 = vld [vmem:[%s471_s0 + $0x10] sm:$0xff] }
   0x4   :  { %27 = vst.msk [vmem:[#allocation2 + $0x28] sm:$0xff] %vm21_vm0, %v321_v3  ;;  %304 = vmatprep.subr.bf16.mxu1 %v272_v4  ;;  %273 = vmatprep.subr.bf16.mxu0 %v272_v4  ;;  %v280_v9 = vpack.c.bf16 %v45_v8, %v44_v7  ;;  %v46_v11 = vld [vmem:[%s470_s1 + $0x30] sm:$0xff]  ;;  %v47_v12 = vld [vmem:[%s470_s1 + $0x38] sm:$0xff]  ;;  %v34_v13 = vld [vmem:[%s471_s0] sm:$0xff] }
   0x5   :  { %312 = vmatpush3.bf16.msra.mxu1 %v272_v4  ;;  %275 = vmatpush3.bf16.msra.mxu0 %v272_v4  ;;  %v284_v14 = vpack.c.bf16 %v47_v12, %v46_v11  ;;  %v48_v15 = vld [vmem:[%s470_s1 + $0x40] sm:$0xff]  ;;  %v49_v16 = vld [vmem:[%s470_s1 + $0x48] sm:$0xff]  ;;  %v50_v18 = vld [vmem:[%s470_s1 + $0x50] sm:$0xff] }
   0x6   :  { %305 = vmatprep.subr.bf16.mxu1 %v276_v6  ;;  %277 = vmatprep.subr.bf16.mxu0 %v276_v6  ;;  %v288_v17 = vpack.c.bf16 %v49_v16, %v48_v15  ;;  %v51_v19 = vld [vmem:[%s470_s1 + $0x58] sm:$0xff]  ;;  %v52_v21 = vld [vmem:[%s470_s1 + $0x60] sm:$0xff]  ;;  %v53_v22 = vld [vmem:[%s470_s1 + $0x68] sm:$0xff] }
   0x7   :  { %266 = vmatprep.mubr.f32.mxu1 %v36_v10  ;;  %263 = vmatprep.mubr.f32.mxu0 %v34_v13  ;;  %v292_v20 = vpack.c.bf16 %v51_v19, %v50_v18  ;;  %v296_v23 = vpack.c.bf16 %v53_v22, %v52_v21  ;;  %v54_v24 = vld [vmem:[%s470_s1 + $0x70] sm:$0xff]  ;;  %v55_v25 = vld [vmem:[%s470_s1 + $0x78] sm:$0xff]  ;;  %v35_v28 = vld [vmem:[%s471_s0 + $0x8] sm:$0xff] }
   0x8   :  { %v300_v26 = vpack.c.bf16 %v55_v25, %v54_v24  ;;  %v37_v27 = vld [vmem:[%s471_s0 + $0x18] sm:$0xff]  ;;  %v38_v29 = vld [vmem:[%s471_s0 + $0x20] sm:$0xff]  ;;  %v39_v30 = vld [vmem:[%s471_s0 + $0x28] sm:$0xff] }
   0x9   :  { %313 = vmatpush3.bf16.msra.mxu1 %v276_v6  ;;  %279 = vmatpush3.bf16.msra.mxu0 %v276_v6  ;;  %v31_v31 = vld [vmem:[#allocation2 + $0x18] sm:$0xff]  ;;  %v29_v32 = vld [vmem:[#allocation2 + $0x8] sm:$0xff]  ;;  %v28_v34 = vld [vmem:[#allocation2] sm:$0xff] }
   0xa   :  { %306 = vmatprep.subr.bf16.mxu1 %v280_v9  ;;  %281 = vmatprep.subr.bf16.mxu0 %v280_v9  ;;  %v30_v33 = vld [vmem:[#allocation2 + $0x10] sm:$0xff]  ;;  %v32_v44 = vld [vmem:[#allocation2 + $0x20] sm:$0xff]  ;;  %v189_v50 = vld [vmem:[%s473_s3 + $0x18] sm:$0xff] }
   0xb   :  { %v33_v43 = vld [vmem:[#allocation2 + $0x28] sm:$0xff]  ;;  %v208_v49 = vld [vmem:[%s472_s2] ss:$0 sm:$0xff]  ;;  %v188_v51 = vld [vmem:[%s473_s3 + $0x10] sm:$0xff] }
   0xc   :  { %v187_v54 = vld [vmem:[%s473_s3 + $0x8] sm:$0xff]  ;;  %v186_v59 = vld [vmem:[%s473_s3] sm:$0xff] }
   0xd   :  { %314 = vmatpush3.bf16.msra.mxu1 %v280_v9  ;;  %283 = vmatpush3.bf16.msra.mxu0 %v280_v9  ;;  %v191_v3 = vld [vmem:[%s473_s3 + $0x28] sm:$0xff]  ;;  %v190_v6 = vld [vmem:[%s473_s3 + $0x20] sm:$0xff] }
   0xe   :  { %307 = vmatprep.subr.bf16.mxu1 %v284_v14  ;;  %285 = vmatprep.subr.bf16.mxu0 %v284_v14 }
  0x11   :  { %315 = vmatpush3.bf16.msra.mxu1 %v284_v14  ;;  %287 = vmatpush3.bf16.msra.mxu0 %v284_v14 }
  0x12   :  { %308 = vmatprep.subr.bf16.mxu1 %v288_v17  ;;  %289 = vmatprep.subr.bf16.mxu0 %v288_v17 }
  0x15   :  { %316 = vmatpush3.bf16.msra.mxu1 %v288_v17  ;;  %291 = vmatpush3.bf16.msra.mxu0 %v288_v17 }
  0x16   :  { %309 = vmatprep.subr.bf16.mxu1 %v292_v20  ;;  %293 = vmatprep.subr.bf16.mxu0 %v292_v20 }
  0x19   :  { %317 = vmatpush3.bf16.msra.mxu1 %v292_v20  ;;  %295 = vmatpush3.bf16.msra.mxu0 %v292_v20 }
  0x1a   :  { %310 = vmatprep.subr.bf16.mxu1 %v296_v23  ;;  %297 = vmatprep.subr.bf16.mxu0 %v296_v23 }
  0x1d   :  { %318 = vmatpush3.bf16.msra.mxu1 %v296_v23  ;;  %299 = vmatpush3.bf16.msra.mxu0 %v296_v23 }
  0x1e   :  { %311 = vmatprep.subr.bf16.mxu1 %v300_v26  ;;  %301 = vmatprep.subr.bf16.mxu0 %v300_v26 }
  0x21   :  { %319 = vmatpush3.bf16.msra.mxu1 %v300_v26  ;;  %303 = vmatpush3.bf16.msra.mxu0 %v300_v26 }
  0x24   :  { %267 = vmatmul.mubr.f32.vlgmr.msra.gmra.mrb[0].mxu1 %v37_v27  ;;  %264 = vmatmul.mubr.f32.vlgmr.msra.gmra.mrb[0].mxu0 %v35_v28 }
  0x25   :  { %269 = vmatprep.mubr.f32.mxu1 %v38_v29 }
  0x28   :  { %270 = vmatmul.mubr.f32.gmra.mrb[2].mxu1 %v39_v30 }
  0xf7   :  { %v268_v35 = vpop.f32.mrb[0].mxu1  ;;  %v265_v36 = vpop.f32.mrb[0].mxu0 }
  0xf8   :  { %v154_v37 = vadd.f32 %v268_v35, %v31_v31  ;;  %v132_v38 = vpop.f32.mrb[1].mxu1  ;;  %v152_v39 = vadd.f32 %v265_v36, %v29_v32  ;;  %v122_v40 = vpop.f32.mrb[1].mxu0 }
  0xf9   :  { %v153_v41 = vadd.f32 %v132_v38, %v30_v33  ;;  %v151_v42 = vadd.f32 %v122_v40, %v28_v34 }
  0xfa   :  { %161 = vst.msk [vmem:[#allocation2 + $0x18] sm:$0xff] %vm21_vm0, %v154_v37  ;;  %159 = vst.msk [vmem:[#allocation2 + $0x8] sm:$0xff] %vm21_vm0, %v152_v39 }
  0xfb   :  { %160 = vst.msk [vmem:[#allocation2 + $0x10] sm:$0xff] %vm21_vm0, %v153_v41  ;;  %158 = vst.msk [vmem:[#allocation2] sm:$0xff] %vm21_vm0, %v151_v42  ;;  %v271_v45 = vpop.f32.mrb[2].mxu1 }
  0xfc   :  { %v156_v46 = vadd.f32 %v271_v45, %v33_v43  ;;  %v142_v47 = vpop.f32.mrb[3].mxu1 }
  0xfd   :  { %v155_v48 = vadd.f32 %v142_v47, %v32_v44 }
  0xfe   :  { %163 = vst.msk [vmem:[#allocation2 + $0x28] sm:$0xff] %vm21_vm0, %v156_v46 }
  0xff   :  { %162 = vst.msk [vmem:[#allocation2 + $0x20] sm:$0xff] %vm21_vm0, %v155_v48 }
 0x101   :  { %v170_v52 = vld [vmem:[#allocation2 + $0x18] sm:$0xff]  ;;  %v168_v53 = vld [vmem:[#allocation2 + $0x8] sm:$0xff] }
 0x102   :  { %v183_v55 = vadd.f32 %v208_v49, %v170_v52  ;;  %v169_v56 = vld [vmem:[#allocation2 + $0x10] sm:$0xff]  ;;  %v181_v57 = vadd.f32 %v208_v49, %v168_v53  ;;  %v167_v58 = vld [vmem:[#allocation2] sm:$0xff] }
 0x103   :  { %v182_v60 = vadd.f32 %v208_v49, %v169_v56  ;;  %v180_v61 = vadd.f32 %v208_v49, %v167_v58 }
 0x104   :  { %v195_v62 = vadd.f32 %v189_v50, %v183_v55  ;;  %v193_v63 = vadd.f32 %v187_v54, %v181_v57 }
 0x105   :  { %v194_v0 = vadd.f32 %v188_v51, %v182_v60  ;;  %v192_v1 = vadd.f32 %v186_v59, %v180_v61  ;;  %v172_v2 = vld [vmem:[#allocation2 + $0x28] sm:$0xff] }
 0x106   :  { %201 = vst.msk [vmem:[%s474_s4 + $0x18] sm:$0xff] %vm21_vm0, %v195_v62  ;;  %199 = vst.msk [vmem:[%s474_s4 + $0x8] sm:$0xff] %vm21_vm0, %v193_v63  ;;  %v185_v4 = vadd.f32 %v208_v49, %v172_v2  ;;  %v171_v5 = vld [vmem:[#allocation2 + $0x20] sm:$0xff] }
 0x107   :  { %200 = vst.msk [vmem:[%s474_s4 + $0x10] sm:$0xff] %vm21_vm0, %v194_v0  ;;  %198 = vst.msk [vmem:[%s474_s4] sm:$0xff] %vm21_vm0, %v192_v1  ;;  %v184_v7 = vadd.f32 %v208_v49, %v171_v5 }
 0x108   :  { %v197_v8 = vadd.f32 %v191_v3, %v185_v4 }
 0x109   :  { %v196_v9 = vadd.f32 %v190_v6, %v184_v7 }
 0x10a   :  { %203 = vst.msk [vmem:[%s474_s4 + $0x28] sm:$0xff] %vm21_vm0, %v197_v8 }
 0x10b   :  { %202 = vst.msk [vmem:[%s474_s4 + $0x20] sm:$0xff] %vm21_vm0, %v196_v9 }

// kernel: encoder_forward.13
= control target key start
LH: loop header
LB: loop body
LE: loop exit
PB: predicated region body
PF: predicated region fallthrough
CT: control target
= control target key end

     0   :  { %s1939_s12 = smov 0   ;;  %s1941_s13 = smov 0   ;;  %s2284_s0 = inlined_call_operand.vmem [shape: f32[2,24,384], index: 0, kind: input, shape index: {}, may-alias: {0,1,2}]   ;;  %s2285_s1 = inlined_call_operand.vmem [shape: f32[2,24,384], index: 1, kind: input, shape index: {}, may-alias: {0,1,2}]   ;;  %s2286_s2 = inlined_call_operand.vmem [shape: f32[2,24,384], index: 2, kind: input, shape index: {}, may-alias: {0,1,2}]   ;;  %s2287_s3 = inlined_call_operand.vmem [shape: f32[2,24,128], index: 3, kind: output, shape index: {}]  }
   0x1   :  { %s1943_s14 = smov 0   ;;  %s1945_s15 = smov 0  }
   0x2   :  { %s1947_s16 = smov 0  }
   0x3 LB: > { %s25_s17 = sadd.s32 1, %s1907_s15  ;;  %p41_p1 = scmp.ne.s32.totalorder %s1899_s13, %s1895_s12  ;;  %s1911_s16 = sphi %s1947_s16, %s13_s16   ;;  %s1907_s15 = sphi %s1945_s15, %s2294_s15   ;;  %s1903_s14 = sphi %s1943_s14, %s2293_s14   ;;  %s1899_s13 = sphi %s1941_s13, %s2292_s13   ;;  %s1895_s12 = sphi %s1939_s12, %s2291_s12  }
   0x4   : > { %p27_p0 = scmp.ge.s32.totalorder %s25_s17, 2  ;;  %p42_p2 = scmp.eq.s32.totalorder %s1911_s16, 0 }
   0x5   : > { %s34_s20 = sadd.s32 1, %s1899_s13  ;;  %p1497_p5 = scmp.ge.s32.totalorder %s1911_s16, 2 }
   0x6   : > { %s2296_s17 = smov (%p27_p0, %s25_s17), 0  ;;  %p1970_p3 = por %p42_p2, %p41_p1 }
   0x7   : > { %s29_s19 = ssub.s32 %s1907_s15, %s2296_s17  ;;  %147 = sbr.rel (%p1497_p5) target bundleno = 35 (0x23), region = 16 }
   0x8   : > { %p32_p4 = scmp.eq.s32.totalorder %s29_s19, 0 }
   0xa   : > { %s1978_s21 = scalar_select %p32_p4, %s1899_s13, %s34_s20  }
   0xe   : > { %150 = sbr.rel (!%p1970_p3) target bundleno = 21 (0x15), region = 20  ;;  %s152_s22 = sand.u32 (%p1970_p3), 1, %s1899_s13  }
   0xf   : > { %s1744_s23 = smul.u32 (%p1970_p3), 72, %s1907_s15 }
  0x10   : > { %s1743_s24 = smul.u32 (%p1970_p3), 24, %s152_s22 }
  0x11   : > { %s160_s27 = scalar_lea.vmem (%p1970_p3), %s2284_s0, %s1744_s23 }
  0x12   : > { %v192_v0 = vld [vmem:[%s160_s27] sm:$0xff] (%p1970_p3)  ;;  %v194_v1 = vld [vmem:[%s160_s27 + $0x18] sm:$0xff] (%p1970_p3)  ;;  %v196_v2 = vld [vmem:[%s160_s27 + $0x30] sm:$0xff] (%p1970_p3)  ;;  %s154_s28 = scalar_lea.vmem (%p1970_p3), [#allocation2], %s1743_s24 }
  0x13   : > { %193 = vst [vmem:[%s154_s28] sm:$0xff] (%p1970_p3), %v192_v0  ;;  %195 = vst [vmem:[%s154_s28 + $0x8] sm:$0xff] (%p1970_p3), %v194_v1 }
  0x14   : > { %197 = vst [vmem:[%s154_s28 + $0x10] sm:$0xff] (%p1970_p3), %v196_v2 }
  0x15 PF: > { %203 = sbr.rel (!%p1970_p3) target bundleno = 28 (0x1c), region = 58  ;;  %s205_s29 = sand.u32 (%p1970_p3), 1, %s1899_s13  }
  0x16   : > { %s1499_s30 = smul.u32 (%p1970_p3), 72, %s1907_s15 }
  0x17   : > { %s1745_s4 = smul.u32 (%p1970_p3), 24, %s205_s29 }
  0x18   : > { %s1405_s7 = scalar_lea.vmem (%p1970_p3), %s2285_s1, %s1499_s30 }
  0x19   : > { %v1500_v3 = vld [vmem:[%s1405_s7 + $0x8] sm:$0xff] (%p1970_p3)  ;;  %v1501_v4 = vld [vmem:[%s1405_s7 + $0x20] sm:$0xff] (%p1970_p3)  ;;  %v1502_v5 = vld [vmem:[%s1405_s7 + $0x38] sm:$0xff] (%p1970_p3)  ;;  %s207_s8 = scalar_lea.vmem (%p1970_p3), [#allocation3], %s1745_s4 }
  0x1a   : > { %244 = vst [vmem:[%s207_s8] sm:$0xff] (%p1970_p3), %v1500_v3  ;;  %246 = vst [vmem:[%s207_s8 + $0x8] sm:$0xff] (%p1970_p3), %v1501_v4 }
  0x1b   : > { %248 = vst [vmem:[%s207_s8 + $0x10] sm:$0xff] (%p1970_p3), %v1502_v5 }
  0x1c PF: > { %254 = sbr.rel (!%p1970_p3) target bundleno = 35 (0x23), region = 96  ;;  %s256_s9 = sand.u32 (%p1970_p3), 1, %s1899_s13  }
  0x1d   : > { %s1503_s10 = smul.u32 (%p1970_p3), 72, %s1907_s15 }
  0x1e   : > { %s1746_s11 = smul.u32 (%p1970_p3), 24, %s256_s9 }
  0x1f   : > { %s1411_s22 = scalar_lea.vmem (%p1970_p3), %s2286_s2, %s1503_s10 }
  0x20   : > { %v1504_v6 = vld [vmem:[%s1411_s22 + $0x10] sm:$0xff] (%p1970_p3)  ;;  %v1505_v7 = vld [vmem:[%s1411_s22 + $0x28] sm:$0xff] (%p1970_p3)  ;;  %v1506_v8 = vld [vmem:[%s1411_s22 + $0x40] sm:$0xff] (%p1970_p3)  ;;  %s258_s23 = scalar_lea.vmem (%p1970_p3), [#allocation4], %s1746_s11 }
  0x21   : > { %295 = vst [vmem:[%s258_s23] sm:$0xff] (%p1970_p3), %v1504_v6  ;;  %297 = vst [vmem:[%s258_s23 + $0x8] sm:$0xff] (%p1970_p3), %v1505_v7 }
  0x22   : > { %299 = vst [vmem:[%s258_s23 + $0x10] sm:$0xff] (%p1970_p3), %v1506_v8 }
  0x23 PF: > { %p1507_p6 = scmp.ge.s32.totalorder %s1911_s16, 1  ;;  %p304_p7 = scmp.lt.s32.totalorder %s1911_s16, 3 }
  0x25   : > { %p305_p8 = pnand %p1507_p6, %p304_p7 }
  0x26   : > { %s311_s18 = sand.u32 (!%p305_p8), 1, %s1895_s12   ;;  %v1913_v9 = vmov (!%p305_p8), 0.0|0.0   ;;  %vm383_vm0 = vcmask (!%p305_p8), 261120   ;;  %vm1914_vm1 = vmmov (!%p305_p8), 0   ;;  %v1915_v10 = vmov (!%p305_p8), 0.0   ;;  %s1916_s27 = smov (!%p305_p8), 96  }
  0x27   : > { %308 = sbr.rel (%p305_p8) target bundleno = 1575 (0x627), region = 134  ;;  %1715 = vmatprep.subr.bf16.mxu0 (!%p305_p8), %v1913_v9  ;;  %1601 = vmatprep.mubr.msk.f32.mxu0 (!%p305_p8), %vm1914_vm1, %v1915_v10  ;;  %vm2016_vm2 = vmpackc.low (!%p305_p8), %vm383_vm0, %vm383_vm0  ;;  %vm482_vm3 = vcmask (!%p305_p8), 195584   ;;  %s1917_s28 = smov (!%p305_p8), 64   ;;  %vm858_vm4 = vcmask (!%p305_p8), 523520   ;;  %vm1109_vm5 = vcmask (!%p305_p8), 785920   ;;  %vm1360_vm6 = vcmask (!%p305_p8), 1048320  }
  0x28   : > { %s2006_s24 = smul.u32 (!%p305_p8), 24, %s311_s18  ;;  %1719 = vmatprep.subr.bf16.mxu1 (!%p305_p8), %v1913_v9  ;;  %1616 = vmatprep.mubr.msk.f32.mxu1 (!%p305_p8), %vm1914_vm1, %v1915_v10  ;;  %s1918_s29 = smov (!%p305_p8), 32  }
  0x29   : > { %p362_p9 = scmp.lt.s32.totalorder (!%p305_p8), %s1903_s14, 1 }
  0x2a   : > { %s320_s25 = scalar_lea.vmem (!%p305_p8), [#allocation3], %s2006_s24  ;;  %s313_s12 = scalar_lea.vmem (!%p305_p8), [#allocation2], %s2006_s24 }
  0x2b   : > { %v377_v11 = vld [vmem:[%s320_s25] sm:$0xff] (!%p305_p8)  ;;  %v378_v12 = vld [vmem:[%s320_s25 + $0x8] sm:$0xff] (!%p305_p8)  ;;  %v371_v15 = vld [vmem:[%s313_s12] sm:$0xff] (!%p305_p8)  ;;  %s327_s26 = scalar_lea.vmem (!%p305_p8), [#allocation4], %s2006_s24 }
  0x2c   : > { %v1716_v14 = vpack.c.bf16 (!%p305_p8), %v378_v12, %v377_v11  ;;  %v2024_v16 = vld [vmem:[%s320_s25 + $0x10] sm:$0xff] (!%p305_p8)  ;;  %v2026_v17 = vmul.f32 (!%p305_p8), 0.17677669, %v371_v15  ;;  %v372_v18 = vld [vmem:[%s313_s12 + $0x8] sm:$0xff] (!%p305_p8)  ;;  %v373_v20 = vld [vmem:[%s313_s12 + $0x10] sm:$0xff] (!%p305_p8)  ;;  %v1800_v44 = vpack.i.bf16 (!%p305_p8), %v378_v12, %v377_v11 }
  0x2d   : > { %v2033_v19 = vmul.f32 (!%p305_p8), 0.17677669, %v372_v18  ;;  %v376_v21 = vmul.f32 (!%p305_p8), 0.17677669, %v373_v20  ;;  %v2050_v41 = vld [vmem:[%s327_s26] sm:$0xff] (!%p305_p8)  ;;  %v2052_v42 = vld [vmem:[%s327_s26 + $0x8] sm:$0xff] (!%p305_p8) }
  0x2e   : > { %1718 = vmatpush3.bf16.xpose.msk.msra.mxu0 %vm2016_vm2, %v1716_v14  ;;  %v1720_v43 = vpack.c.bf16 %v2052_v42, %v2050_v41  ;;  %v2059_v45 = vld [vmem:[%s327_s26 + $0x10] sm:$0xff]  ;;  %s2298_s14 = smov (!%p362_p9, %s1903_s14), 1 }
  0x2f   : > { %1599 = vmatprep.subr.mxu0 %v1915_v10  ;;  %s1748_s30 = smul.u32 24, %s2298_s14 }
  0x30   : > { %1721 = vmatpush3.bf16.msra.mxu1 %v1720_v43 }
  0x31   : > { %1614 = vmatprep.subr.mxu1 %v1915_v10  ;;  %s2139_s6 = scalar_lea.vmem %s2287_s3, %s1748_s30 }
  0x34   : > { %1615 = vmatpush3.msra.mxu1 %v2059_v45 }
  0x35   : > { %1722 = vmatprep.subr.bf16.mxu1 %v1913_v9 }
  0x36   : > { %1600 = vmatpush3.xpose.msk.msra.mxu0 %vm383_vm0, %v2024_v16 }
  0x37   : > { %1726 = vmatprep.subr.bf16.mxu0 %v1913_v9 }
  0x39   : > { %1602 = vmatmul.mubr.msk.f32.vlgmr.msra.gmra.mrb[0].mxu0 %vm383_vm0, %v2026_v17 }
  0x3a   : > { %1604 = vmatprep.mubr.msk.f32.mxu0 %vm1914_vm1, %v1915_v10 }
  0x3d   : > { %1605 = vmatmul.mubr.msk.f32.gmra.mrb[2].mxu0 %vm383_vm0, %v2033_v19 }
  0x3e   : > { %1607 = vmatprep.mubr.msk.f32.mxu0 %vm1914_vm1, %v1915_v10 }
  0x41   : > { %1608 = vmatmul.mubr.msk.f32.gmra.mrb[4].mxu0 %vm383_vm0, %v376_v21 }
  0x42   : > { %1646 = vmatprep.mubr.msk.f32.mxu0 %vm1914_vm1, %v1915_v10 }
 0x10c   : > { %v468_v22 = vpop.f32.mrb[0].mxu0 }
 0x10d   : > { %v1603_v23 = vpop.f32.mrb[1].mxu0  ;;  %v483_v24 = vsel %vm482_vm3, %v468_v22, -inf }
 0x10e   : > { %484 = vmax.xlane.f32.xlu0 %v483_v24 }
 0x110   : > { %v473_v25 = vpop.f32.mrb[2].mxu0 }
 0x111   : > { %v486_v26 = vsel %vm482_vm3, %v473_v25, -inf  ;;  %v1606_v27 = vpop.f32.mrb[3].mxu0 }
 0x112   : > { %487 = vmax.xlane.f32.xlu0 %v486_v26 }
 0x114   : > { %v478_v28 = vpop.f32.mrb[4].mxu0 }
 0x115   : > { %v489_v29 = vsel %vm482_vm3, %v478_v28, -inf  ;;  %v1609_v30 = vpop.f32.mrb[5].mxu0 }
 0x116   : > { %490 = vmax.xlane.f32.xlu1 %v489_v29 }
 0x19b   : > { %v485_v31 = vpop.xlane.xlu0 %484 }
 0x19c   : > { %v492_v32 = vsub.f32 %v468_v22, %v485_v31 }
 0x19e   : > { %v495_v33 = vmul.f32 1.442695, %v492_v32 }
 0x19f   : > { %v488_v34 = vpop.xlane.xlu0 %487 }
 0x1a0   : > { %1825 = vpow2.f32 %v495_v33  ;;  %v493_v35 = vsub.f32 %v473_v25, %v488_v34 }
 0x1a2   : > { %v497_v36 = vmul.f32 1.442695, %v493_v35 }
 0x1a3   : > { %v491_v46 = vpop.xlane.xlu1 %490 }
 0x1a4   : > { %1827 = vpow2.f32 %v497_v36  ;;  %v494_v47 = vsub.f32 %v478_v28, %v491_v46 }
 0x1a6   : > { %v499_v48 = vmul.f32 1.442695, %v494_v47 }
 0x1a8   : > { %1829 = vpow2.f32 %v499_v48 }
 0x1aa   : > { %v1826_v37 = vpop.eup %1825 }
 0x1ab   : > { %v501_v38 = vsel %vm482_vm3, %v1826_v37, 0.0 }
 0x1ac   : > { %502 = vadd.xlane.f32.xlu1 %v501_v38 }
 0x1ae   : > { %v1828_v39 = vpop.eup %1827 }
 0x1af   : > { %v504_v40 = vsel %vm482_vm3, %v1828_v39, 0.0 }
 0x1b0   : > { %505 = vadd.xlane.f32.xlu0 %v504_v40 }
 0x1b2   : > { %v1830_v49 = vpop.eup %1829 }
 0x1b3   : > { %v507_v50 = vsel %vm482_vm3, %v1830_v49, 0.0 }
 0x1bd   : > { %618 = vrot.lane.b32.xlu1 %v2024_v16, %s1916_s27 }
 0x1c1   : > { %1801 = vrot.lane.b32.xlu1 %v1800_v44, %s1917_s28 }
 0x1c6   : > { %1796 = vrot.lane.b32.xlu0 %v1800_v44, %s1916_s27 }
 0x1ca   : > { %610 = vrot.lane.b32.xlu0 %v2033_v19, %s1916_s27 }
 0x1ce   : > { %872 = vrot.lane.b32.xlu0 %v2024_v16, %s1917_s28 }
 0x1d2   : > { %862 = vrot.lane.b32.xlu0 %v2026_v17, %s1917_s28 }
 0x1d6   : > { %866 = vrot.lane.b32.xlu0 %v376_v21, %s1917_s28 }
 0x1da   : > { %1113 = vrot.lane.b32.xlu0 %v2026_v17, %s1918_s29 }
 0x1de   : > { %1117 = vrot.lane.b32.xlu0 %v376_v21, %s1918_s29 }
 0x1e5   : > { %508 = vadd.xlane.f32.xlu1 %v507_v50 }
 0x1f6   : > { %608 = vrot.lane.b32.xlu1 %v2026_v17, %s1916_s27 }
 0x1fa   : > { %612 = vrot.lane.b32.xlu1 %v376_v21, %s1916_s27 }
 0x1fe   : > { %1806 = vrot.lane.b32.xlu1 %v1800_v44, %s1918_s29 }
 0x202   : > { %864 = vrot.lane.b32.xlu1 %v2033_v19, %s1917_s28 }
 0x206   : > { %1123 = vrot.lane.b32.xlu1 %v2024_v16, %s1918_s29 }
 0x20a   : > { %1115 = vrot.lane.b32.xlu1 %v2033_v19, %s1918_s29 }
 0x239   : > { %v503_v51 = vpop.xlane.xlu1 %502 }
 0x23a   : > { %1831 = vrcp.f32 %v503_v51 }
 0x23d   : > { %v506_v52 = vpop.xlane.xlu0 %505  ;;  %v619_v61 = vpop.permute.xlu1 %618 }
 0x23e   : > { %1833 = vrcp.f32 %v506_v52 }
 0x241   : > { %v1797_v53 = vpop.permute.xlu0 %1796  ;;  %v1802_v62 = vpop.permute.xlu1 %1801 }
 0x242   : > { %v1799_v54 = vunpack.i.h.bf16 %v1797_v53  ;;  %v1798_v55 = vunpack.i.l.bf16 %v1797_v53  ;;  %v1804_v3 = vunpack.i.h.bf16 %v1802_v62  ;;  %v1803_v4 = vunpack.i.l.bf16 %v1802_v62 }
 0x244   : > { %v1832_v56 = vpop.eup %1831  ;;  %v1723_v57 = vpack.c.bf16 %v1799_v54, %v1798_v55  ;;  %v1730_v7 = vpack.c.bf16 %v1804_v3, %v1803_v4 }
 0x245   : > { %v513_v58 = vmul.f32 %v1832_v56, %v1826_v37  ;;  %v611_v6 = vpop.permute.xlu0 %610 }
 0x247   : > { %1617 = vmatmul.mubr.msk.f32.vlgmr.msra.gmra.mrb[0].mxu1 %vm482_vm3, %v513_v58  ;;  %v2164_v58 = vpack.i.bf16 %v2052_v42, %v2050_v41 }
 0x248   : > { %v1834_v59 = vpop.eup %1833  ;;  %1725 = vmatpush3.bf16.xpose.msk.msra.mxu1 %vm2016_vm2, %v1723_v57  ;;  %1619 = vmatprep.mubr.msk.f32.mxu1 %vm1914_vm1, %v1915_v10 }
 0x249   : > { %v514_v60 = vmul.f32 %v1834_v59, %v1828_v39  ;;  %1629 = vmatprep.subr.mxu1 %v1915_v10  ;;  %v873_v11 = vpop.permute.xlu0 %872 }
 0x24b   : > { %1620 = vmatmul.mubr.msk.f32.gmra.mrb[2].mxu1 %vm482_vm3, %v514_v60 }
 0x24c   : > { %1622 = vmatprep.mubr.msk.f32.mxu1 %vm1914_vm1, %v1915_v10 }
 0x24d   : > { %v863_v16 = vpop.permute.xlu0 %862 }
 0x250   : > { %1630 = vmatpush3.xpose.msk.msra.mxu1 %vm383_vm0, %v619_v61 }
 0x251   : > { %1729 = vmatprep.subr.bf16.mxu1 %v1913_v9  ;;  %v867_v18 = vpop.permute.xlu0 %866 }
 0x255   : > { %v1114_v13 = vpop.permute.xlu0 %1113 }
 0x259   : > { %v1118_v21 = vpop.permute.xlu0 %1117 }
 0x272   : > { %v509_v63 = vpop.xlane.xlu1 %508 }
 0x273   : > { %1835 = vrcp.f32 %v509_v63 }
 0x276   : > { %v609_v0 = vpop.permute.xlu1 %608 }
 0x27a   : > { %v613_v5 = vpop.permute.xlu1 %612 }
 0x27d   : > { %v1836_v1 = vpop.eup %1835 }
 0x27e   : > { %v515_v2 = vmul.f32 %v1836_v1, %v1830_v49  ;;  %v1807_v8 = vpop.permute.xlu1 %1806 }
 0x27f   : > { %v1809_v12 = vunpack.i.h.bf16 %v1807_v8  ;;  %v1808_v14 = vunpack.i.l.bf16 %v1807_v8 }
 0x280   : > { %1623 = vmatmul.mubr.msk.f32.gmra.mrb[4].mxu1 %vm482_vm3, %v515_v2 }
 0x281   : > { %1631 = vmatprep.mubr.msk.f32.mxu1 %vm1914_vm1, %v1915_v10  ;;  %v1737_v15 = vpack.c.bf16 %v1809_v12, %v1808_v14 }
 0x282   : > { %v865_v17 = vpop.permute.xlu1 %864 }
 0x284   : > { %1632 = vmatmul.mubr.msk.f32.vlgmr.msra.gmra.mrb[6].mxu1 %vm383_vm0, %v609_v0 }
 0x285   : > { %1732 = vmatpush3.bf16.xpose.msk.msra.mxu1 %vm2016_vm2, %v1730_v7  ;;  %1634 = vmatprep.mubr.msk.f32.mxu1 %vm1914_vm1, %v1915_v10 }
 0x286   : > { %1659 = vmatprep.subr.mxu1 %v1915_v10  ;;  %v1124_v19 = vpop.permute.xlu1 %1123 }
 0x288   : > { %1635 = vmatmul.mubr.msk.f32.gmra.mrb[8].mxu1 %vm383_vm0, %v611_v6 }
 0x289   : > { %1637 = vmatprep.mubr.msk.f32.mxu1 %vm1914_vm1, %v1915_v10 }
 0x28a   : > { %v1116_v20 = vpop.permute.xlu1 %1115 }
 0x28c   : > { %1638 = vmatmul.mubr.msk.f32.gmra.mrb[10].mxu1 %vm383_vm0, %v613_v5 }
 0x28d   : > { %1660 = vmatpush3.xpose.msk.msra.mxu1 %vm383_vm0, %v873_v11  ;;  %1661 = vmatprep.mubr.msk.f32.mxu1 %vm1914_vm1, %v1915_v10 }
 0x28e   : > { %1736 = vmatprep.subr.bf16.mxu1 %v1913_v9 }
 0x290   : > { %1662 = vmatmul.mubr.msk.f32.vlgmr.msra.gmra.mrb[12].mxu1 %vm383_vm0, %v863_v16 }
 0x291   : > { %1739 = vmatpush3.bf16.xpose.msk.msra.mxu1 %vm2016_vm2, %v1737_v15  ;;  %1664 = vmatprep.mubr.msk.f32.mxu1 %vm1914_vm1, %v1915_v10 }
 0x292   : > { %1689 = vmatprep.subr.mxu1 %v1915_v10 }
 0x294   : > { %1665 = vmatmul.mubr.msk.f32.gmra.mrb[14].mxu1 %vm383_vm0, %v865_v17 }
 0x295   : > { %1667 = vmatprep.mubr.msk.f32.mxu1 %vm1914_vm1, %v1915_v10 }
 0x298   : > { %1668 = vmatmul.mubr.msk.f32.gmra.mrb[16].mxu1 %vm383_vm0, %v867_v18 }
 0x299   : > { %1690 = vmatpush3.xpose.msk.msra.mxu1 %vm383_vm0, %v1124_v19  ;;  %1691 = vmatprep.mubr.msk.f32.mxu1 %vm1914_vm1, %v1915_v10 }
 0x29c   : > { %1692 = vmatmul.mubr.msk.f32.vlgmr.msra.gmra.mrb[18].mxu1 %vm383_vm0, %v1114_v13 }
 0x29d   : > { %1694 = vmatprep.mubr.msk.f32.mxu1 %vm1914_vm1, %v1915_v10 }
 0x2a0   : > { %1695 = vmatmul.mubr.msk.f32.gmra.mrb[20].mxu1 %vm383_vm0, %v1116_v20 }
 0x2a1   : > { %1697 = vmatprep.mubr.msk.f32.mxu1 %vm1914_vm1, %v1915_v10 }
 0x2a4   : > { %1698 = vmatmul.mubr.msk.f32.gmra.mrb[22].mxu1 %vm383_vm0, %v1118_v21 }
 0x31a   : > { %v591_v22 = vpop.f32.mrb[0].mxu1 }
 0x31b   : > { %605 = vst.msk [vmem:[%s2139_s6] sm:$0xff] %vm383_vm0, %v591_v22  ;;  %v1618_v23 = vpop.f32.mrb[1].mxu1 }
 0x31e   : > { %v596_v24 = vpop.f32.mrb[2].mxu1 }
 0x31f   : > { %606 = vst.msk [vmem:[%s2139_s6 + $0x8] sm:$0xff] %vm383_vm0, %v596_v24  ;;  %v1621_v25 = vpop.f32.mrb[3].mxu1 }
 0x353   : > { %v601_v26 = vpop.f32.mrb[4].mxu1 }
 0x354   : > { %607 = vst.msk [vmem:[%s2139_s6 + $0x10] sm:$0xff] %vm383_vm0, %v601_v26  ;;  %v1624_v27 = vpop.f32.mrb[5].mxu1 }
 0x357   : > { %v698_v28 = vpop.f32.mrb[6].mxu1 }
 0x358   : > { %v1633_v29 = vpop.f32.mrb[7].mxu1  ;;  %v712_v30 = vsel %vm482_vm3, %v698_v28, -inf }
 0x359   : > { %713 = vmax.xlane.f32.xlu1 %v712_v30 }
 0x35b   : > { %v703_v31 = vpop.f32.mrb[8].mxu1 }
 0x35c   : > { %v1636_v32 = vpop.f32.mrb[9].mxu1  ;;  %v715_v33 = vsel %vm482_vm3, %v703_v31, -inf }
 0x35d   : > { %716 = vmax.xlane.f32.xlu0 %v715_v33 }
 0x35f   : > { %v708_v34 = vpop.f32.mrb[10].mxu1 }
 0x360   : > { %v718_v35 = vsel %vm482_vm3, %v708_v34, -inf  ;;  %v1639_v36 = vpop.f32.mrb[11].mxu1 }
 0x361   : > { %719 = vmax.xlane.f32.xlu0 %v718_v35 }
 0x363   : > { %v2150_v37 = vpop.f32.mrb[12].mxu1 }
 0x364   : > { %v966_v38 = vsel %vm482_vm3, %v2150_v37, -inf  ;;  %v1663_v39 = vpop.f32.mrb[13].mxu1 }
 0x365   : > { %967 = vmax.xlane.f32.xlu0 %v966_v38 }
 0x367   : > { %v957_v40 = vpop.f32.mrb[14].mxu1 }
 0x368   : > { %v969_v43 = vsel %vm482_vm3, %v957_v40, -inf  ;;  %v1666_v44 = vpop.f32.mrb[15].mxu1 }
 0x369   : > { %970 = vmax.xlane.f32.xlu1 %v969_v43 }
 0x36b   : > { %v962_v46 = vpop.f32.mrb[16].mxu1 }
 0x36c   : > { %v972_v47 = vsel %vm482_vm3, %v962_v46, -inf  ;;  %v1669_v48 = vpop.f32.mrb[17].mxu1 }
 0x36d   : > { %973 = vmax.xlane.f32.xlu0 %v972_v47 }
 0x36f   : > { %v1203_v49 = vpop.f32.mrb[18].mxu1 }
 0x370   : > { %v1217_v50 = vsel %vm482_vm3, %v1203_v49, -inf  ;;  %v1693_v51 = vpop.f32.mrb[19].mxu1 }
 0x371   : > { %1218 = vmax.xlane.f32.xlu1 %v1217_v50 }
 0x373   : > { %v2157_v52 = vpop.f32.mrb[20].mxu1 }
 0x374   : > { %v1220_v53 = vsel %vm482_vm3, %v2157_v52, -inf  ;;  %v1696_v54 = vpop.f32.mrb[21].mxu1 }
 0x375   : > { %1221 = vmax.xlane.f32.xlu0 %v1220_v53 }
 0x377   : > { %v1213_v55 = vpop.f32.mrb[22].mxu1 }
 0x378   : > { %v1223_v56 = vsel %vm482_vm3, %v1213_v55, -inf  ;;  %v1699_v57 = vpop.f32.mrb[23].mxu1 }
 0x379   : > { %1224 = vmax.xlane.f32.xlu1 %v1223_v56 }
 0x38a   : > { %1811 = vrot.lane.b32.xlu1 %v2164_v58, %s1916_s27 }
 0x38b   : > { %752 = vrot.lane.b32.xlu0 %v2059_v45, %s1916_s27 }
 0x38f   : > { %1816 = vrot.lane.b32.xlu0 %v2164_v58, %s1917_s28 }
 0x3e6   : > { %v714_v59 = vpop.xlane.xlu1 %713 }
 0x3e7   : > { %v721_v60 = vsub.f32 %v698_v28, %v714_v59 }
 0x3e9   : > { %v724_v61 = vmul.f32 1.442695, %v721_v60 }
 0x3ea   : > { %v717_v62 = vpop.xlane.xlu0 %716 }
 0x3eb   : > { %1837 = vpow2.f32 %v724_v61  ;;  %v722_v63 = vsub.f32 %v703_v31, %v717_v62 }
 0x3ed   : > { %v726_v0 = vmul.f32 1.442695, %v722_v63 }
 0x3ee   : > { %v720_v1 = vpop.xlane.xlu0 %719 }
 0x3ef   : > { %1839 = vpow2.f32 %v726_v0  ;;  %v723_v41 = vsub.f32 %v708_v34, %v720_v1 }
 0x3f1   : > { %v728_v42 = vmul.f32 1.442695, %v723_v41 }
 0x3f2   : > { %v968_v3 = vpop.xlane.xlu0 %967 }
 0x3f3   : > { %1841 = vpow2.f32 %v728_v42  ;;  %v975_v38 = vsub.f32 %v2150_v37, %v968_v3 }
 0x3f5   : > { %v2172_v2 = vpop.eup %1837  ;;  %v978_v39 = vmul.f32 1.442695, %v975_v38 }
 0x3f6   : > { %v971_v4 = vpop.xlane.xlu1 %970  ;;  %v730_v5 = vsel %vm482_vm3, %v2172_v2, 0.0 }
 0x3f7   : > { %v976_v6 = vsub.f32 %v957_v40, %v971_v4  ;;  %731 = vadd.xlane.f32.xlu0 %v730_v5 }
 0x3f9   : > { %v2176_v7 = vpop.eup %1839  ;;  %v980_v8 = vmul.f32 1.442695, %v976_v6 }
 0x3fa   : > { %v974_v11 = vpop.xlane.xlu0 %973  ;;  %v733_v12 = vsel %vm482_vm3, %v2176_v7, 0.0 }
 0x3fb   : > { %1843 = vpow2.f32 %v980_v8  ;;  %v977_v14 = vsub.f32 %v962_v46, %v974_v11  ;;  %734 = vadd.xlane.f32.xlu1 %v733_v12 }
 0x3fd   : > { %v2180_v15 = vpop.eup %1841  ;;  %v982_v16 = vmul.f32 1.442695, %v977_v14 }
 0x3fe   : > { %v1219_v17 = vpop.xlane.xlu1 %1218  ;;  %v736_v18 = vsel %vm482_vm3, %v2180_v15, 0.0 }
 0x3ff   : > { %1845 = vpow2.f32 %v982_v16  ;;  %v1226_v19 = vsub.f32 %v1203_v49, %v1219_v17  ;;  %737 = vadd.xlane.f32.xlu0 %v736_v18 }
 0x401   : > { %v1229_v13 = vmul.f32 1.442695, %v1226_v19 }
 0x402   : > { %v1222_v30 = vpop.xlane.xlu0 %1221 }
 0x403   : > { %1847 = vpow2.f32 %v1229_v13  ;;  %v1227_v40 = vsub.f32 %v2157_v52, %v1222_v30 }
 0x405   : > { %v2184_v20 = vpop.eup %1843  ;;  %v1231_v43 = vmul.f32 1.442695, %v1227_v40 }
 0x406   : > { %v1225_v21 = vpop.xlane.xlu1 %1224  ;;  %v987_v22 = vsel %vm482_vm3, %v2184_v20, 0.0  ;;  %v753_v34 = vpop.permute.xlu0 %752 }
 0x407   : > { %v1228_v23 = vsub.f32 %v1213_v55, %v1225_v21  ;;  %988 = vadd.xlane.f32.xlu0 %v987_v22 }
 0x409   : > { %v2188_v24 = vpop.eup %1845  ;;  %v1233_v25 = vmul.f32 1.442695, %v1228_v23 }
 0x40a   : > { %v990_v26 = vsel %vm482_vm3, %v2188_v24, 0.0  ;;  %v1812_v27 = vpop.permute.xlu1 %1811  ;;  %v1817_v37 = vpop.permute.xlu0 %1816 }
 0x40b   : > { %1849 = vpow2.f32 %v1233_v25  ;;  %991 = vadd.xlane.f32.xlu0 %v990_v26  ;;  %v1814_v28 = vunpack.i.h.bf16 %v1812_v27  ;;  %v1813_v29 = vunpack.i.l.bf16 %v1812_v27  ;;  %v1819_v52 = vunpack.i.h.bf16 %v1817_v37 }
 0x40c   : > { %1003 = vrot.lane.b32.xlu1 %v2059_v45, %s1917_s28  ;;  %1851 = vpow2.f32 %v978_v39  ;;  %v1818_v53 = vunpack.i.l.bf16 %v1817_v37 }
 0x40d   : > { %v2194_v31 = vpop.eup %1847  ;;  %v1727_v32 = vpack.c.bf16 %v1814_v28, %v1813_v29  ;;  %1853 = vpow2.f32 %v1231_v43 }
 0x40e   : > { %v1235_v33 = vsel %vm482_vm3, %v2194_v31, 0.0  ;;  %v1734_v56 = vpack.c.bf16 %v1819_v52, %v1818_v53 }
 0x40f   : > { %1236 = vadd.xlane.f32.xlu0 %v1235_v33  ;;  %1728 = vmatpush3.bf16.msra.mxu0 %v1727_v32 }
 0x410   : > { %1644 = vmatprep.subr.mxu0 %v1915_v10 }
 0x413   : > { %1645 = vmatpush3.msra.mxu0 %v753_v34 }
 0x414   : > { %1733 = vmatprep.subr.bf16.mxu0 %v1913_v9 }
 0x415   : > { %v2200_v35 = vpop.eup %1849 }
 0x416   : > { %v1241_v36 = vsel %vm482_vm3, %v2200_v35, 0.0  ;;  %v1852_v44 = vpop.eup %1851 }
 0x417   : > { %1242 = vadd.xlane.f32.xlu0 %v1241_v36  ;;  %v984_v46 = vsel %vm482_vm3, %v1852_v44, 0.0  ;;  %v2209_v47 = vpop.eup %1853 }
 0x418   : > { %v1238_v48 = vsel %vm482_vm3, %v2209_v47, 0.0 }
 0x42d   : > { %1821 = vrot.lane.b32.xlu0 %v2164_v58, %s1918_s29 }
 0x430   : > { %985 = vadd.xlane.f32.xlu1 %v984_v46 }
 0x434   : > { %1239 = vadd.xlane.f32.xlu1 %v1238_v48 }
 0x445   : > { %1254 = vrot.lane.b32.xlu1 %v2059_v45, %s1918_s29 }
 0x484   : > { %v732_v49 = vpop.xlane.xlu0 %731 }
 0x485   : > { %1855 = vrcp.f32 %v732_v49 }
 0x488   : > { %v735_v50 = vpop.xlane.xlu1 %734 }
 0x489   : > { %1857 = vrcp.f32 %v735_v50 }
 0x48c   : > { %v738_v51 = vpop.xlane.xlu0 %737  ;;  %v1004_v58 = vpop.permute.xlu1 %1003 }
 0x48d   : > { %1859 = vrcp.f32 %v738_v51 }
 0x48f   : > { %v1856_v54 = vpop.eup %1855 }
 0x490   : > { %v742_v55 = vmul.f32 %v1856_v54, %v2172_v2 }
 0x492   : > { %1647 = vmatmul.mubr.msk.f32.vlgmr.msra.gmra.mrb[6].mxu0 %vm482_vm3, %v742_v55 }
 0x493   : > { %v1858_v57 = vpop.eup %1857  ;;  %1735 = vmatpush3.bf16.msra.mxu0 %v1734_v56  ;;  %1649 = vmatprep.mubr.msk.f32.mxu0 %vm1914_vm1, %v1915_v10 }
 0x494   : > { %1674 = vmatprep.subr.mxu0 %v1915_v10  ;;  %v743_v45 = vmul.f32 %v1858_v57, %v2176_v7  ;;  %v989_v61 = vpop.xlane.xlu0 %988 }
 0x496   : > { %1650 = vmatmul.mubr.msk.f32.gmra.mrb[8].mxu0 %vm482_vm3, %v743_v45 }
 0x497   : > { %v1860_v59 = vpop.eup %1859  ;;  %1675 = vmatpush3.msra.mxu0 %v1004_v58  ;;  %1652 = vmatprep.mubr.msk.f32.mxu0 %vm1914_vm1, %v1915_v10 }
 0x498   : > { %v744_v60 = vmul.f32 %v1860_v59, %v2180_v15  ;;  %1740 = vmatprep.subr.bf16.mxu0 %v1913_v9  ;;  %v992_v62 = vpop.xlane.xlu0 %991 }
 0x49a   : > { %1653 = vmatmul.mubr.msk.f32.gmra.mrb[10].mxu0 %vm482_vm3, %v744_v60 }
 0x49b   : > { %1676 = vmatprep.mubr.msk.f32.mxu0 %vm1914_vm1, %v1915_v10 }
 0x49c   : > { %v1237_v63 = vpop.xlane.xlu0 %1236 }
 0x4a4   : > { %v1243_v0 = vpop.xlane.xlu0 %1242 }
 0x4a8   : > { %v1822_v41 = vpop.permute.xlu0 %1821 }
 0x4a9   : > { %v1824_v42 = vunpack.i.h.bf16 %v1822_v41  ;;  %v1823_v2 = vunpack.i.l.bf16 %v1822_v41 }
 0x4ab   : > { %v1741_v4 = vpack.c.bf16 %v1824_v42, %v1823_v2 }
 0x4bd   : > { %v986_v1 = vpop.xlane.xlu1 %985 }
 0x4be   : > { %1861 = vrcp.f32 %v986_v1 }
 0x4bf   : > { %1863 = vrcp.f32 %v989_v61 }
 0x4c0   : > { %1865 = vrcp.f32 %v992_v62 }
 0x4c1   : > { %1867 = vrcp.f32 %v1237_v63  ;;  %v1240_v5 = vpop.xlane.xlu1 %1239 }
 0x4c2   : > { %1869 = vrcp.f32 %v1240_v5 }
 0x4c3   : > { %1871 = vrcp.f32 %v1243_v0 }
 0x4c5   : > { %v1255_v8 = vpop.permute.xlu1 %1254 }
 0x4c8   : > { %v1862_v3 = vpop.eup %1861 }
 0x4c9   : > { %v996_v9 = vmul.f32 %v1862_v3, %v1852_v44  ;;  %v1864_v6 = vpop.eup %1863 }
 0x4ca   : > { %v997_v7 = vmul.f32 %v1864_v6, %v2184_v20  ;;  %v1866_v11 = vpop.eup %1865 }
 0x4cb   : > { %1677 = vmatmul.mubr.msk.f32.vlgmr.msra.gmra.mrb[12].mxu0 %vm482_vm3, %v996_v9  ;;  %v998_v12 = vmul.f32 %v1866_v11, %v2188_v24  ;;  %v1868_v14 = vpop.eup %1867 }
 0x4cc   : > { %1742 = vmatpush3.bf16.msra.mxu0 %v1741_v4  ;;  %1679 = vmatprep.mubr.msk.f32.mxu0 %vm1914_vm1, %v1915_v10  ;;  %v1247_v15 = vmul.f32 %v1868_v14, %v2194_v31  ;;  %v1870_v16 = vpop.eup %1869 }
 0x4cd   : > { %1704 = vmatprep.subr.mxu0 %v1915_v10  ;;  %v1248_v17 = vmul.f32 %v1870_v16, %v2209_v47  ;;  %v1872_v18 = vpop.eup %1871 }
 0x4ce   : > { %v1249_v19 = vmul.f32 %v1872_v18, %v2200_v35 }
 0x4cf   : > { %1680 = vmatmul.mubr.msk.f32.gmra.mrb[14].mxu0 %vm482_vm3, %v997_v7 }
 0x4d0   : > { %1705 = vmatpush3.msra.mxu0 %v1255_v8  ;;  %1682 = vmatprep.mubr.msk.f32.mxu0 %vm1914_vm1, %v1915_v10 }
 0x4d3   : > { %1683 = vmatmul.mubr.msk.f32.gmra.mrb[16].mxu0 %vm482_vm3, %v998_v12 }
 0x4d4   : > { %1706 = vmatprep.mubr.msk.f32.mxu0 %vm1914_vm1, %v1915_v10 }
 0x4d7   : > { %1707 = vmatmul.mubr.msk.f32.vlgmr.msra.gmra.mrb[18].mxu0 %vm482_vm3, %v1247_v15 }
 0x4d8   : > { %1709 = vmatprep.mubr.msk.f32.mxu0 %vm1914_vm1, %v1915_v10 }
 0x4db   : > { %1710 = vmatmul.mubr.msk.f32.gmra.mrb[20].mxu0 %vm482_vm3, %v1248_v17 }
 0x4dc   : > { %1712 = vmatprep.mubr.msk.f32.mxu0 %vm1914_vm1, %v1915_v10 }
 0x4df   : > { %1713 = vmatmul.mubr.msk.f32.gmra.mrb[22].mxu0 %vm482_vm3, %v1249_v19 }
 0x565   : > { %v832_v13 = vpop.f32.mrb[6].mxu0 }
 0x566   : > { %849 = vrot.lane.b32.xlu1 %v832_v13, %s1918_s29  ;;  %v1648_v20 = vpop.f32.mrb[7].mxu0 }
 0x569   : > { %v837_v21 = vpop.f32.mrb[8].mxu0 }
 0x56a   : > { %851 = vrot.lane.b32.xlu1 %v837_v21, %s1918_s29  ;;  %v1651_v22 = vpop.f32.mrb[9].mxu0 }
 0x56d   : > { %v842_v23 = vpop.f32.mrb[10].mxu0 }
 0x56e   : > { %853 = vrot.lane.b32.xlu1 %v842_v23, %s1918_s29  ;;  %v1654_v24 = vpop.f32.mrb[11].mxu0 }
 0x59e   : > { %v1083_v25 = vpop.f32.mrb[12].mxu0 }
 0x59f   : > { %1100 = vrot.lane.b32.xlu1 %v1083_v25, %s1917_s28  ;;  %v1678_v10 = vpop.f32.mrb[13].mxu0 }
 0x5a2   : > { %v1088_v26 = vpop.f32.mrb[14].mxu0 }
 0x5a3   : > { %1102 = vrot.lane.b32.xlu1 %v1088_v26, %s1917_s28  ;;  %v1681_v27 = vpop.f32.mrb[15].mxu0 }
 0x5a6   : > { %v1093_v28 = vpop.f32.mrb[16].mxu0 }
 0x5a7   : > { %1104 = vrot.lane.b32.xlu0 %v1093_v28, %s1917_s28  ;;  %v1684_v29 = vpop.f32.mrb[17].mxu0 }
 0x5aa   : > { %v1334_v30 = vpop.f32.mrb[18].mxu0 }
 0x5ab   : > { %1351 = vrot.lane.b32.xlu1 %v1334_v30, %s1916_s27  ;;  %v1708_v31 = vpop.f32.mrb[19].mxu0 }
 0x5ae   : > { %v1339_v32 = vpop.f32.mrb[20].mxu0 }
 0x5af   : > { %1353 = vrot.lane.b32.xlu0 %v1339_v32, %s1916_s27  ;;  %v1711_v33 = vpop.f32.mrb[21].mxu0 }
 0x5b2   : > { %v1344_v34 = vpop.f32.mrb[22].mxu0 }
 0x5b3   : > { %1355 = vrot.lane.b32.xlu1 %v1344_v34, %s1916_s27  ;;  %v1714_v35 = vpop.f32.mrb[23].mxu0 }
 0x5d8   : > { %v850_v36 = vpop.permute.xlu1 %849 }
 0x5d9   : > { %859 = vst.msk [vmem:[%s2139_s6] sm:$0xff] %vm858_vm4, %v850_v36 }
 0x5dc   : > { %v852_v38 = vpop.permute.xlu1 %851 }
 0x5dd   : > { %860 = vst.msk [vmem:[%s2139_s6 + $0x8] sm:$0xff] %vm858_vm4, %v852_v38 }
 0x5e0   : > { %v854_v39 = vpop.permute.xlu1 %853 }
 0x5e1   : > { %861 = vst.msk [vmem:[%s2139_s6 + $0x10] sm:$0xff] %vm858_vm4, %v854_v39 }
 0x611   : > { %v1101_v40 = vpop.permute.xlu1 %1100 }
 0x612   : > { %1110 = vst.msk [vmem:[%s2139_s6] sm:$0xff] %vm1109_vm5, %v1101_v40 }
 0x615   : > { %v1103_v43 = vpop.permute.xlu1 %1102 }
 0x616   : > { %1111 = vst.msk [vmem:[%s2139_s6 + $0x8] sm:$0xff] %vm1109_vm5, %v1103_v43 }
 0x619   : > { %v1105_v44 = vpop.permute.xlu0 %1104 }
 0x61a   : > { %1112 = vst.msk [vmem:[%s2139_s6 + $0x10] sm:$0xff] %vm1109_vm5, %v1105_v44 }
 0x61d   : > { %v1352_v46 = vpop.permute.xlu1 %1351 }
 0x61e   : > { %1361 = vst.msk [vmem:[%s2139_s6] sm:$0xff] %vm1360_vm6, %v1352_v46 }
 0x621   : > { %v1354_v47 = vpop.permute.xlu0 %1353 }
 0x622   : > { %1362 = vst.msk [vmem:[%s2139_s6 + $0x8] sm:$0xff] %vm1360_vm6, %v1354_v47 }
 0x625   : > { %v1356_v48 = vpop.permute.xlu1 %1355 }
 0x626   : > { %1363 = vst.msk [vmem:[%s2139_s6 + $0x10] sm:$0xff] %vm1360_vm6, %v1356_v48 }
 0x627 PF: > { %s13_s16 = sadd.s32 1, %s1911_s16   ;;  %s2291_s12 = smov %s1899_s13 }
 0x628   : > { %p10_p10 = scmp.ge.s32.totalorder %s13_s16, 4   ;;  %s2292_s13 = smov %s1978_s21 }
 0x629   : > { %s2293_s14 = smov %s1907_s15  ;;  %s2294_s15 = smov %s2296_s17 }
 0x62a   :  { %12 = sbr.rel (!%p10_p10) target bundleno = 3 (0x3), region = 197 }

// kernel: encoder_forward.15
= control target key start
LH: loop header
LB: loop body
LE: loop exit
PB: predicated region body
PF: predicated region fallthrough
CT: control target
= control target key end

     0   :  { %vm45_vm0 = vcmask 261120   ;;  %s1125_s0 = inlined_call_operand.vmem [shape: f32[48,32], index: 0, kind: input, shape index: {}, may-alias: {0,9}]   ;;  %s1126_s3 = inlined_call_operand.vmem [shape: f32[32,128], index: 3, kind: input, shape index: {}]   ;;  %s1127_s5 = inlined_call_operand.vmem [shape: f32[32,128], index: 5, kind: input, shape index: {}]   ;;  %s1128_s1 = inlined_call_operand.vmem [shape: f32[1,32], index: 1, kind: input, shape index: {}]   ;;  %s1129_s2 = inlined_call_operand.vmem [shape: f32[1,32], index: 2, kind: input, shape index: {}]   ;;  %s1130_s7 = inlined_call_operand.vmem [shape: f32[128,32], index: 7, kind: input, shape index: {}]   ;;  %s1131_s4 = inlined_call_operand.vmem [shape: f32[1,128], index: 4, kind: input, shape index: {}]   ;;  %s1132_s6 = inlined_call_operand.vmem [shape: f32[1,128], index: 6, kind: input, shape index: {}]   ;;  %s1133_s8 = inlined_call_operand.vmem [shape: f32[1,32], index: 8, kind: input, shape index: {}]   ;;  %s1134_s9 = inlined_call_operand.vmem [shape: f32[48,32], index: 9, kind: input, shape index: {}, may-alias: {0,9}]   ;;  %s1135_s10 = inlined_call_operand.vmem [shape: f32[48,32], index: 10, kind: output, shape index: {}]  }
   0x1   :  { %v39_v0 = vld [vmem:[%s1125_s0] sm:$0xff]  ;;  %v41_v1 = vld [vmem:[%s1125_s0 + $0x10] sm:$0xff]  ;;  %v40_v2 = vld [vmem:[%s1125_s0 + $0x8] sm:$0xff] }
   0x2   :  { %v46_v3 = vsel %vm45_vm0, %v39_v0, 0.0  ;;  %v52_v4 = vsel %vm45_vm0, %v41_v1, 0.0  ;;  %v42_v5 = vld [vmem:[%s1125_s0 + $0x18] sm:$0xff]  ;;  %v49_v6 = vsel %vm45_vm0, %v40_v2, 0.0  ;;  %v43_v8 = vld [vmem:[%s1125_s0 + $0x20] sm:$0xff]  ;;  %v44_v9 = vld [vmem:[%s1125_s0 + $0x28] sm:$0xff] }
   0x3   :  { %47 = vadd.xlane.f32.xlu0 %v46_v3  ;;  %53 = vadd.xlane.f32.xlu1 %v52_v4  ;;  %v55_v7 = vsel %vm45_vm0, %v42_v5, 0.0  ;;  %v58_v10 = vsel %vm45_vm0, %v43_v8, 0.0  ;;  %v61_v11 = vsel %vm45_vm0, %v44_v9, 0.0  ;;  %v169_v42 = vld [vmem:[%s1126_s3] sm:$0xff]  ;;  %v170_v43 = vld [vmem:[%s1126_s3 + $0x8] sm:$0xff]  ;;  %v171_v45 = vld [vmem:[%s1126_s3 + $0x10] sm:$0xff] }
   0x4   :  { %v761_v44 = vpack.c.bf16 %v170_v43, %v169_v42  ;;  %v172_v46 = vld [vmem:[%s1126_s3 + $0x18] sm:$0xff]  ;;  %v294_v48 = vld [vmem:[%s1127_s5] sm:$0xff]  ;;  %v295_v49 = vld [vmem:[%s1127_s5 + $0x8] sm:$0xff] }
   0x5   :  { %v765_v47 = vpack.c.bf16 %v172_v46, %v171_v45  ;;  %v974_v50 = vpack.c.bf16 %v295_v49, %v294_v48  ;;  %v456_v43 = vld [vmem:[%s1130_s7 + $0x10] sm:$0xff]  ;;  %v458_v46 = vld [vmem:[%s1130_s7 + $0x20] sm:$0xff] }
   0x6   :  { %762 = vmatprep.subr.bf16.mxu1 %v761_v44  ;;  %v460_v49 = vld [vmem:[%s1130_s7 + $0x30] sm:$0xff] }
   0x7   :  { %50 = vadd.xlane.f32.xlu0 %v49_v6  ;;  %56 = vadd.xlane.f32.xlu1 %v55_v7 }
   0x8   :  { %764 = vmatpush3.bf16.msra.mxu1 %v761_v44  ;;  %v457_v44 = vld [vmem:[%s1130_s7 + $0x18] sm:$0xff] }
   0x9   :  { %766 = vmatprep.subr.bf16.mxu1 %v765_v47  ;;  %v781_v45 = vpack.c.bf16 %v457_v44, %v456_v43 }
   0xb   :  { %59 = vadd.xlane.f32.xlu0 %v58_v10  ;;  %62 = vadd.xlane.f32.xlu1 %v61_v11 }
   0xc   :  { %768 = vmatpush3.bf16.msra.mxu1 %v765_v47  ;;  %v459_v47 = vld [vmem:[%s1130_s7 + $0x28] sm:$0xff] }
   0xd   :  { %770 = vmatprep.subr.bf16.mxu1 %v974_v50  ;;  %v785_v48 = vpack.c.bf16 %v459_v47, %v458_v46 }
  0x90   :  { %v48_v12 = vpop.xlane.xlu0 %47  ;;  %v54_v13 = vpop.xlane.xlu1 %53 }
  0x91   :  { %v65_v14 = vmul.f32 0.03125, %v48_v12  ;;  %v67_v15 = vmul.f32 0.03125, %v54_v13 }
  0x93   :  { %v926_v16 = vsub.f32 %v39_v0, %v65_v14  ;;  %v928_v17 = vsub.f32 %v41_v1, %v67_v15 }
  0x94   :  { %v51_v18 = vpop.xlane.xlu0 %50  ;;  %v57_v19 = vpop.xlane.xlu1 %56 }
  0x95   :  { %v66_v20 = vmul.f32 0.03125, %v51_v18  ;;  %v68_v21 = vmul.f32 0.03125, %v57_v19  ;;  %v77_v22 = vmul.f32 %v926_v16, %v926_v16  ;;  %v79_v23 = vmul.f32 %v928_v17, %v928_v17 }
  0x97   :  { %v934_v24 = vsub.f32 %v40_v2, %v66_v20  ;;  %v936_v25 = vsub.f32 %v42_v5, %v68_v21  ;;  %v83_v26 = vsel %vm45_vm0, %v77_v22, 0.0  ;;  %v89_v29 = vsel %vm45_vm0, %v79_v23, 0.0  ;;  %v621_v5 = vld [vmem:[%s1128_s1] ss:$0 sm:$0xff] }
  0x98   :  { %84 = vadd.xlane.f32.xlu0 %v83_v26  ;;  %v60_v27 = vpop.xlane.xlu0 %59  ;;  %v63_v28 = vpop.xlane.xlu1 %62 }
  0x99   :  { %v69_v30 = vmul.f32 0.03125, %v60_v27  ;;  %v70_v31 = vmul.f32 0.03125, %v63_v28  ;;  %v78_v32 = vmul.f32 %v934_v24, %v934_v24  ;;  %v80_v33 = vmul.f32 %v936_v25, %v936_v25 }
  0x9b   :  { %v944_v34 = vsub.f32 %v43_v8, %v69_v30  ;;  %v946_v35 = vsub.f32 %v44_v9, %v70_v31  ;;  %v86_v36 = vsel %vm45_vm0, %v78_v32, 0.0  ;;  %v92_v37 = vsel %vm45_vm0, %v80_v33, 0.0  ;;  %v622_v8 = vld [vmem:[%s1129_s2] ss:$0 sm:$0xff]  ;;  %v296_v31 = vld [vmem:[%s1127_s5 + $0x10] sm:$0xff] }
  0x9c   :  { %90 = vadd.xlane.f32.xlu0 %v89_v29  ;;  %87 = vadd.xlane.f32.xlu1 %v86_v36 }
  0x9d   :  { %v81_v38 = vmul.f32 %v944_v34, %v944_v34  ;;  %v82_v39 = vmul.f32 %v946_v35, %v946_v35 }
  0x9f   :  { %v95_v40 = vsel %vm45_vm0, %v81_v38, 0.0  ;;  %v98_v41 = vsel %vm45_vm0, %v82_v39, 0.0 }
  0xa0   :  { %93 = vadd.xlane.f32.xlu1 %v92_v37  ;;  %96 = vadd.xlane.f32.xlu0 %v95_v40  ;;  %v454_v40 = vld [vmem:[%s1130_s7] sm:$0xff] }
  0xa4   :  { %99 = vadd.xlane.f32.xlu1 %v98_v41  ;;  %v455_v41 = vld [vmem:[%s1130_s7 + $0x8] sm:$0xff] }
  0xa5   :  { %v777_v42 = vpack.c.bf16 %v455_v41, %v454_v40 }
  0xa7   :  { %778 = vmatprep.subr.bf16.mxu0 %v777_v42 }
  0xa8   :  { %780 = vmatpush3.bf16.msra.mxu0 %v777_v42 }
  0xa9   :  { %782 = vmatprep.subr.bf16.mxu0 %v781_v45 }
  0xac   :  { %784 = vmatpush3.bf16.msra.mxu0 %v781_v45 }
  0xad   :  { %786 = vmatprep.subr.bf16.mxu0 %v785_v48 }
  0xb0   :  { %788 = vmatpush3.bf16.msra.mxu0 %v785_v48 }
 0x125   :  { %v85_v51 = vpop.xlane.xlu0 %84 }
 0x126   :  { %v101_v52 = vmul.f32 0.03125, %v85_v51 }
 0x128   :  { %v107_v53 = vadd.f32 1e-05, %v101_v52  ;;  %v462_v52 = vld [vmem:[%s1130_s7 + $0x40] sm:$0xff] }
 0x129   :  { %v88_v54 = vpop.xlane.xlu1 %87  ;;  %v91_v55 = vpop.xlane.xlu0 %90 }
 0x12a   :  { %810 = vrsqrt.f32 %v107_v53  ;;  %v102_v56 = vmul.f32 0.03125, %v88_v54  ;;  %v103_v57 = vmul.f32 0.03125, %v91_v55  ;;  %v463_v53 = vld [vmem:[%s1130_s7 + $0x48] sm:$0xff]  ;;  %v464_v55 = vld [vmem:[%s1130_s7 + $0x50] sm:$0xff] }
 0x12b   :  { %v793_v54 = vpack.c.bf16 %v463_v53, %v462_v52 }
 0x12c   :  { %v108_v58 = vadd.f32 1e-05, %v102_v56  ;;  %v109_v59 = vadd.f32 1e-05, %v103_v57  ;;  %v465_v56 = vld [vmem:[%s1130_s7 + $0x58] sm:$0xff] }
 0x12d   :  { %v94_v60 = vpop.xlane.xlu1 %93  ;;  %v97_v61 = vpop.xlane.xlu0 %96  ;;  %v797_v57 = vpack.c.bf16 %v465_v56, %v464_v55 }
 0x12e   :  { %812 = vrsqrt.f32 %v108_v58  ;;  %v104_v62 = vmul.f32 0.03125, %v94_v60  ;;  %v105_v63 = vmul.f32 0.03125, %v97_v61  ;;  %v466_v58 = vld [vmem:[%s1130_s7 + $0x60] sm:$0xff]  ;;  %v468_v61 = vld [vmem:[%s1130_s7 + $0x70] sm:$0xff] }
 0x12f   :  { %814 = vrsqrt.f32 %v109_v59  ;;  %v467_v59 = vld [vmem:[%s1130_s7 + $0x68] sm:$0xff] }
 0x130   :  { %v110_v0 = vadd.f32 1e-05, %v104_v62  ;;  %v111_v1 = vadd.f32 1e-05, %v105_v63  ;;  %v801_v60 = vpack.c.bf16 %v467_v59, %v466_v58  ;;  %v469_v62 = vld [vmem:[%s1130_s7 + $0x78] sm:$0xff] }
 0x131   :  { %v100_v2 = vpop.xlane.xlu1 %99  ;;  %v805_v63 = vpack.c.bf16 %v469_v62, %v468_v61 }
 0x132   :  { %816 = vrsqrt.f32 %v110_v0  ;;  %v106_v3 = vmul.f32 0.03125, %v100_v2  ;;  %v846_v0 = vmov 0.0  }
 0x133   :  { %818 = vrsqrt.f32 %v111_v1  ;;  %158 = vst.msk [vmem:[#allocation3 + $0x8] sm:$0xff] %vm45_vm0, %v846_v0  ;;  %157 = vst.msk [vmem:[#allocation3] sm:$0xff] %vm45_vm0, %v846_v0  ;;  %v623_v1 = vld [vmem:[%s1131_s4] ss:$0 sm:$0xff] }
 0x134   :  { %v811_v4 = vpop.eup %810  ;;  %v112_v6 = vadd.f32 1e-05, %v106_v3  ;;  %159 = vst.msk [vmem:[#allocation3 + $0x10] sm:$0xff] %vm45_vm0, %v846_v0  ;;  %160 = vst.msk [vmem:[#allocation3 + $0x18] sm:$0xff] %vm45_vm0, %v846_v0 }
 0x135   :  { %v119_v7 = vmul.f32 %v811_v4, %v926_v16  ;;  %161 = vst.msk [vmem:[#allocation3 + $0x20] sm:$0xff] %vm45_vm0, %v846_v0  ;;  %162 = vst.msk [vmem:[#allocation3 + $0x28] sm:$0xff] %vm45_vm0, %v846_v0 }
 0x136   :  { %820 = vrsqrt.f32 %v112_v6 }
 0x137   :  { %v132_v9 = vmul.f32 %v621_v5, %v119_v7 }
 0x138   :  { %v813_v10 = vpop.eup %812 }
 0x139   :  { %v815_v11 = vpop.eup %814  ;;  %v145_v12 = vadd.f32 %v622_v8, %v132_v9  ;;  %v120_v13 = vmul.f32 %v813_v10, %v934_v24 }
 0x13a   :  { %v121_v14 = vmul.f32 %v815_v11, %v928_v17  ;;  %v448_v0 = vld [vmem:[#allocation3] sm:$0xff] }
 0x13b   :  { %151 = vst.msk [vmem:[#allocation2] sm:$0xff] %vm45_vm0, %v145_v12  ;;  %v133_v15 = vmul.f32 %v621_v5, %v120_v13 }
 0x13c   :  { %v817_v18 = vpop.eup %816  ;;  %v134_v19 = vmul.f32 %v621_v5, %v121_v14 }
 0x13d   :  { %v819_v20 = vpop.eup %818  ;;  %v146_v16 = vadd.f32 %v622_v8, %v133_v15  ;;  %v122_v21 = vmul.f32 %v817_v18, %v936_v25  ;;  %v297_v25 = vld [vmem:[%s1127_s5 + $0x18] sm:$0xff] }
 0x13e   :  { %v147_v22 = vadd.f32 %v622_v8, %v134_v19  ;;  %v123_v23 = vmul.f32 %v819_v20, %v944_v34  ;;  %v773_v34 = vpack.c.bf16 %v297_v25, %v296_v31 }
 0x13f   :  { %152 = vst.msk [vmem:[#allocation2 + $0x8] sm:$0xff] %vm45_vm0, %v146_v16  ;;  %v135_v26 = vmul.f32 %v621_v5, %v122_v21 }
 0x140   :  { %v821_v27 = vpop.eup %820  ;;  %153 = vst.msk [vmem:[#allocation2 + $0x10] sm:$0xff] %vm45_vm0, %v147_v22  ;;  %v136_v24 = vmul.f32 %v621_v5, %v123_v23 }
 0x141   :  { %v148_v17 = vadd.f32 %v622_v8, %v135_v26  ;;  %v124_v28 = vmul.f32 %v821_v27, %v946_v35 }
 0x142   :  { %v149_v29 = vadd.f32 %v622_v8, %v136_v24  ;;  %v163_v30 = vld [vmem:[#allocation2] sm:$0xff] }
 0x143   :  { %154 = vst.msk [vmem:[#allocation2 + $0x18] sm:$0xff] %vm45_vm0, %v148_v17  ;;  %v137_v32 = vmul.f32 %v621_v5, %v124_v28  ;;  %694 = vmatprep.mubr.msk.f32.mxu1 %vm45_vm0, %v163_v30 }
 0x144   :  { %155 = vst.msk [vmem:[#allocation2 + $0x20] sm:$0xff] %vm45_vm0, %v149_v29 }
 0x145   :  { %v150_v33 = vadd.f32 %v622_v8, %v137_v32 }
 0x146   :  { %v164_v35 = vld [vmem:[#allocation2 + $0x8] sm:$0xff] }
 0x147   :  { %156 = vst.msk [vmem:[#allocation2 + $0x28] sm:$0xff] %vm45_vm0, %v150_v33  ;;  %695 = vmatmul.mubr.msk.f32.vlgmr.msra.gmra.mrb[0].mxu1 %vm45_vm0, %v164_v35  ;;  %v165_v36 = vld [vmem:[#allocation2 + $0x10] sm:$0xff] }
 0x148   :  { %697 = vmatprep.mubr.msk.f32.mxu1 %vm45_vm0, %v165_v36  ;;  %772 = vmatpush3.bf16.msra.mxu1 %v974_v50  ;;  %v461_v50 = vld [vmem:[%s1130_s7 + $0x38] sm:$0xff] }
 0x149   :  { %774 = vmatprep.subr.bf16.mxu1 %v773_v34  ;;  %v789_v51 = vpack.c.bf16 %v461_v50, %v460_v49 }
 0x14a   :  { %v166_v37 = vld [vmem:[#allocation2 + $0x18] sm:$0xff] }
 0x14b   :  { %698 = vmatmul.mubr.msk.f32.gmra.mrb[2].mxu1 %vm45_vm0, %v166_v37  ;;  %v167_v38 = vld [vmem:[#allocation2 + $0x20] sm:$0xff]  ;;  %790 = vmatprep.subr.bf16.mxu0 %v789_v51 }
 0x14c   :  { %700 = vmatprep.mubr.msk.f32.mxu1 %vm45_vm0, %v167_v38  ;;  %776 = vmatpush3.bf16.msra.mxu1 %v773_v34 }
 0x14d   :  { %792 = vmatpush3.bf16.msra.mxu0 %v789_v51 }
 0x14e   :  { %v168_v39 = vld [vmem:[#allocation2 + $0x28] sm:$0xff]  ;;  %794 = vmatprep.subr.bf16.mxu0 %v793_v54 }
 0x14f   :  { %701 = vmatmul.mubr.msk.f32.gmra.mrb[4].mxu1 %vm45_vm0, %v168_v39 }
 0x150   :  { %711 = vmatprep.mubr.msk.f32.mxu1 %vm45_vm0, %v163_v30 }
 0x151   :  { %796 = vmatpush3.bf16.msra.mxu0 %v793_v54 }
 0x152   :  { %798 = vmatprep.subr.bf16.mxu0 %v797_v57 }
 0x153   :  { %712 = vmatmul.mubr.msk.f32.vlgmr.msra.gmra.mrb[6].mxu1 %vm45_vm0, %v164_v35 }
 0x154   :  { %714 = vmatprep.mubr.msk.f32.mxu1 %vm45_vm0, %v165_v36 }
 0x155   :  { %800 = vmatpush3.bf16.msra.mxu0 %v797_v57 }
 0x156   :  { %802 = vmatprep.subr.bf16.mxu0 %v801_v60 }
 0x157   :  { %715 = vmatmul.mubr.msk.f32.gmra.mrb[8].mxu1 %vm45_vm0, %v166_v37 }
 0x158   :  { %717 = vmatprep.mubr.msk.f32.mxu1 %vm45_vm0, %v167_v38  ;;  %v630_v38 = vld [vmem:[%s1132_s6] ss:$0 sm:$0xff] }
 0x159   :  { %804 = vmatpush3.bf16.msra.mxu0 %v801_v60 }
 0x15a   :  { %806 = vmatprep.subr.bf16.mxu0 %v805_v63 }
 0x15b   :  { %718 = vmatmul.mubr.msk.f32.gmra.mrb[10].mxu1 %vm45_vm0, %v168_v39 }
 0x15d   :  { %808 = vmatpush3.bf16.msra.mxu0 %v805_v63  ;;  %v449_v63 = vld [vmem:[#allocation3 + $0x8] sm:$0xff] }
 0x21a   :  { %v696_v2 = vpop.f32.mrb[0].mxu1 }
 0x21b   :  { %v271_v3 = vadd.f32 %v696_v2, %v623_v1  ;;  %v265_v4 = vpop.f32.mrb[1].mxu1 }
 0x21c   :  { %v266_v5 = vadd.f32 %v623_v1, %v265_v4 }
 0x21d   :  { %v638_v6 = vmul.f32 -1.442695, %v271_v3 }
 0x21e   :  { %v637_v7 = vmul.f32 -1.442695, %v266_v5  ;;  %v699_v8 = vpop.f32.mrb[2].mxu1 }
 0x21f   :  { %822 = vpow2.f32 %v638_v6  ;;  %v281_v9 = vadd.f32 %v699_v8, %v623_v1  ;;  %v275_v10 = vpop.f32.mrb[3].mxu1  ;;  %v450_v6 = vld [vmem:[#allocation3 + $0x10] sm:$0xff] }
 0x220   :  { %824 = vpow2.f32 %v637_v7  ;;  %v276_v11 = vadd.f32 %v623_v1, %v275_v10 }
 0x221   :  { %v640_v12 = vmul.f32 -1.442695, %v281_v9 }
 0x222   :  { %v639_v13 = vmul.f32 -1.442695, %v276_v11  ;;  %v702_v14 = vpop.f32.mrb[4].mxu1 }
 0x223   :  { %826 = vpow2.f32 %v640_v12  ;;  %v291_v15 = vadd.f32 %v702_v14, %v623_v1  ;;  %v285_v18 = vpop.f32.mrb[5].mxu1  ;;  %v452_v12 = vld [vmem:[#allocation3 + $0x20] sm:$0xff] }
 0x224   :  { %828 = vpow2.f32 %v639_v13  ;;  %v286_v19 = vadd.f32 %v623_v1, %v285_v18  ;;  %v643_v13 = vld [vmem:[%s1133_s8] ss:$0 sm:$0xff] }
 0x225   :  { %v642_v20 = vmul.f32 -1.442695, %v291_v15 }
 0x226   :  { %v641_v16 = vmul.f32 -1.442695, %v286_v19  ;;  %v713_v21 = vpop.f32.mrb[6].mxu1 }
 0x227   :  { %830 = vpow2.f32 %v642_v20  ;;  %v371_v22 = vpop.f32.mrb[7].mxu1  ;;  %v377_v42 = vadd.f32 %v713_v21, %v630_v38  ;;  %v600_v20 = vld [vmem:[%s1134_s9 + $0x8] sm:$0xff] }
 0x228   :  { %832 = vpow2.f32 %v641_v16  ;;  %v372_v43 = vadd.f32 %v630_v38, %v371_v22 }
 0x229   :  { %v823_v23 = vpop.eup %822 }
 0x22a   :  { %v825_v26 = vpop.eup %824  ;;  %v419_v27 = vadd.f32 1.0, %v823_v23  ;;  %v716_v24 = vpop.f32.mrb[8].mxu1  ;;  %v599_v23 = vld [vmem:[%s1134_s9] sm:$0xff] }
 0x22b   :  { %v418_v17 = vadd.f32 1.0, %v825_v26  ;;  %v381_v28 = vpop.f32.mrb[9].mxu1  ;;  %v387_v50 = vadd.f32 %v716_v24, %v630_v38 }
 0x22c   :  { %834 = vrcp.f32 %v419_v27  ;;  %v382_v52 = vadd.f32 %v630_v38, %v381_v28  ;;  %v602_v28 = vld [vmem:[%s1134_s9 + $0x18] sm:$0xff] }
 0x22d   :  { %v827_v29 = vpop.eup %826  ;;  %836 = vrcp.f32 %v418_v17 }
 0x22e   :  { %v829_v30 = vpop.eup %828  ;;  %v421_v31 = vadd.f32 1.0, %v827_v29  ;;  %v719_v25 = vpop.f32.mrb[10].mxu1 }
 0x22f   :  { %v420_v32 = vadd.f32 1.0, %v829_v30  ;;  %v391_v33 = vpop.f32.mrb[11].mxu1  ;;  %v397_v58 = vadd.f32 %v719_v25, %v630_v38 }
 0x230   :  { %838 = vrcp.f32 %v421_v31  ;;  %v392_v60 = vadd.f32 %v630_v38, %v391_v33  ;;  %v601_v31 = vld [vmem:[%s1134_s9 + $0x10] sm:$0xff]  ;;  %v603_v38 = vld [vmem:[%s1134_s9 + $0x20] sm:$0xff] }
 0x231   :  { %v831_v34 = vpop.eup %830  ;;  %840 = vrcp.f32 %v420_v32 }
 0x232   :  { %v833_v35 = vpop.eup %832  ;;  %v423_v36 = vadd.f32 1.0, %v831_v34 }
 0x233   :  { %v422_v37 = vadd.f32 1.0, %v833_v35  ;;  %v604_v35 = vld [vmem:[%s1134_s9 + $0x28] sm:$0xff] }
 0x234   :  { %842 = vrcp.f32 %v423_v36 }
 0x235   :  { %844 = vrcp.f32 %v422_v37 }
 0x236   :  { %v835_v39 = vpop.eup %834 }
 0x237   :  { %v837_v40 = vpop.eup %836  ;;  %v437_v41 = vmul.f32 %v835_v39, %v271_v3 }
 0x238   :  { %v436_v44 = vmul.f32 %v837_v40, %v266_v5  ;;  %v451_v5 = vld [vmem:[#allocation3 + $0x18] sm:$0xff] }
 0x239   :  { %v443_v45 = vmul.f32 %v437_v41, %v377_v42 }
 0x23a   :  { %v839_v46 = vpop.eup %838  ;;  %v442_v47 = vmul.f32 %v436_v44, %v372_v43 }
 0x23b   :  { %v841_v48 = vpop.eup %840  ;;  %v439_v49 = vmul.f32 %v839_v46, %v281_v9 }
 0x23c   :  { %v438_v51 = vmul.f32 %v841_v48, %v276_v11  ;;  %752 = vmatprep.mubr.f32.mxu0 %v442_v47  ;;  %v453_v11 = vld [vmem:[#allocation3 + $0x28] sm:$0xff] }
 0x23d   :  { %v445_v53 = vmul.f32 %v439_v49, %v387_v50  ;;  %753 = vmatmul.mubr.f32.vlgmr.msra.gmra.mrb[0].mxu0 %v443_v45 }
 0x23e   :  { %v843_v54 = vpop.eup %842  ;;  %v444_v55 = vmul.f32 %v438_v51, %v382_v52 }
 0x23f   :  { %v845_v56 = vpop.eup %844  ;;  %v441_v57 = vmul.f32 %v843_v54, %v291_v15 }
 0x240   :  { %v440_v59 = vmul.f32 %v845_v56, %v286_v19  ;;  %755 = vmatprep.mubr.f32.mxu0 %v444_v55 }
 0x241   :  { %v447_v61 = vmul.f32 %v441_v57, %v397_v58  ;;  %756 = vmatmul.mubr.f32.gmra.mrb[2].mxu0 %v445_v53 }
 0x242   :  { %v446_v62 = vmul.f32 %v440_v59, %v392_v60 }
 0x244   :  { %758 = vmatprep.mubr.f32.mxu0 %v446_v62 }
 0x245   :  { %759 = vmatmul.mubr.f32.gmra.mrb[4].mxu0 %v447_v61 }
 0x310   :  { %v754_v1 = vpop.f32.mrb[0].mxu0 }
 0x311   :  { %v566_v2 = vadd.f32 %v754_v1, %v449_v63  ;;  %v536_v3 = vpop.f32.mrb[1].mxu0 }
 0x312   :  { %v565_v4 = vadd.f32 %v536_v3, %v448_v0 }
 0x313   :  { %572 = vst.msk [vmem:[#allocation3 + $0x8] sm:$0xff] %vm45_vm0, %v566_v2 }
 0x314   :  { %571 = vst.msk [vmem:[#allocation3] sm:$0xff] %vm45_vm0, %v565_v4  ;;  %v757_v7 = vpop.f32.mrb[2].mxu0 }
 0x315   :  { %v568_v8 = vadd.f32 %v757_v7, %v451_v5  ;;  %v546_v9 = vpop.f32.mrb[3].mxu0 }
 0x316   :  { %v567_v10 = vadd.f32 %v546_v9, %v450_v6 }
 0x317   :  { %574 = vst.msk [vmem:[#allocation3 + $0x18] sm:$0xff] %vm45_vm0, %v568_v8 }
 0x318   :  { %573 = vst.msk [vmem:[#allocation3 + $0x10] sm:$0xff] %vm45_vm0, %v567_v10  ;;  %v760_v14 = vpop.f32.mrb[4].mxu0 }
 0x319   :  { %v570_v15 = vadd.f32 %v760_v14, %v453_v11  ;;  %v556_v18 = vpop.f32.mrb[5].mxu0 }
 0x31a   :  { %v581_v19 = vld [vmem:[#allocation3 + $0x8] sm:$0xff]  ;;  %v569_v16 = vadd.f32 %v556_v18, %v452_v12 }
 0x31b   :  { %v594_v21 = vadd.f32 %v643_v13, %v581_v19  ;;  %v580_v22 = vld [vmem:[#allocation3] sm:$0xff]  ;;  %576 = vst.msk [vmem:[#allocation3 + $0x28] sm:$0xff] %vm45_vm0, %v570_v15 }
 0x31c   :  { %v593_v26 = vadd.f32 %v643_v13, %v580_v22  ;;  %575 = vst.msk [vmem:[#allocation3 + $0x20] sm:$0xff] %vm45_vm0, %v569_v16 }
 0x31d   :  { %v606_v27 = vadd.f32 %v600_v20, %v594_v21 }
 0x31e   :  { %v605_v24 = vadd.f32 %v599_v23, %v593_v26  ;;  %v583_v17 = vld [vmem:[#allocation3 + $0x18] sm:$0xff] }
 0x31f   :  { %612 = vst.msk [vmem:[%s1135_s10 + $0x8] sm:$0xff] %vm45_vm0, %v606_v27  ;;  %v596_v29 = vadd.f32 %v643_v13, %v583_v17  ;;  %v582_v30 = vld [vmem:[#allocation3 + $0x10] sm:$0xff] }
 0x320   :  { %611 = vst.msk [vmem:[%s1135_s10] sm:$0xff] %vm45_vm0, %v605_v24  ;;  %v595_v25 = vadd.f32 %v643_v13, %v582_v30 }
 0x321   :  { %v608_v32 = vadd.f32 %v602_v28, %v596_v29 }
 0x322   :  { %v607_v33 = vadd.f32 %v601_v31, %v595_v25  ;;  %v585_v34 = vld [vmem:[#allocation3 + $0x28] sm:$0xff] }
 0x323   :  { %614 = vst.msk [vmem:[%s1135_s10 + $0x18] sm:$0xff] %vm45_vm0, %v608_v32  ;;  %v598_v36 = vadd.f32 %v643_v13, %v585_v34  ;;  %v584_v37 = vld [vmem:[#allocation3 + $0x20] sm:$0xff] }
 0x324   :  { %613 = vst.msk [vmem:[%s1135_s10 + $0x10] sm:$0xff] %vm45_vm0, %v607_v33  ;;  %v597_v39 = vadd.f32 %v643_v13, %v584_v37 }
 0x325   :  { %v610_v40 = vadd.f32 %v604_v35, %v598_v36 }
 0x326   :  { %v609_v41 = vadd.f32 %v603_v38, %v597_v39 }
 0x327   :  { %616 = vst.msk [vmem:[%s1135_s10 + $0x28] sm:$0xff] %vm45_vm0, %v610_v40 }
 0x328   :  { %615 = vst.msk [vmem:[%s1135_s10 + $0x20] sm:$0xff] %vm45_vm0, %v609_v41 }

// kernel: encoder_forward.19
= control target key start
LH: loop header
LB: loop body
LE: loop exit
PB: predicated region body
PF: predicated region fallthrough
CT: control target
= control target key end

     0   :  { %vm46_vm0 = vcmask 261120   ;;  %s1162_s0 = inlined_call_operand.vmem [shape: f32[48,32], index: 0, kind: input, shape index: {}, may-alias: {0,9}]   ;;  %s1163_s1 = inlined_call_operand.vmem [shape: f32[1,32], index: 1, kind: input, shape index: {}]   ;;  %s1164_s2 = inlined_call_operand.vmem [shape: f32[1,32], index: 2, kind: input, shape index: {}]   ;;  %s1165_s3 = inlined_call_operand.vmem [shape: f32[32,128], index: 3, kind: input, shape index: {}]   ;;  %s1166_s4 = inlined_call_operand.vmem [shape: f32[1,128], index: 4, kind: input, shape index: {}]   ;;  %s1167_s5 = inlined_call_operand.vmem [shape: f32[32,128], index: 5, kind: input, shape index: {}]   ;;  %s1168_s6 = inlined_call_operand.vmem [shape: f32[1,128], index: 6, kind: input, shape index: {}]   ;;  %s1169_s7 = inlined_call_operand.vmem [shape: f32[128,32], index: 7, kind: input, shape index: {}]   ;;  %s1170_s8 = inlined_call_operand.vmem [shape: f32[1,32], index: 8, kind: input, shape index: {}]   ;;  %s1171_s9 = inlined_call_operand.vmem [shape: f32[48,32], index: 9, kind: input, shape index: {}, may-alias: {0,9}]   ;;  %s1172_s10 = inlined_call_operand.hbm [shape: f32[48,32], index: 10, kind: output, shape index: {}]  }
   0x1   :  { %v40_v0 = vld [vmem:[%s1162_s0] sm:$0xff]  ;;  %v42_v1 = vld [vmem:[%s1162_s0 + $0x10] sm:$0xff]  ;;  %v41_v2 = vld [vmem:[%s1162_s0 + $0x8] sm:$0xff] }
   0x2   :  { %v47_v3 = vsel %vm46_vm0, %v40_v0, 0.0  ;;  %v53_v4 = vsel %vm46_vm0, %v42_v1, 0.0  ;;  %v43_v5 = vld [vmem:[%s1162_s0 + $0x18] sm:$0xff] }
   0x3   :  { %48 = vadd.xlane.f32.xlu0 %v47_v3  ;;  %54 = vadd.xlane.f32.xlu1 %v53_v4 }
   0x4   :  { %15 = vsyncpa [#allocation5], 0  ;;  %v50_v6 = vsel %vm46_vm0, %v41_v2, 0.0  ;;  %v56_v7 = vsel %vm46_vm0, %v43_v5, 0.0  ;;  %v44_v8 = vld [vmem:[%s1162_s0 + $0x20] sm:$0xff]  ;;  %v45_v9 = vld [vmem:[%s1162_s0 + $0x28] sm:$0xff] }
   0x5   :  { %v59_v10 = vsel %vm46_vm0, %v44_v8, 0.0  ;;  %v62_v11 = vsel %vm46_vm0, %v45_v9, 0.0  ;;  %v170_v42 = vld [vmem:[%s1165_s3] sm:$0xff]  ;;  %v171_v43 = vld [vmem:[%s1165_s3 + $0x8] sm:$0xff]  ;;  %v172_v45 = vld [vmem:[%s1165_s3 + $0x10] sm:$0xff] }
   0x6   :  { %v774_v44 = vpack.c.bf16 %v171_v43, %v170_v42  ;;  %v173_v46 = vld [vmem:[%s1165_s3 + $0x18] sm:$0xff]  ;;  %v295_v48 = vld [vmem:[%s1167_s5] sm:$0xff]  ;;  %v296_v49 = vld [vmem:[%s1167_s5 + $0x8] sm:$0xff] }
   0x7   :  { %51 = vadd.xlane.f32.xlu0 %v50_v6  ;;  %57 = vadd.xlane.f32.xlu1 %v56_v7  ;;  %v778_v47 = vpack.c.bf16 %v173_v46, %v172_v45  ;;  %v1017_v50 = vpack.c.bf16 %v296_v49, %v295_v48  ;;  %v457_v43 = vld [vmem:[%s1169_s7 + $0x10] sm:$0xff]  ;;  %v459_v46 = vld [vmem:[%s1169_s7 + $0x20] sm:$0xff] }
   0x8   :  { %775 = vmatprep.subr.bf16.mxu1 %v774_v44  ;;  %v461_v49 = vld [vmem:[%s1169_s7 + $0x30] sm:$0xff] }
   0x9   :  { %777 = vmatpush3.bf16.msra.mxu1 %v774_v44  ;;  %v458_v44 = vld [vmem:[%s1169_s7 + $0x18] sm:$0xff] }
   0xa   :  { %779 = vmatprep.subr.bf16.mxu1 %v778_v47  ;;  %v794_v45 = vpack.c.bf16 %v458_v44, %v457_v43 }
   0xb   :  { %60 = vadd.xlane.f32.xlu0 %v59_v10  ;;  %63 = vadd.xlane.f32.xlu1 %v62_v11 }
   0xd   :  { %781 = vmatpush3.bf16.msra.mxu1 %v778_v47  ;;  %v460_v47 = vld [vmem:[%s1169_s7 + $0x28] sm:$0xff] }
   0xe   :  { %783 = vmatprep.subr.bf16.mxu1 %v1017_v50  ;;  %v798_v48 = vpack.c.bf16 %v460_v47, %v459_v46 }
  0x90   :  { %v49_v12 = vpop.xlane.xlu0 %48  ;;  %v55_v13 = vpop.xlane.xlu1 %54 }
  0x91   :  { %v66_v14 = vmul.f32 0.03125, %v49_v12  ;;  %v68_v15 = vmul.f32 0.03125, %v55_v13 }
  0x93   :  { %v969_v16 = vsub.f32 %v40_v0, %v66_v14  ;;  %v971_v17 = vsub.f32 %v42_v1, %v68_v15 }
  0x94   :  { %v52_v18 = vpop.xlane.xlu0 %51  ;;  %v58_v19 = vpop.xlane.xlu1 %57 }
  0x95   :  { %v67_v20 = vmul.f32 0.03125, %v52_v18  ;;  %v69_v21 = vmul.f32 0.03125, %v58_v19  ;;  %v78_v22 = vmul.f32 %v969_v16, %v969_v16  ;;  %v80_v23 = vmul.f32 %v971_v17, %v971_v17 }
  0x97   :  { %v977_v24 = vsub.f32 %v41_v2, %v67_v20  ;;  %v979_v25 = vsub.f32 %v43_v5, %v69_v21  ;;  %v84_v26 = vsel %vm46_vm0, %v78_v22, 0.0  ;;  %v90_v29 = vsel %vm46_vm0, %v80_v23, 0.0  ;;  %v634_v5 = vld [vmem:[%s1163_s1] ss:$0 sm:$0xff]  ;;  %s887_s1 = smov [#allocation4]  }
  0x98   :  { %85 = vadd.xlane.f32.xlu0 %v84_v26  ;;  %v61_v27 = vpop.xlane.xlu0 %60  ;;  %v64_v28 = vpop.xlane.xlu1 %63 }
  0x99   :  { %v70_v30 = vmul.f32 0.03125, %v61_v27  ;;  %v71_v31 = vmul.f32 0.03125, %v64_v28  ;;  %v79_v32 = vmul.f32 %v977_v24, %v977_v24  ;;  %v81_v33 = vmul.f32 %v979_v25, %v979_v25 }
  0x9b   :  { %v987_v34 = vsub.f32 %v44_v8, %v70_v30  ;;  %v989_v35 = vsub.f32 %v45_v9, %v71_v31  ;;  %v87_v36 = vsel %vm46_vm0, %v79_v32, 0.0  ;;  %v93_v37 = vsel %vm46_vm0, %v81_v33, 0.0  ;;  %v635_v8 = vld [vmem:[%s1164_s2] ss:$0 sm:$0xff]  ;;  %v297_v31 = vld [vmem:[%s1167_s5 + $0x10] sm:$0xff]  ;;  %s623_s2 = sshll.u32 %s887_s1, 4  ;;  %s624_s2 = int_to_ptr.vmem [resolvable:$true] %s623_s2 }
  0x9c   :  { %91 = vadd.xlane.f32.xlu0 %v90_v29  ;;  %88 = vadd.xlane.f32.xlu1 %v87_v36  ;;  %s862_s19 = scalar_lea.vmem %s624_s2, 768  ;;  %p867_p1 = scmp.lt.s32.totalorder %s624_s2, %s624_s2 }
  0x9d   :  { %v82_v38 = vmul.f32 %v987_v34, %v987_v34  ;;  %v83_v39 = vmul.f32 %v989_v35, %v989_v35  ;;  %p863_p0 = scmp.ne.s32.totalorder %s624_s2, %s862_s19  ;;  %p868_p2 = scmp.lt.s32.totalorder %s862_s19, %s862_s19 }
  0x9f   :  { %v96_v40 = vsel %vm46_vm0, %v82_v38, 0.0  ;;  %v99_v41 = vsel %vm46_vm0, %v83_v39, 0.0  ;;  %p869_p3 = por %p868_p2, %p867_p1 }
  0xa0   :  { %94 = vadd.xlane.f32.xlu1 %v93_v37  ;;  %97 = vadd.xlane.f32.xlu0 %v96_v40  ;;  %v455_v40 = vld [vmem:[%s1169_s7] sm:$0xff] }
  0xa1   :  { %p870_p4 = pnand %p869_p3, %p863_p0 }
  0xa4   :  { %100 = vadd.xlane.f32.xlu1 %v99_v41  ;;  %v456_v41 = vld [vmem:[%s1169_s7 + $0x8] sm:$0xff] }
  0xa5   :  { %v790_v42 = vpack.c.bf16 %v456_v41, %v455_v40 }
  0xa7   :  { %791 = vmatprep.subr.bf16.mxu0 %v790_v42 }
  0xa8   :  { %793 = vmatpush3.bf16.msra.mxu0 %v790_v42 }
  0xa9   :  { %795 = vmatprep.subr.bf16.mxu0 %v794_v45 }
  0xac   :  { %797 = vmatpush3.bf16.msra.mxu0 %v794_v45 }
  0xad   :  { %799 = vmatprep.subr.bf16.mxu0 %v798_v48 }
  0xb0   :  { %801 = vmatpush3.bf16.msra.mxu0 %v798_v48 }
 0x125   :  { %v86_v51 = vpop.xlane.xlu0 %85 }
 0x126   :  { %v102_v52 = vmul.f32 0.03125, %v86_v51 }
 0x128   :  { %v108_v53 = vadd.f32 1e-05, %v102_v52  ;;  %v463_v52 = vld [vmem:[%s1169_s7 + $0x40] sm:$0xff] }
 0x129   :  { %v89_v54 = vpop.xlane.xlu1 %88  ;;  %v92_v55 = vpop.xlane.xlu0 %91 }
 0x12a   :  { %826 = vrsqrt.f32 %v108_v53  ;;  %v103_v56 = vmul.f32 0.03125, %v89_v54  ;;  %v104_v57 = vmul.f32 0.03125, %v92_v55  ;;  %v464_v53 = vld [vmem:[%s1169_s7 + $0x48] sm:$0xff]  ;;  %v465_v55 = vld [vmem:[%s1169_s7 + $0x50] sm:$0xff] }
 0x12b   :  { %v806_v54 = vpack.c.bf16 %v464_v53, %v463_v52 }
 0x12c   :  { %v109_v58 = vadd.f32 1e-05, %v103_v56  ;;  %v110_v59 = vadd.f32 1e-05, %v104_v57  ;;  %v466_v56 = vld [vmem:[%s1169_s7 + $0x58] sm:$0xff] }
 0x12d   :  { %v95_v60 = vpop.xlane.xlu1 %94  ;;  %v98_v61 = vpop.xlane.xlu0 %97  ;;  %v810_v57 = vpack.c.bf16 %v466_v56, %v465_v55 }
 0x12e   :  { %828 = vrsqrt.f32 %v109_v58  ;;  %v105_v62 = vmul.f32 0.03125, %v95_v60  ;;  %v106_v63 = vmul.f32 0.03125, %v98_v61  ;;  %v467_v58 = vld [vmem:[%s1169_s7 + $0x60] sm:$0xff]  ;;  %v469_v61 = vld [vmem:[%s1169_s7 + $0x70] sm:$0xff] }
 0x12f   :  { %830 = vrsqrt.f32 %v110_v59  ;;  %v468_v59 = vld [vmem:[%s1169_s7 + $0x68] sm:$0xff] }
 0x130   :  { %v111_v0 = vadd.f32 1e-05, %v105_v62  ;;  %v112_v1 = vadd.f32 1e-05, %v106_v63  ;;  %v814_v60 = vpack.c.bf16 %v468_v59, %v467_v58  ;;  %v470_v62 = vld [vmem:[%s1169_s7 + $0x78] sm:$0xff] }
 0x131   :  { %v101_v2 = vpop.xlane.xlu1 %100  ;;  %v818_v63 = vpack.c.bf16 %v470_v62, %v469_v61 }
 0x132   :  { %832 = vrsqrt.f32 %v111_v0  ;;  %v107_v3 = vmul.f32 0.03125, %v101_v2  ;;  %v886_v0 = vmov 0.0  }
 0x133   :  { %834 = vrsqrt.f32 %v112_v1  ;;  %159 = vst.msk [vmem:[#allocation3 + $0x8] sm:$0xff] %vm46_vm0, %v886_v0  ;;  %158 = vst.msk [vmem:[#allocation3] sm:$0xff] %vm46_vm0, %v886_v0  ;;  %v636_v1 = vld [vmem:[%s1166_s4] ss:$0 sm:$0xff] }
 0x134   :  { %v827_v4 = vpop.eup %826  ;;  %v113_v6 = vadd.f32 1e-05, %v107_v3  ;;  %160 = vst.msk [vmem:[#allocation3 + $0x10] sm:$0xff] %vm46_vm0, %v886_v0  ;;  %161 = vst.msk [vmem:[#allocation3 + $0x18] sm:$0xff] %vm46_vm0, %v886_v0 }
 0x135   :  { %v120_v7 = vmul.f32 %v827_v4, %v969_v16  ;;  %162 = vst.msk [vmem:[#allocation3 + $0x20] sm:$0xff] %vm46_vm0, %v886_v0  ;;  %163 = vst.msk [vmem:[#allocation3 + $0x28] sm:$0xff] %vm46_vm0, %v886_v0 }
 0x136   :  { %836 = vrsqrt.f32 %v113_v6 }
 0x137   :  { %v133_v9 = vmul.f32 %v634_v5, %v120_v7 }
 0x138   :  { %v829_v10 = vpop.eup %828 }
 0x139   :  { %v831_v11 = vpop.eup %830  ;;  %v146_v12 = vadd.f32 %v635_v8, %v133_v9  ;;  %v121_v13 = vmul.f32 %v829_v10, %v977_v24 }
 0x13a   :  { %v122_v14 = vmul.f32 %v831_v11, %v971_v17  ;;  %v449_v0 = vld [vmem:[#allocation3] sm:$0xff] }
 0x13b   :  { %152 = vst.msk [vmem:[#allocation2] sm:$0xff] %vm46_vm0, %v146_v12  ;;  %v134_v15 = vmul.f32 %v634_v5, %v121_v13 }
 0x13c   :  { %v833_v18 = vpop.eup %832  ;;  %v135_v19 = vmul.f32 %v634_v5, %v122_v14 }
 0x13d   :  { %v835_v20 = vpop.eup %834  ;;  %v147_v16 = vadd.f32 %v635_v8, %v134_v15  ;;  %v123_v21 = vmul.f32 %v833_v18, %v979_v25  ;;  %v298_v25 = vld [vmem:[%s1167_s5 + $0x18] sm:$0xff] }
 0x13e   :  { %v148_v22 = vadd.f32 %v635_v8, %v135_v19  ;;  %v124_v23 = vmul.f32 %v835_v20, %v987_v34  ;;  %v786_v34 = vpack.c.bf16 %v298_v25, %v297_v31 }
 0x13f   :  { %153 = vst.msk [vmem:[#allocation2 + $0x8] sm:$0xff] %vm46_vm0, %v147_v16  ;;  %v136_v26 = vmul.f32 %v634_v5, %v123_v21 }
 0x140   :  { %v837_v27 = vpop.eup %836  ;;  %154 = vst.msk [vmem:[#allocation2 + $0x10] sm:$0xff] %vm46_vm0, %v148_v22  ;;  %v137_v24 = vmul.f32 %v634_v5, %v124_v23 }
 0x141   :  { %v149_v17 = vadd.f32 %v635_v8, %v136_v26  ;;  %v125_v28 = vmul.f32 %v837_v27, %v989_v35 }
 0x142   :  { %v150_v29 = vadd.f32 %v635_v8, %v137_v24  ;;  %v164_v30 = vld [vmem:[#allocation2] sm:$0xff] }
 0x143   :  { %155 = vst.msk [vmem:[#allocation2 + $0x18] sm:$0xff] %vm46_vm0, %v149_v17  ;;  %v138_v32 = vmul.f32 %v634_v5, %v125_v28  ;;  %707 = vmatprep.mubr.msk.f32.mxu1 %vm46_vm0, %v164_v30 }
 0x144   :  { %156 = vst.msk [vmem:[#allocation2 + $0x20] sm:$0xff] %vm46_vm0, %v150_v29 }
 0x145   :  { %v151_v33 = vadd.f32 %v635_v8, %v138_v32 }
 0x146   :  { %v165_v35 = vld [vmem:[#allocation2 + $0x8] sm:$0xff] }
 0x147   :  { %157 = vst.msk [vmem:[#allocation2 + $0x28] sm:$0xff] %vm46_vm0, %v151_v33  ;;  %708 = vmatmul.mubr.msk.f32.vlgmr.msra.gmra.mrb[0].mxu1 %vm46_vm0, %v165_v35  ;;  %v166_v36 = vld [vmem:[#allocation2 + $0x10] sm:$0xff] }
 0x148   :  { %710 = vmatprep.mubr.msk.f32.mxu1 %vm46_vm0, %v166_v36  ;;  %785 = vmatpush3.bf16.msra.mxu1 %v1017_v50  ;;  %v462_v50 = vld [vmem:[%s1169_s7 + $0x38] sm:$0xff] }
 0x149   :  { %787 = vmatprep.subr.bf16.mxu1 %v786_v34  ;;  %v802_v51 = vpack.c.bf16 %v462_v50, %v461_v49 }
 0x14a   :  { %v167_v37 = vld [vmem:[#allocation2 + $0x18] sm:$0xff] }
 0x14b   :  { %711 = vmatmul.mubr.msk.f32.gmra.mrb[2].mxu1 %vm46_vm0, %v167_v37  ;;  %v168_v38 = vld [vmem:[#allocation2 + $0x20] sm:$0xff]  ;;  %803 = vmatprep.subr.bf16.mxu0 %v802_v51 }
 0x14c   :  { %713 = vmatprep.mubr.msk.f32.mxu1 %vm46_vm0, %v168_v38  ;;  %789 = vmatpush3.bf16.msra.mxu1 %v786_v34 }
 0x14d   :  { %805 = vmatpush3.bf16.msra.mxu0 %v802_v51 }
 0x14e   :  { %v169_v39 = vld [vmem:[#allocation2 + $0x28] sm:$0xff]  ;;  %807 = vmatprep.subr.bf16.mxu0 %v806_v54 }
 0x14f   :  { %714 = vmatmul.mubr.msk.f32.gmra.mrb[4].mxu1 %vm46_vm0, %v169_v39 }
 0x150   :  { %724 = vmatprep.mubr.msk.f32.mxu1 %vm46_vm0, %v164_v30 }
 0x151   :  { %809 = vmatpush3.bf16.msra.mxu0 %v806_v54 }
 0x152   :  { %811 = vmatprep.subr.bf16.mxu0 %v810_v57 }
 0x153   :  { %725 = vmatmul.mubr.msk.f32.vlgmr.msra.gmra.mrb[6].mxu1 %vm46_vm0, %v165_v35 }
 0x154   :  { %727 = vmatprep.mubr.msk.f32.mxu1 %vm46_vm0, %v166_v36 }
 0x155   :  { %813 = vmatpush3.bf16.msra.mxu0 %v810_v57 }
 0x156   :  { %815 = vmatprep.subr.bf16.mxu0 %v814_v60 }
 0x157   :  { %728 = vmatmul.mubr.msk.f32.gmra.mrb[8].mxu1 %vm46_vm0, %v167_v37 }
 0x158   :  { %730 = vmatprep.mubr.msk.f32.mxu1 %vm46_vm0, %v168_v38  ;;  %v643_v38 = vld [vmem:[%s1168_s6] ss:$0 sm:$0xff] }
 0x159   :  { %817 = vmatpush3.bf16.msra.mxu0 %v814_v60 }
 0x15a   :  { %819 = vmatprep.subr.bf16.mxu0 %v818_v63 }
 0x15b   :  { %731 = vmatmul.mubr.msk.f32.gmra.mrb[10].mxu1 %vm46_vm0, %v169_v39 }
 0x15d   :  { %821 = vmatpush3.bf16.msra.mxu0 %v818_v63  ;;  %v450_v63 = vld [vmem:[#allocation3 + $0x8] sm:$0xff] }
 0x21a   :  { %v709_v2 = vpop.f32.mrb[0].mxu1 }
 0x21b   :  { %v272_v3 = vadd.f32 %v709_v2, %v636_v1  ;;  %v266_v4 = vpop.f32.mrb[1].mxu1 }
 0x21c   :  { %v267_v5 = vadd.f32 %v636_v1, %v266_v4 }
 0x21d   :  { %v651_v6 = vmul.f32 -1.442695, %v272_v3 }
 0x21e   :  { %v650_v7 = vmul.f32 -1.442695, %v267_v5  ;;  %v712_v8 = vpop.f32.mrb[2].mxu1 }
 0x21f   :  { %838 = vpow2.f32 %v651_v6  ;;  %v282_v9 = vadd.f32 %v712_v8, %v636_v1  ;;  %v276_v10 = vpop.f32.mrb[3].mxu1  ;;  %v451_v6 = vld [vmem:[#allocation3 + $0x10] sm:$0xff] }
 0x220   :  { %840 = vpow2.f32 %v650_v7  ;;  %v277_v11 = vadd.f32 %v636_v1, %v276_v10 }
 0x221   :  { %v653_v12 = vmul.f32 -1.442695, %v282_v9 }
 0x222   :  { %v652_v13 = vmul.f32 -1.442695, %v277_v11  ;;  %v715_v14 = vpop.f32.mrb[4].mxu1 }
 0x223   :  { %842 = vpow2.f32 %v653_v12  ;;  %v292_v15 = vadd.f32 %v715_v14, %v636_v1  ;;  %v286_v18 = vpop.f32.mrb[5].mxu1  ;;  %v453_v12 = vld [vmem:[#allocation3 + $0x20] sm:$0xff]  ;;  %v656_v14 = vld [vmem:[%s1170_s8] ss:$0 sm:$0xff] }
 0x224   :  { %844 = vpow2.f32 %v652_v13  ;;  %v287_v19 = vadd.f32 %v636_v1, %v286_v18 }
 0x225   :  { %v655_v20 = vmul.f32 -1.442695, %v292_v15 }
 0x226   :  { %v654_v16 = vmul.f32 -1.442695, %v287_v19  ;;  %v726_v21 = vpop.f32.mrb[6].mxu1 }
 0x227   :  { %846 = vpow2.f32 %v655_v20  ;;  %v372_v22 = vpop.f32.mrb[7].mxu1  ;;  %v378_v42 = vadd.f32 %v726_v21, %v643_v38 }
 0x228   :  { %848 = vpow2.f32 %v654_v16  ;;  %v373_v43 = vadd.f32 %v643_v38, %v372_v22  ;;  %v601_v16 = vld [vmem:[%s1171_s9 + $0x8] sm:$0xff] }
 0x229   :  { %v839_v23 = vpop.eup %838 }
 0x22a   :  { %v841_v26 = vpop.eup %840  ;;  %v420_v27 = vadd.f32 1.0, %v839_v23  ;;  %v729_v24 = vpop.f32.mrb[8].mxu1  ;;  %v600_v23 = vld [vmem:[%s1171_s9] sm:$0xff] }
 0x22b   :  { %v419_v17 = vadd.f32 1.0, %v841_v26  ;;  %v382_v28 = vpop.f32.mrb[9].mxu1  ;;  %v388_v50 = vadd.f32 %v729_v24, %v643_v38 }
 0x22c   :  { %850 = vrcp.f32 %v420_v27  ;;  %v383_v52 = vadd.f32 %v643_v38, %v382_v28 }
 0x22d   :  { %v843_v29 = vpop.eup %842  ;;  %852 = vrcp.f32 %v419_v17  ;;  %v603_v17 = vld [vmem:[%s1171_s9 + $0x18] sm:$0xff] }
 0x22e   :  { %v845_v30 = vpop.eup %844  ;;  %v422_v31 = vadd.f32 1.0, %v843_v29  ;;  %v732_v25 = vpop.f32.mrb[10].mxu1 }
 0x22f   :  { %v421_v32 = vadd.f32 1.0, %v845_v30  ;;  %v392_v33 = vpop.f32.mrb[11].mxu1  ;;  %v398_v58 = vadd.f32 %v732_v25, %v643_v38 }
 0x230   :  { %854 = vrcp.f32 %v422_v31  ;;  %v393_v60 = vadd.f32 %v643_v38, %v392_v33  ;;  %v602_v31 = vld [vmem:[%s1171_s9 + $0x10] sm:$0xff]  ;;  %v604_v38 = vld [vmem:[%s1171_s9 + $0x20] sm:$0xff] }
 0x231   :  { %v847_v34 = vpop.eup %846  ;;  %856 = vrcp.f32 %v421_v32 }
 0x232   :  { %v849_v35 = vpop.eup %848  ;;  %v424_v36 = vadd.f32 1.0, %v847_v34  ;;  %v605_v34 = vld [vmem:[%s1171_s9 + $0x28] sm:$0xff] }
 0x233   :  { %v423_v37 = vadd.f32 1.0, %v849_v35 }
 0x234   :  { %858 = vrcp.f32 %v424_v36 }
 0x235   :  { %860 = vrcp.f32 %v423_v37 }
 0x236   :  { %v851_v39 = vpop.eup %850 }
 0x237   :  { %v853_v40 = vpop.eup %852  ;;  %v438_v41 = vmul.f32 %v851_v39, %v272_v3 }
 0x238   :  { %v437_v44 = vmul.f32 %v853_v40, %v267_v5  ;;  %v452_v5 = vld [vmem:[#allocation3 + $0x18] sm:$0xff] }
 0x239   :  { %v444_v45 = vmul.f32 %v438_v41, %v378_v42 }
 0x23a   :  { %v855_v46 = vpop.eup %854  ;;  %v443_v47 = vmul.f32 %v437_v44, %v373_v43 }
 0x23b   :  { %v857_v48 = vpop.eup %856  ;;  %v440_v49 = vmul.f32 %v855_v46, %v282_v9 }
 0x23c   :  { %v439_v51 = vmul.f32 %v857_v48, %v277_v11  ;;  %765 = vmatprep.mubr.f32.mxu0 %v443_v47  ;;  %v454_v11 = vld [vmem:[#allocation3 + $0x28] sm:$0xff] }
 0x23d   :  { %v446_v53 = vmul.f32 %v440_v49, %v388_v50  ;;  %766 = vmatmul.mubr.f32.vlgmr.msra.gmra.mrb[0].mxu0 %v444_v45 }
 0x23e   :  { %v859_v54 = vpop.eup %858  ;;  %v445_v55 = vmul.f32 %v439_v51, %v383_v52 }
 0x23f   :  { %v861_v56 = vpop.eup %860  ;;  %v442_v57 = vmul.f32 %v859_v54, %v292_v15 }
 0x240   :  { %v441_v59 = vmul.f32 %v861_v56, %v287_v19  ;;  %768 = vmatprep.mubr.f32.mxu0 %v445_v55 }
 0x241   :  { %v448_v61 = vmul.f32 %v442_v57, %v398_v58  ;;  %769 = vmatmul.mubr.f32.gmra.mrb[2].mxu0 %v446_v53 }
 0x242   :  { %v447_v62 = vmul.f32 %v441_v59, %v393_v60 }
 0x244   :  { %771 = vmatprep.mubr.f32.mxu0 %v447_v62 }
 0x245   :  { %772 = vmatmul.mubr.f32.gmra.mrb[4].mxu0 %v448_v61 }
 0x310   :  { %v767_v1 = vpop.f32.mrb[0].mxu0 }
 0x311   :  { %v567_v2 = vadd.f32 %v767_v1, %v450_v63  ;;  %v537_v3 = vpop.f32.mrb[1].mxu0 }
 0x312   :  { %v566_v4 = vadd.f32 %v537_v3, %v449_v0 }
 0x313   :  { %573 = vst.msk [vmem:[#allocation3 + $0x8] sm:$0xff] %vm46_vm0, %v567_v2 }
 0x314   :  { %572 = vst.msk [vmem:[#allocation3] sm:$0xff] %vm46_vm0, %v566_v4  ;;  %v770_v7 = vpop.f32.mrb[2].mxu0 }
 0x315   :  { %v569_v8 = vadd.f32 %v770_v7, %v452_v5  ;;  %v547_v9 = vpop.f32.mrb[3].mxu0 }
 0x316   :  { %v568_v10 = vadd.f32 %v547_v9, %v451_v6 }
 0x317   :  { %575 = vst.msk [vmem:[#allocation3 + $0x18] sm:$0xff] %vm46_vm0, %v569_v8 }
 0x318   :  { %574 = vst.msk [vmem:[#allocation3 + $0x10] sm:$0xff] %vm46_vm0, %v568_v10  ;;  %v773_v13 = vpop.f32.mrb[4].mxu0 }
 0x319   :  { %v571_v15 = vadd.f32 %v773_v13, %v454_v11  ;;  %v557_v18 = vpop.f32.mrb[5].mxu0 }
 0x31a   :  { %v570_v19 = vadd.f32 %v557_v18, %v453_v12  ;;  %v582_v20 = vld [vmem:[#allocation3 + $0x8] sm:$0xff] }
 0x31b   :  { %577 = vst.msk [vmem:[#allocation3 + $0x28] sm:$0xff] %vm46_vm0, %v571_v15  ;;  %v581_v21 = vld [vmem:[#allocation3] sm:$0xff]  ;;  %v595_v22 = vadd.f32 %v656_v14, %v582_v20 }
 0x31c   :  { %576 = vst.msk [vmem:[#allocation3 + $0x20] sm:$0xff] %vm46_vm0, %v570_v19  ;;  %v594_v26 = vadd.f32 %v656_v14, %v581_v21 }
 0x31d   :  { %v607_v27 = vadd.f32 %v601_v16, %v595_v22 }
 0x31e   :  { %v584_v24 = vld [vmem:[#allocation3 + $0x18] sm:$0xff]  ;;  %v606_v28 = vadd.f32 %v600_v23, %v594_v26 }
 0x31f   :  { %v583_v29 = vld [vmem:[#allocation3 + $0x10] sm:$0xff]  ;;  %v597_v30 = vadd.f32 %v656_v14, %v584_v24  ;;  %613 = vst.msk [vmem:[#allocation4 + $0x8] sm:$0xff] %vm46_vm0, %v607_v27 }
 0x320   :  { %v596_v25 = vadd.f32 %v656_v14, %v583_v29  ;;  %612 = vst.msk [vmem:[#allocation4] sm:$0xff] %vm46_vm0, %v606_v28 }
 0x321   :  { %v609_v32 = vadd.f32 %v603_v17, %v597_v30 }
 0x322   :  { %v586_v33 = vld [vmem:[#allocation3 + $0x28] sm:$0xff]  ;;  %v608_v35 = vadd.f32 %v602_v31, %v596_v25 }
 0x323   :  { %v585_v36 = vld [vmem:[#allocation3 + $0x20] sm:$0xff]  ;;  %v599_v37 = vadd.f32 %v656_v14, %v586_v33  ;;  %615 = vst.msk [vmem:[#allocation4 + $0x18] sm:$0xff] %vm46_vm0, %v609_v32 }
 0x324   :  { %v598_v39 = vadd.f32 %v656_v14, %v585_v36  ;;  %614 = vst.msk [vmem:[#allocation4 + $0x10] sm:$0xff] %vm46_vm0, %v608_v35 }
 0x325   :  { %v611_v40 = vadd.f32 %v605_v34, %v599_v37 }
 0x326   :  { %v610_v41 = vadd.f32 %v604_v38, %v598_v39 }
 0x327   :  { %617 = vst.msk [vmem:[#allocation4 + $0x28] sm:$0xff] %vm46_vm0, %v611_v40 }
 0x328   :  { %616 = vst.msk [vmem:[#allocation4 + $0x20] sm:$0xff] %vm46_vm0, %v610_v41 }
 0x329   :  { %873 = shalt.err (!%p870_p4)
}
 0x32a   :  { %s874_s5 = scalar_lea.hbm %s1172_s10, 768 }
 0x32b   :  { %p875_p5 = scmp.ne.s32.totalorder %s1172_s10, %s874_s5  ;;  %p878_p6 = scmp.lt.u32.totalorder %s874_s5, %s1172_s10 }
 0x32d   :  { %p880_p7 = pnand %p878_p6, %p875_p5 }
 0x32f   :  { %883 = shalt.err (!%p880_p7)
}
 0x330   :  { %s888_s0 = smov 128   ;;  %s889_s25 = smov 8  }
 0x331   :  { %629 = dma.vmem_to_hbm [thread:$0]  %s624_s2, 768, %s1172_s10, [#allocation5], %s888_s0, %s888_s0, %s889_s25  }
 0x332   :  { %884 = dma.done.wait [#allocation5], 768  }
 0x333   :  { %885 = vsyncadd [#allocation5], 4294966528 }
 0x334   :  { %633 = vsyncpa [#allocation5], 1 }

</bundles_post_ra>
